<compile_context>
chip_gen: v5e
topology: v5e:2x2
jax: 0.10.0
libtpu: 0.0.40
codegen_flags: <defaults>
</compile_context>

<pallas_src>
import jax
import jax.numpy as jnp
from jax.experimental import pallas as pl
from jax.experimental.pallas import tpu as pltpu


NOISE_DIM = 100
OUT_SIZE = 784


def _round_up(x, m):
    return (x + m - 1) // m * m


def _leaky_relu(x, slope=0.2):
    return jnp.where(x >= 0, x, slope * x)


def generator_kernel(x_ref,
                     w1_ref, b1_ref,
                     w2_ref, b2_ref,
                     w3_ref, b3_ref,
                     w4_ref, b4_ref,
                     o_ref):
    # Layer 1: (TB, 128) @ (128, 256) + (1, 256)  -> leaky_relu
    h = jnp.dot(x_ref[...].astype(jnp.bfloat16), w1_ref[...],
                preferred_element_type=jnp.float32)
    h = _leaky_relu(h + b1_ref[...])

    # Layer 2: (TB, 256) @ (256, 512) + (1, 512)  -> leaky_relu
    h = jnp.dot(h.astype(jnp.bfloat16), w2_ref[...],
                preferred_element_type=jnp.float32)
    h = _leaky_relu(h + b2_ref[...])

    # Layer 3: (TB, 512) @ (512, 1024) + (1, 1024) -> leaky_relu
    h = jnp.dot(h.astype(jnp.bfloat16), w3_ref[...],
                preferred_element_type=jnp.float32)
    h = _leaky_relu(h + b3_ref[...])

    # Layer 4: (TB, 1024) @ (1024, 896) + (1, 896) -> tanh
    h = jnp.dot(h.astype(jnp.bfloat16), w4_ref[...],
                preferred_element_type=jnp.float32)
    h = jnp.tanh(h + b4_ref[...])

    o_ref[...] = h.astype(o_ref.dtype)


def init_params(key, noise_dim=NOISE_DIM, out_size=OUT_SIZE):
    """Logical f32 params mimicking nn.Linear init (uniform +-1/sqrt(fan_in))."""
    dims = [(noise_dim, 256), (256, 512), (512, 1024), (1024, out_size)]
    params = []
    for (fan_in, fan_out) in dims:
        key, kw, kb = jax.random.split(key, 3)
        bound = 1.0 / jnp.sqrt(fan_in)
        w = jax.random.uniform(kw, (fan_in, fan_out), jnp.float32, -bound, bound)
        b = jax.random.uniform(kb, (1, fan_out), jnp.float32, -bound, bound)
        params.append((w, b))
    return params


def prepare_params(params):
    """Zero-pad every dim to a 128 multiple, cast weights to bf16, biases f32."""
    prepped = []
    for (w, b) in params:
        fi, fo = w.shape
        fi_p, fo_p = _round_up(fi, 128), _round_up(fo, 128)
        w_p = jnp.zeros((fi_p, fo_p), jnp.bfloat16)
        w_p = w_p.at[:fi, :fo].set(w.astype(jnp.bfloat16))
        b_p = jnp.zeros((1, fo_p), jnp.float32)
        b_p = b_p.at[:, :fo].set(b)
        prepped.append((w_p, b_p))
    return prepped


def generator_forward(x, prepped_params, *, out_size=OUT_SIZE, tb_max=512):
    """x: (B, noise_dim) f32 -> (B, 1, 28, 28) f32."""
    b_size, noise_dim = x.shape
    (w1, b1), (w2, b2), (w3, b3), (w4, b4) = prepped_params
    k_pad = w1.shape[0]           # padded noise dim (128)
    n_pad = w4.shape[1]           # padded out size (896)

    # Batch tile: multiple of 8 sublanes, capped so VMEM stays well under the
    # 32 MiB budget (v7x-safe).  Pad B to a whole number of tiles.
    tb = min(tb_max, _round_up(b_size, 8))
    b_pad = _round_up(b_size, tb)

    x_p = jnp.zeros((b_pad, k_pad), jnp.float32)
    x_p = x_p.at[:b_size, :noise_dim].set(x)

    def resident(arr):
        # Full-array block with constant index_map: loaded once, stays in VMEM.
        return pl.BlockSpec(arr.shape, lambda i: (0, 0))

    out_padded = pl.pallas_call(
        generator_kernel,
        out_shape=jax.ShapeDtypeStruct((b_pad, n_pad), jnp.float32),
        grid=(b_pad // tb,),
        in_specs=[
            pl.BlockSpec((tb, k_pad), lambda i: (i, 0)),   # x: tiled over batch
            resident(w1), resident(b1),
            resident(w2), resident(b2),
            resident(w3), resident(b3),
            resident(w4), resident(b4),
        ],
        out_specs=pl.BlockSpec((tb, n_pad), lambda i: (i, 0)),
        compiler_params=pltpu.CompilerParams(
            dimension_semantics=("parallel",),
            vmem_limit_bytes=32 << 20,
        ),
    )(x_p, w1, b1, w2, b2, w3, b3, w4, b4)

    return out_padded[:b_size, :out_size].reshape(b_size, 1, 28, 28)


def reference_forward(x, params):
    """Pure-JAX reference with the same bf16-at-dot-inputs numerics."""
    h = x
    for i, (w, b) in enumerate(params):
        h = jnp.dot(h.astype(jnp.bfloat16), w.astype(jnp.bfloat16),
                    preferred_element_type=jnp.float32) + b
        if i < 3:
            h = jnp.where(h >= 0, h, 0.2 * h)
    h = jnp.tanh(h)
    return h.reshape(x.shape[0], 1, 28, 28)


if __name__ == "__main__":
    key = jax.random.PRNGKey(0)
    k_x, k_p = jax.random.split(key)

    batch = 8
    x = jax.random.normal(k_x, (batch, NOISE_DIM), jnp.float32)

    params = init_params(k_p)
    prepped = prepare_params(params)

    out = generator_forward(x, prepped)
    out = jax.block_until_ready(out)

    ref = reference_forward(x, params)
    assert out.shape == (batch, 1, 28, 28), out.shape
    assert jnp.allclose(out, ref, atol=2e-2, rtol=2e-2), "mismatch vs reference"

    print("KERNEL_OK")
</pallas_src>

<mosaic_0001>
module attributes {stable_mosaic.version = 11 : i64} {
  func.func @generator_kernel(%arg0: i32, %arg1: memref<8x128xf32, #tpu.memory_space<vmem>>, %arg2: memref<128x256xbf16, #tpu.memory_space<vmem>>, %arg3: memref<1x256xf32, #tpu.memory_space<vmem>>, %arg4: memref<256x512xbf16, #tpu.memory_space<vmem>>, %arg5: memref<1x512xf32, #tpu.memory_space<vmem>>, %arg6: memref<512x1024xbf16, #tpu.memory_space<vmem>>, %arg7: memref<1x1024xf32, #tpu.memory_space<vmem>>, %arg8: memref<1024x896xbf16, #tpu.memory_space<vmem>>, %arg9: memref<1x896xf32, #tpu.memory_space<vmem>>, %arg10: memref<8x896xf32, #tpu.memory_space<vmem>>) attributes {dimension_semantics = [#tpu.dimension_semantics<parallel>], iteration_bounds = array<i64: 1>, scalar_prefetch = 0 : i64, scratch_operands = 0 : i64, tpu.core_type = #tpu.core_type<tc>, window_params = [{transform_indices = @transform_0, window_bounds = array<i64: 8, 128>}, {pipeline_mode = #tpu.pipeline_mode<synchronous>, transform_indices = @transform_1, window_bounds = array<i64: 128, 256>}, {pipeline_mode = #tpu.pipeline_mode<synchronous>, transform_indices = @transform_2, window_bounds = array<i64: 1, 256>}, {pipeline_mode = #tpu.pipeline_mode<synchronous>, transform_indices = @transform_3, window_bounds = array<i64: 256, 512>}, {pipeline_mode = #tpu.pipeline_mode<synchronous>, transform_indices = @transform_4, window_bounds = array<i64: 1, 512>}, {pipeline_mode = #tpu.pipeline_mode<synchronous>, transform_indices = @transform_5, window_bounds = array<i64: 512, 1024>}, {pipeline_mode = #tpu.pipeline_mode<synchronous>, transform_indices = @transform_6, window_bounds = array<i64: 1, 1024>}, {pipeline_mode = #tpu.pipeline_mode<synchronous>, transform_indices = @transform_7, window_bounds = array<i64: 1024, 896>}, {pipeline_mode = #tpu.pipeline_mode<synchronous>, transform_indices = @transform_8, window_bounds = array<i64: 1, 896>}, {transform_indices = @transform_9, window_bounds = array<i64: 8, 896>}]} {
    %c0 = arith.constant 0 : index
    %c0_0 = arith.constant 0 : index
    %0 = vector.load %arg1[%c0, %c0_0] : memref<8x128xf32, #tpu.memory_space<vmem>>, vector<8x128xf32>
    %1 = arith.truncf %0 : vector<8x128xf32> to vector<8x128xbf16>
    %c0_1 = arith.constant 0 : index
    %c0_2 = arith.constant 0 : index
    %2 = vector.load %arg2[%c0_1, %c0_2] : memref<128x256xbf16, #tpu.memory_space<vmem>>, vector<128x256xbf16>
    %cst = arith.constant dense<0.000000e+00> : vector<8x256xf32>
    %3 = tpu.matmul %1, %2, %cst {dimension_numbers = #tpu.dot_dimension_numbers<[1], [0], [0], [1], [0, 0, 1, 1], [], []>} : vector<8x128xbf16>, vector<128x256xbf16>, vector<8x256xf32> -> vector<8x256xf32>
    %c0_3 = arith.constant 0 : index
    %c0_4 = arith.constant 0 : index
    %4 = vector.load %arg3[%c0_3, %c0_4] : memref<1x256xf32, #tpu.memory_space<vmem>>, vector<1x256xf32>
    %5 = vector.broadcast %4 : vector<1x256xf32> to vector<8x256xf32>
    %6 = arith.addf %3, %5 : vector<8x256xf32>
    %cst_5 = arith.constant 0.000000e+00 : f32
    %7 = vector.broadcast %cst_5 : f32 to vector<8x256xf32>
    %8 = arith.cmpf oge, %6, %7 : vector<8x256xf32>
    %cst_6 = arith.constant 2.000000e-01 : f32
    %9 = vector.broadcast %cst_6 : f32 to vector<8x256xf32>
    %10 = arith.mulf %9, %6 : vector<8x256xf32>
    %11 = arith.select %8, %6, %10 : vector<8x256xi1>, vector<8x256xf32>
    %12 = arith.truncf %11 : vector<8x256xf32> to vector<8x256xbf16>
    %c0_7 = arith.constant 0 : index
    %c0_8 = arith.constant 0 : index
    %13 = vector.load %arg4[%c0_7, %c0_8] : memref<256x512xbf16, #tpu.memory_space<vmem>>, vector<256x512xbf16>
    %cst_9 = arith.constant dense<0.000000e+00> : vector<8x512xf32>
    %14 = tpu.matmul %12, %13, %cst_9 {dimension_numbers = #tpu.dot_dimension_numbers<[1], [0], [0], [1], [0, 0, 1, 1], [], []>} : vector<8x256xbf16>, vector<256x512xbf16>, vector<8x512xf32> -> vector<8x512xf32>
    %c0_10 = arith.constant 0 : index
    %c0_11 = arith.constant 0 : index
    %15 = vector.load %arg5[%c0_10, %c0_11] : memref<1x512xf32, #tpu.memory_space<vmem>>, vector<1x512xf32>
    %16 = vector.broadcast %15 : vector<1x512xf32> to vector<8x512xf32>
    %17 = arith.addf %14, %16 : vector<8x512xf32>
    %cst_12 = arith.constant 0.000000e+00 : f32
    %18 = vector.broadcast %cst_12 : f32 to vector<8x512xf32>
    %19 = arith.cmpf oge, %17, %18 : vector<8x512xf32>
    %cst_13 = arith.constant 2.000000e-01 : f32
    %20 = vector.broadcast %cst_13 : f32 to vector<8x512xf32>
    %21 = arith.mulf %20, %17 : vector<8x512xf32>
    %22 = arith.select %19, %17, %21 : vector<8x512xi1>, vector<8x512xf32>
    %23 = arith.truncf %22 : vector<8x512xf32> to vector<8x512xbf16>
    %c0_14 = arith.constant 0 : index
    %c0_15 = arith.constant 0 : index
    %24 = vector.load %arg6[%c0_14, %c0_15] : memref<512x1024xbf16, #tpu.memory_space<vmem>>, vector<512x1024xbf16>
    %cst_16 = arith.constant dense<0.000000e+00> : vector<8x1024xf32>
    %25 = tpu.matmul %23, %24, %cst_16 {dimension_numbers = #tpu.dot_dimension_numbers<[1], [0], [0], [1], [0, 0, 1, 1], [], []>} : vector<8x512xbf16>, vector<512x1024xbf16>, vector<8x1024xf32> -> vector<8x1024xf32>
    %c0_17 = arith.constant 0 : index
    %c0_18 = arith.constant 0 : index
    %26 = vector.load %arg7[%c0_17, %c0_18] : memref<1x1024xf32, #tpu.memory_space<vmem>>, vector<1x1024xf32>
    %27 = vector.broadcast %26 : vector<1x1024xf32> to vector<8x1024xf32>
    %28 = arith.addf %25, %27 : vector<8x1024xf32>
    %cst_19 = arith.constant 0.000000e+00 : f32
    %29 = vector.broadcast %cst_19 : f32 to vector<8x1024xf32>
    %30 = arith.cmpf oge, %28, %29 : vector<8x1024xf32>
    %cst_20 = arith.constant 2.000000e-01 : f32
    %31 = vector.broadcast %cst_20 : f32 to vector<8x1024xf32>
    %32 = arith.mulf %31, %28 : vector<8x1024xf32>
    %33 = arith.select %30, %28, %32 : vector<8x1024xi1>, vector<8x1024xf32>
    %34 = arith.truncf %33 : vector<8x1024xf32> to vector<8x1024xbf16>
    %c0_21 = arith.constant 0 : index
    %c0_22 = arith.constant 0 : index
    %35 = vector.load %arg8[%c0_21, %c0_22] : memref<1024x896xbf16, #tpu.memory_space<vmem>>, vector<1024x896xbf16>
    %cst_23 = arith.constant dense<0.000000e+00> : vector<8x896xf32>
    %36 = tpu.matmul %34, %35, %cst_23 {dimension_numbers = #tpu.dot_dimension_numbers<[1], [0], [0], [1], [0, 0, 1, 1], [], []>} : vector<8x1024xbf16>, vector<1024x896xbf16>, vector<8x896xf32> -> vector<8x896xf32>
    %c0_24 = arith.constant 0 : index
    %c0_25 = arith.constant 0 : index
    %37 = vector.load %arg9[%c0_24, %c0_25] : memref<1x896xf32, #tpu.memory_space<vmem>>, vector<1x896xf32>
    %38 = vector.broadcast %37 : vector<1x896xf32> to vector<8x896xf32>
    %39 = arith.addf %36, %38 : vector<8x896xf32>
    %40 = math.tanh %39 : vector<8x896xf32>
    %c0_26 = arith.constant 0 : index
    %c0_27 = arith.constant 0 : index
    %41 = vector.load %arg10[%c0_26, %c0_27] : memref<8x896xf32, #tpu.memory_space<vmem>>, vector<8x896xf32>
    tpu.vector_store %arg10[%c0_26, %c0_27], %40 {strides = array<i32>} : memref<8x896xf32, #tpu.memory_space<vmem>>, vector<8x896xf32>,
    return
  }
  func.func @transform_0(%arg0: i32) -> (i32, i32) {
    %c0_i32 = arith.constant 0 : i32
    %c0_i32_0 = arith.constant 0 : i32
    return %arg0, %c0_i32 : i32, i32
  }
  func.func @transform_1(%arg0: i32) -> (i32, i32) {
    %c0_i32 = arith.constant 0 : i32
    %c0_i32_0 = arith.constant 0 : i32
    %c0_i32_1 = arith.constant 0 : i32
    return %c0_i32, %c0_i32_0 : i32, i32
  }
  func.func @transform_2(%arg0: i32) -> (i32, i32) {
    %c0_i32 = arith.constant 0 : i32
    %c0_i32_0 = arith.constant 0 : i32
    %c0_i32_1 = arith.constant 0 : i32
    return %c0_i32, %c0_i32_0 : i32, i32
  }
  func.func @transform_3(%arg0: i32) -> (i32, i32) {
    %c0_i32 = arith.constant 0 : i32
    %c0_i32_0 = arith.constant 0 : i32
    %c0_i32_1 = arith.constant 0 : i32
    return %c0_i32, %c0_i32_0 : i32, i32
  }
  func.func @transform_4(%arg0: i32) -> (i32, i32) {
    %c0_i32 = arith.constant 0 : i32
    %c0_i32_0 = arith.constant 0 : i32
    %c0_i32_1 = arith.constant 0 : i32
    return %c0_i32, %c0_i32_0 : i32, i32
  }
  func.func @transform_5(%arg0: i32) -> (i32, i32) {
    %c0_i32 = arith.constant 0 : i32
    %c0_i32_0 = arith.constant 0 : i32
    %c0_i32_1 = arith.constant 0 : i32
    return %c0_i32, %c0_i32_0 : i32, i32
  }
  func.func @transform_6(%arg0: i32) -> (i32, i32) {
    %c0_i32 = arith.constant 0 : i32
    %c0_i32_0 = arith.constant 0 : i32
    %c0_i32_1 = arith.constant 0 : i32
    return %c0_i32, %c0_i32_0 : i32, i32
  }
  func.func @transform_7(%arg0: i32) -> (i32, i32) {
    %c0_i32 = arith.constant 0 : i32
    %c0_i32_0 = arith.constant 0 : i32
    %c0_i32_1 = arith.constant 0 : i32
    return %c0_i32, %c0_i32_0 : i32, i32
  }
  func.func @transform_8(%arg0: i32) -> (i32, i32) {
    %c0_i32 = arith.constant 0 : i32
    %c0_i32_0 = arith.constant 0 : i32
    %c0_i32_1 = arith.constant 0 : i32
    return %c0_i32, %c0_i32_0 : i32, i32
  }
  func.func @transform_9(%arg0: i32) -> (i32, i32) {
    %c0_i32 = arith.constant 0 : i32
    %c0_i32_0 = arith.constant 0 : i32
    return %arg0, %c0_i32 : i32, i32
  }
}

</mosaic_0001>

<bundles_post_ra>
// kernel: tpu_custom_call.1
= control target key start
LH: loop header
LB: loop body
LE: loop exit
PB: predicated region body
PF: predicated region fallthrough
CT: control target
= control target key end

     0   :  { %14 = vsyncpa [#allocation3], 0  ;;  %s10991_s0 = inlined_call_operand.hbm [shape: f32[8,128], index: 0, kind: input, shape index: {}]   ;;  %s10992_s1 = inlined_call_operand.hbm [shape: bf16[128,256], index: 1, kind: input, shape index: {}]   ;;  %s10993_s2 = inlined_call_operand.hbm [shape: f32[1,256], index: 2, kind: input, shape index: {}]   ;;  %s10994_s3 = inlined_call_operand.hbm [shape: bf16[256,512], index: 3, kind: input, shape index: {}]   ;;  %s10995_s4 = inlined_call_operand.hbm [shape: f32[1,512], index: 4, kind: input, shape index: {}]   ;;  %s10996_s5 = inlined_call_operand.hbm [shape: bf16[512,1024], index: 5, kind: input, shape index: {}]   ;;  %s10997_s6 = inlined_call_operand.hbm [shape: f32[1,1024], index: 6, kind: input, shape index: {}]   ;;  %s10998_s7 = inlined_call_operand.hbm [shape: bf16[1024,896], index: 7, kind: input, shape index: {}]   ;;  %s10999_s8 = inlined_call_operand.hbm [shape: f32[1,896], index: 8, kind: input, shape index: {}]   ;;  %s11000_s9 = inlined_call_operand.hbm [shape: f32[8,896], index: 9, kind: output, shape index: {}]  }
   0x1   :  { %15 = vsyncpa [#allocation6], 0 }
   0x2   :  { %16 = vsyncpa [#allocation9], 0 }
   0x3   :  { %17 = vsyncpa [#allocation12], 0 }
   0x4   :  { %18 = vsyncpa [#allocation15], 0  ;;  %s35_s11 = sshll.u32 %s10992_s1, 4  ;;  %s36_s11 = int_to_ptr.hbm [resolvable:$true] %s35_s11 }
   0x5   :  { %19 = vsyncpa [#allocation4], 0  ;;  %s10619_s12 = smov [#allocation5]   ;;  %s59_s16 = sshll.u32 %s10994_s3, 4  ;;  %s60_s16 = int_to_ptr.hbm [resolvable:$true] %s59_s16 }
   0x6   :  { %s37_s13 = sshll.u32 %s10619_s12, 4  ;;  %s10620_s17 = smov 128   ;;  %s38_s13 = int_to_ptr.vmem [resolvable:$true] %s37_s13 }
   0x7   :  { %s10621_s18 = smov 8   ;;  %s10622_s19 = smov [#allocation8]  }
   0x8   :  { %43 = dma.hbm_to_vmem [thread:$0]  %s36_s11, 2048, %s38_s13, [#allocation6], %s10620_s17, %s10620_s17, %s10621_s18  }
   0x9   :  { %s61_s20 = sshll.u32 %s10622_s19, 4  ;;  %s10623_s21 = smov 256   ;;  %s62_s20 = int_to_ptr.vmem [resolvable:$true] %s61_s20 }
   0xa   :  { %s10624_s22 = smov 16   ;;  %s83_s24 = sshll.u32 %s10996_s5, 4  ;;  %s84_s24 = int_to_ptr.hbm [resolvable:$true] %s83_s24 }
   0xb   :  { %67 = dma.hbm_to_vmem [thread:$0]  %s60_s16, 8192, %s62_s20, [#allocation9], %s10623_s21, %s10623_s21, %s10624_s22  }
   0xc   :  { %s10625_s25 = smov [#allocation11]   ;;  %s107_s28 = sshll.u32 %s10998_s7, 4  ;;  %s108_s28 = int_to_ptr.hbm [resolvable:$true] %s107_s28 }
   0xd   :  { %s85_s26 = sshll.u32 %s10625_s25, 4  ;;  %s10626_s29 = smov 512   ;;  %s86_s26 = int_to_ptr.vmem [resolvable:$true] %s85_s26 }
   0xe   :  { %s10627_s30 = smov 32   ;;  %s10628_s10 = smov [#allocation14]  }
   0xf   :  { %91 = dma.hbm_to_vmem [thread:$0]  %s84_s24, 32768, %s86_s26, [#allocation12], %s10626_s29, %s10626_s29, %s10627_s30  }
  0x10   :  { %s109_s11 = sshll.u32 %s10628_s10, 4  ;;  %s10629_s12 = smov 448   ;;  %s110_s11 = int_to_ptr.vmem [resolvable:$true] %s109_s11 }
  0x11   :  { %s10630_s13 = smov 28   ;;  %s25_s15 = sshll.u32 %s10991_s0, 4  ;;  %s26_s15 = int_to_ptr.hbm [resolvable:$true] %s25_s15 }
  0x12   :  { %115 = dma.hbm_to_vmem [thread:$0]  %s108_s28, 57344, %s110_s11, [#allocation15], %s10629_s12, %s10629_s12, %s10630_s13  }
  0x13   :  { %s10631_s16 = smov [#allocation2]   ;;  %s49_s19 = sshll.u32 %s10993_s2, 4  ;;  %s50_s19 = int_to_ptr.hbm [resolvable:$true] %s49_s19 }
  0x14   :  { %s27_s17 = sshll.u32 %s10631_s16, 4  ;;  %s10632_s20 = smov [#allocation7]   ;;  %s28_s17 = int_to_ptr.vmem [resolvable:$true] %s27_s17 }
  0x15   :  { %30 = dma.hbm_to_vmem [thread:$0]  %s26_s15, 128, %s28_s17, [#allocation3]  }
  0x16   :  { %s51_s21 = sshll.u32 %s10632_s20, 4  ;;  %s73_s23 = sshll.u32 %s10995_s4, 4  ;;  %s52_s21 = int_to_ptr.vmem [resolvable:$true] %s51_s21  ;;  %s74_s23 = int_to_ptr.hbm [resolvable:$true] %s73_s23 }
  0x17   :  { %54 = dma.hbm_to_vmem [thread:$0]  %s50_s19, 32, %s52_s21, [#allocation6]  }
  0x18   :  { %s97_s25 = sshll.u32 %s10997_s6, 4  ;;  %s10633_s26 = smov [#allocation10]   ;;  %s98_s25 = int_to_ptr.hbm [resolvable:$true] %s97_s25 }
  0x19   :  { %s75_s27 = sshll.u32 %s10633_s26, 4  ;;  %s10634_s2 = smov [#allocation13]   ;;  %s76_s27 = int_to_ptr.vmem [resolvable:$true] %s75_s27 }
  0x1a   :  { %78 = dma.hbm_to_vmem [thread:$0]  %s74_s23, 64, %s76_s27, [#allocation9]  }
  0x1b   :  { %s99_s3 = sshll.u32 %s10634_s2, 4  ;;  %s121_s30 = sshll.u32 %s10999_s8, 4  ;;  %s100_s3 = int_to_ptr.vmem [resolvable:$true] %s99_s3  ;;  %s122_s30 = int_to_ptr.hbm [resolvable:$true] %s121_s30 }
  0x1c   :  { %102 = dma.hbm_to_vmem [thread:$0]  %s98_s25, 128, %s100_s3, [#allocation12]  }
  0x1d   :  { %s10635_s4 = smov [#allocation16]  }
  0x1e   :  { %s123_s10 = sshll.u32 %s10635_s4, 4  ;;  %s124_s10 = int_to_ptr.vmem [resolvable:$true] %s123_s10 }
  0x1f   :  { %126 = dma.hbm_to_vmem [thread:$0]  %s122_s30, 112, %s124_s10, [#allocation15]  }
  0x20   :  { %10607 = dma.done.wait [#allocation3], 128  }
  0x21   :  { %10608 = vsyncadd [#allocation3], 4294967168 }
  0x22   :  { %10609 = dma.done.wait [#allocation6], 2080  }
  0x23   :  { %10610 = vsyncadd [#allocation6], 4294965216 }
  0x24   :  { %10611 = dma.done.wait [#allocation9], 8256  }
  0x25   :  { %10612 = vsyncadd [#allocation9], 4294959040 }
  0x26   :  { %10613 = dma.done.wait [#allocation12], 32896  }
  0x27   :  { %10614 = vsyncadd [#allocation12], 4294934400 }
  0x28   :  { %10615 = dma.done.wait [#allocation15], 57456  }
  0x29   :  { %10616 = vsyncadd [#allocation15], 4294909840  ;;  %v6470_v0 = vld [vmem:[#allocation5 + $0x70] sm:$0xf]  ;;  %v9563_v1 = vld [vmem:[#allocation5 + $0x74] sm:$0xf0] }
  0x2a   :  { %v9562_v2 = vld [vmem:[#allocation5 + $0x74] sm:$0xf]  ;;  %v6471_v3 = vor.u32 %v9563_v1, %v6470_v0  ;;  %v6472_v4 = vld [vmem:[#allocation5 + $0x78] sm:$0xf0]  ;;  %v6462_v5 = vld [vmem:[#allocation5 + $0x60] sm:$0xf] }
  0x2b   :  { %v9561_v6 = vld [vmem:[#allocation5 + $0x64] sm:$0xf0]  ;;  %v6475_v7 = vor.u32 %v9562_v2, %v6472_v4  ;;  %v9560_v8 = vld [vmem:[#allocation5 + $0x64] sm:$0xf]  ;;  %v6464_v9 = vld [vmem:[#allocation5 + $0x68] sm:$0xf0] }
  0x2c   :  { %267 = vmatpush.bf16.msra.mxu0 %v6471_v3  ;;  %v6463_v10 = vor.u32 %v9561_v6, %v6462_v5  ;;  %v6467_v11 = vor.u32 %v9560_v8, %v6464_v9  ;;  %v6454_v12 = vld [vmem:[#allocation5 + $0x50] sm:$0xf]  ;;  %v9559_v13 = vld [vmem:[#allocation5 + $0x54] sm:$0xf0]  ;;  %v9558_v14 = vld [vmem:[#allocation5 + $0x54] sm:$0xf] }
  0x2d   :  { %280 = vmatpush.bf16.msra.mxu1 %v6475_v7  ;;  %v6456_v15 = vld [vmem:[#allocation5 + $0x58] sm:$0xf0]  ;;  %v6455_v16 = vor.u32 %v9559_v13, %v6454_v12  ;;  %v6446_v18 = vld [vmem:[#allocation5 + $0x40] sm:$0xf]  ;;  %v9557_v19 = vld [vmem:[#allocation5 + $0x44] sm:$0xf0] }
  0x2e   :  { %v6459_v17 = vor.u32 %v9558_v14, %v6456_v15  ;;  %v9556_v20 = vld [vmem:[#allocation5 + $0x44] sm:$0xf]  ;;  %v6448_v21 = vld [vmem:[#allocation5 + $0x48] sm:$0xf0]  ;;  %v6447_v22 = vor.u32 %v9557_v19, %v6446_v18  ;;  %v9594_v24 = vld [vmem:[#allocation8 + $0xec] sm:$0xf0] }
  0x2f   :  { %v6590_v23 = vld [vmem:[#allocation8 + $0xe0] sm:$0xf]  ;;  %v6451_v26 = vor.u32 %v9556_v20, %v6448_v21  ;;  %v6438_v27 = vld [vmem:[#allocation5 + $0x30] sm:$0xf]  ;;  %v9555_v28 = vld [vmem:[#allocation5 + $0x34] sm:$0xf0] }
  0x30   :  { %268 = vmatpush.bf16.msra.mxu0 %v6463_v10  ;;  %v6718_v25 = vld [vmem:[#allocation8 + $0x1e0] sm:$0xf]  ;;  %v6591_v29 = vor.u32 %v9594_v24, %v6590_v23  ;;  %v9626_v30 = vld [vmem:[#allocation8 + $0x1ec] sm:$0xf0]  ;;  %v6440_v32 = vld [vmem:[#allocation5 + $0x38] sm:$0xf0]  ;;  %v6439_v38 = vor.u32 %v9555_v28, %v6438_v27 }
  0x31   :  { %281 = vmatpush.bf16.msra.mxu1 %v6467_v11  ;;  %v9554_v31 = vld [vmem:[#allocation5 + $0x34] sm:$0xf]  ;;  %v6719_v33 = vor.u32 %v9626_v30, %v6718_v25  ;;  %v6574_v34 = vld [vmem:[#allocation8 + $0xc0] sm:$0xf]  ;;  %v9553_v40 = vld [vmem:[#allocation5 + $0x24] sm:$0xf0] }
  0x32   :  { %695 = vmatpush.bf16.msra.mxu2 %v6591_v29  ;;  %v9590_v35 = vld [vmem:[#allocation8 + $0xcc] sm:$0xf0]  ;;  %v6702_v36 = vld [vmem:[#allocation8 + $0x1c0] sm:$0xf]  ;;  %v6443_v43 = vor.u32 %v9554_v31, %v6440_v32  ;;  %v6432_v47 = vld [vmem:[#allocation5 + $0x28] sm:$0xf0] }
  0x33   :  { %v9622_v37 = vld [vmem:[#allocation8 + $0x1cc] sm:$0xf0]  ;;  %v6430_v39 = vld [vmem:[#allocation5 + $0x20] sm:$0xf]  ;;  %708 = vmatpush.bf16.msra.mxu3 %v6719_v33  ;;  %v6575_v41 = vor.u32 %v9590_v35, %v6574_v34  ;;  %v9552_v44 = vld [vmem:[#allocation5 + $0x24] sm:$0xf] }
  0x34   :  { %269 = vmatpush.bf16.msra.mxu0 %v6455_v16  ;;  %v6703_v42 = vor.u32 %v9622_v37, %v6702_v36  ;;  %v6558_v45 = vld [vmem:[#allocation8 + $0xa0] sm:$0xf]  ;;  %v9586_v46 = vld [vmem:[#allocation8 + $0xac] sm:$0xf0]  ;;  %v6431_v51 = vor.u32 %v9553_v40, %v6430_v39  ;;  %v6435_v56 = vor.u32 %v9552_v44, %v6432_v47  ;;  %v9551_v57 = vld [vmem:[#allocation5 + $0x14] sm:$0xf0] }
  0x35   :  { %282 = vmatpush.bf16.msra.mxu1 %v6459_v17  ;;  %v6686_v48 = vld [vmem:[#allocation8 + $0x1a0] sm:$0xf]  ;;  %v9618_v49 = vld [vmem:[#allocation8 + $0x1ac] sm:$0xf0]  ;;  %v6559_v50 = vor.u32 %v9586_v46, %v6558_v45  ;;  %v6424_v61 = vld [vmem:[#allocation5 + $0x18] sm:$0xf0] }
  0x36   :  { %696 = vmatpush.bf16.msra.mxu2 %v6575_v41  ;;  %v6422_v52 = vld [vmem:[#allocation5 + $0x10] sm:$0xf]  ;;  %v6687_v53 = vor.u32 %v9618_v49, %v6686_v48  ;;  %v6542_v54 = vld [vmem:[#allocation8 + $0x80] sm:$0xf]  ;;  %v9550_v60 = vld [vmem:[#allocation5 + $0x14] sm:$0xf] }
  0x37   :  { %709 = vmatpush.bf16.msra.mxu3 %v6703_v42  ;;  %v9582_v55 = vld [vmem:[#allocation8 + $0x8c] sm:$0xf0]  ;;  %v6670_v58 = vld [vmem:[#allocation8 + $0x180] sm:$0xf]  ;;  %v6423_v0 = vor.u32 %v9551_v57, %v6422_v52  ;;  %v9549_v1 = vld [vmem:[#allocation5 + $0x4] sm:$0xf0]  ;;  %v6427_v5 = vor.u32 %v9550_v60, %v6424_v61 }
  0x38   :  { %270 = vmatpush.bf16.msra.mxu0 %v6447_v22  ;;  %v9614_v59 = vld [vmem:[#allocation8 + $0x18c] sm:$0xf0]  ;;  %v6414_v62 = vld [vmem:[#allocation5] sm:$0xf]  ;;  %v6543_v63 = vor.u32 %v9582_v55, %v6542_v54  ;;  %v9548_v6 = vld [vmem:[#allocation5 + $0x4] sm:$0xf] }
  0x39   :  { %283 = vmatpush.bf16.msra.mxu1 %v6451_v26  ;;  %v6671_v2 = vor.u32 %v9614_v59, %v6670_v58  ;;  %v6526_v3 = vld [vmem:[#allocation8 + $0x60] sm:$0xf]  ;;  %v9578_v4 = vld [vmem:[#allocation8 + $0x6c] sm:$0xf0]  ;;  %v6416_v9 = vld [vmem:[#allocation5 + $0x8] sm:$0xf0]  ;;  %v6415_v15 = vor.u32 %v9549_v1, %v6414_v62 }
  0x3a   :  { %697 = vmatpush.bf16.msra.mxu2 %v6559_v50  ;;  %v6654_v7 = vld [vmem:[#allocation8 + $0x160] sm:$0xf]  ;;  %v9610_v8 = vld [vmem:[#allocation8 + $0x16c] sm:$0xf0]  ;;  %v9592_v10 = vld [vmem:[#allocation8 + $0xe4] sm:$0xf]  ;;  %v6527_v14 = vor.u32 %v9578_v4, %v6526_v3  ;;  %v6419_v20 = vor.u32 %v9548_v6, %v6416_v9 }
  0x3b   :  { %710 = vmatpush.bf16.msra.mxu3 %v6687_v53  ;;  %v6592_v11 = vld [vmem:[#allocation8 + $0xf0] sm:$0xf0]  ;;  %v9624_v12 = vld [vmem:[#allocation8 + $0x1e4] sm:$0xf]  ;;  %v6655_v17 = vor.u32 %v9610_v8, %v6654_v7  ;;  %v6510_v18 = vld [vmem:[#allocation8 + $0x40] sm:$0xf] }
  0x3c   :  { %271 = vmatpush.bf16.msra.mxu0 %v6439_v38  ;;  %v6720_v13 = vld [vmem:[#allocation8 + $0x1f0] sm:$0xf0]  ;;  %v9574_v19 = vld [vmem:[#allocation8 + $0x4c] sm:$0xf0]  ;;  %v6595_v21 = vor.u32 %v9592_v10, %v6592_v11  ;;  %v6638_v22 = vld [vmem:[#allocation8 + $0x140] sm:$0xf] }
  0x3d   :  { %284 = vmatpush.bf16.msra.mxu1 %v6443_v43  ;;  %v163_v16 = vld [vmem:[#allocation2] sm:$0xff]  ;;  %v9606_v23 = vld [vmem:[#allocation8 + $0x14c] sm:$0xf0]  ;;  %v6723_v24 = vor.u32 %v9624_v12, %v6720_v13  ;;  %v9588_v25 = vld [vmem:[#allocation8 + $0xc4] sm:$0xf]  ;;  %v6511_v30 = vor.u32 %v9574_v19, %v6510_v18  ;;  %s10636_s6 = smov [#allocation17]  }
  0x3e   :  { %698 = vmatpush.bf16.msra.mxu2 %v6543_v63  ;;  %v6576_v26 = vld [vmem:[#allocation8 + $0xd0] sm:$0xf0]  ;;  %v164_v27 = vpack.c.bf16 %v163_v16, %v163_v16  ;;  %v9620_v28 = vld [vmem:[#allocation8 + $0x1c4] sm:$0xf]  ;;  %v6639_v31 = vor.u32 %v9606_v23, %v6638_v22  ;;  %v6494_v32 = vld [vmem:[#allocation8 + $0x20] sm:$0xf] }
  0x3f   :  { %711 = vmatpush.bf16.msra.mxu3 %v6671_v2  ;;  %v6704_v29 = vld [vmem:[#allocation8 + $0x1d0] sm:$0xf0]  ;;  %v9570_v33 = vld [vmem:[#allocation8 + $0x2c] sm:$0xf0]  ;;  %v6579_v34 = vor.u32 %v9588_v25, %v6576_v26  ;;  %v6622_v35 = vld [vmem:[#allocation8 + $0x120] sm:$0xf] }
  0x40   :  { %272 = vmatpush.bf16.msra.mxu0 %v6431_v51  ;;  %v9602_v36 = vld [vmem:[#allocation8 + $0x12c] sm:$0xf0]  ;;  %v6707_v37 = vor.u32 %v9620_v28, %v6704_v29  ;;  %v9584_v38 = vld [vmem:[#allocation8 + $0xa4] sm:$0xf]  ;;  %v6560_v39 = vld [vmem:[#allocation8 + $0xb0] sm:$0xf0]  ;;  %v6495_v42 = vor.u32 %v9570_v33, %v6494_v32 }
  0x41   :  { %285 = vmatpush.bf16.msra.mxu1 %v6435_v56  ;;  %v9616_v40 = vld [vmem:[#allocation8 + $0x1a4] sm:$0xf]  ;;  %v6688_v41 = vld [vmem:[#allocation8 + $0x1b0] sm:$0xf0]  ;;  %v6623_v44 = vor.u32 %v9602_v36, %v6622_v35  ;;  %v6478_v45 = vld [vmem:[#allocation8] sm:$0xf]  ;;  %v6563_v48 = vor.u32 %v9584_v38, %v6560_v39 }
  0x42   :  { %699 = vmatpush.bf16.msra.mxu2 %v6527_v14  ;;  %v9580_v43 = vld [vmem:[#allocation8 + $0x84] sm:$0xf]  ;;  %v9566_v46 = vld [vmem:[#allocation8 + $0xc] sm:$0xf0]  ;;  %v6606_v47 = vld [vmem:[#allocation8 + $0x100] sm:$0xf]  ;;  %v6691_v52 = vor.u32 %v9616_v40, %v6688_v41 }
  0x43   :  { %712 = vmatpush.bf16.msra.mxu3 %v6655_v17  ;;  %v9598_v49 = vld [vmem:[#allocation8 + $0x10c] sm:$0xf0]  ;;  %v6598_v50 = vld [vmem:[#allocation8 + $0xe8] sm:$0xf]  ;;  %v9595_v51 = vld [vmem:[#allocation8 + $0xf4] sm:$0xf0]  ;;  %v6479_v58 = vor.u32 %v9566_v46, %v6478_v45 }
  0x44   :  { %273 = vmatpush.bf16.msra.mxu0 %v6423_v0  ;;  %v6544_v53 = vld [vmem:[#allocation8 + $0x90] sm:$0xf0]  ;;  %v6726_v54 = vld [vmem:[#allocation8 + $0x1e8] sm:$0xf]  ;;  %v9627_v55 = vld [vmem:[#allocation8 + $0x1f4] sm:$0xf0]  ;;  %v6607_v59 = vor.u32 %v9598_v49, %v6606_v47  ;;  %v6599_v60 = vor.u32 %v9595_v51, %v6598_v50 }
  0x45   :  { %286 = vmatpush.bf16.msra.mxu1 %v6427_v5  ;;  %v9612_v56 = vld [vmem:[#allocation8 + $0x184] sm:$0xf]  ;;  %v6672_v57 = vld [vmem:[#allocation8 + $0x190] sm:$0xf0]  ;;  %v6547_v61 = vor.u32 %v9580_v43, %v6544_v53  ;;  %v6727_v63 = vor.u32 %v9627_v55, %v6726_v54  ;;  %v6582_v0 = vld [vmem:[#allocation8 + $0xc8] sm:$0xf] }
  0x46   :  { %700 = vmatpush.bf16.msra.mxu2 %v6511_v30  ;;  %v9576_v62 = vld [vmem:[#allocation8 + $0x64] sm:$0xf]  ;;  %v9591_v1 = vld [vmem:[#allocation8 + $0xd4] sm:$0xf0]  ;;  %v6675_v2 = vor.u32 %v9612_v56, %v6672_v57  ;;  %v6528_v3 = vld [vmem:[#allocation8 + $0x70] sm:$0xf0] }
  0x47   :  { %713 = vmatpush.bf16.msra.mxu3 %v6639_v31  ;;  %v6710_v4 = vld [vmem:[#allocation8 + $0x1c8] sm:$0xf]  ;;  %v9623_v5 = vld [vmem:[#allocation8 + $0x1d4] sm:$0xf0]  ;;  %v9608_v6 = vld [vmem:[#allocation8 + $0x164] sm:$0xf]  ;;  %v6583_v8 = vor.u32 %v9591_v1, %v6582_v0  ;;  %v6531_v9 = vor.u32 %v9576_v62, %v6528_v3 }
  0x48   :  { %274 = vmatpush.bf16.msra.mxu0 %v6415_v15  ;;  %v6656_v7 = vld [vmem:[#allocation8 + $0x170] sm:$0xf0]  ;;  %v6711_v10 = vor.u32 %v9623_v5, %v6710_v4  ;;  %v9572_v12 = vld [vmem:[#allocation8 + $0x44] sm:$0xf]  ;;  %v9593_v28 = vld [vmem:[#allocation8 + $0xec] sm:$0xf] }
  0x49   :  { %287 = vmatpush.bf16.msra.mxu1 %v6419_v20  ;;  %v6659_v11 = vor.u32 %v9608_v6, %v6656_v7  ;;  %v6512_v13 = vld [vmem:[#allocation8 + $0x50] sm:$0xf0]  ;;  %v9604_v14 = vld [vmem:[#allocation8 + $0x144] sm:$0xf]  ;;  %v6600_v29 = vld [vmem:[#allocation8 + $0xf8] sm:$0xf0] }
  0x4a   :  { %701 = vmatpush.bf16.msra.mxu2 %v6495_v42  ;;  %v6640_v15 = vld [vmem:[#allocation8 + $0x150] sm:$0xf0]  ;;  %v6515_v16 = vor.u32 %v9572_v12, %v6512_v13  ;;  %v9568_v18 = vld [vmem:[#allocation8 + $0x24] sm:$0xf]  ;;  %v9625_v30 = vld [vmem:[#allocation8 + $0x1ec] sm:$0xf] }
  0x4b   :  { %275 = vmatmul.bf16.vlgmr.msra.gmra.mxu0 %v164_v27  ;;  %714 = vmatpush.bf16.msra.mxu3 %v6623_v44  ;;  %v6643_v17 = vor.u32 %v9604_v14, %v6640_v15  ;;  %v6496_v19 = vld [vmem:[#allocation8 + $0x30] sm:$0xf0]  ;;  %v9600_v20 = vld [vmem:[#allocation8 + $0x124] sm:$0xf]  ;;  %v6728_v31 = vld [vmem:[#allocation8 + $0x1f8] sm:$0xf0] }
  0x4c   :  { %721 = vmatpush.bf16.msrb.mxu0 %v6595_v21  ;;  %288 = vmatmul.bf16.vlgmr.msra.gmra.mxu1 %v164_v27  ;;  %v6624_v21 = vld [vmem:[#allocation8 + $0x130] sm:$0xf0]  ;;  %v6499_v22 = vor.u32 %v9568_v18, %v6496_v19  ;;  %v9596_v26 = vld [vmem:[#allocation8 + $0x104] sm:$0xf]  ;;  %v6731_v35 = vor.u32 %v9625_v30, %v6728_v31  ;;  %v9589_v36 = vld [vmem:[#allocation8 + $0xcc] sm:$0xf] }
  0x4d   :  { %734 = vmatpush.bf16.msrb.mxu1 %v6723_v24  ;;  %v6627_v23 = vor.u32 %v9600_v20, %v6624_v21  ;;  %v9564_v24 = vld [vmem:[#allocation8 + $0x4] sm:$0xf]  ;;  %v6480_v25 = vld [vmem:[#allocation8 + $0x10] sm:$0xf0]  ;;  %v9621_v38 = vld [vmem:[#allocation8 + $0x1cc] sm:$0xf] }
  0x4e   :  { %702 = vmatpush.bf16.msra.mxu2 %v6479_v58  ;;  %v6608_v27 = vld [vmem:[#allocation8 + $0x110] sm:$0xf0]  ;;  %v6483_v32 = vor.u32 %v9564_v24, %v6480_v25  ;;  %v6712_v39 = vld [vmem:[#allocation8 + $0x1d8] sm:$0xf0]  ;;  %v6566_v42 = vld [vmem:[#allocation8 + $0xa8] sm:$0xf] }
  0x4f   :  { %715 = vmatpush.bf16.msra.mxu3 %v6607_v59  ;;  %v6611_v33 = vor.u32 %v9596_v26, %v6608_v27  ;;  %v6715_v41 = vor.u32 %v9621_v38, %v6712_v39  ;;  %v9587_v43 = vld [vmem:[#allocation8 + $0xb4] sm:$0xf0]  ;;  %v6694_v44 = vld [vmem:[#allocation8 + $0x1a8] sm:$0xf]  ;;  %v9585_v47 = vld [vmem:[#allocation8 + $0xac] sm:$0xf] }
  0x50   :  { %722 = vmatpush.bf16.msrb.mxu0 %v6579_v34  ;;  %v6603_v34 = vor.u32 %v9593_v28, %v6600_v29  ;;  %v6567_v45 = vor.u32 %v9587_v43, %v6566_v42  ;;  %v9619_v46 = vld [vmem:[#allocation8 + $0x1b4] sm:$0xf0]  ;;  %v6568_v49 = vld [vmem:[#allocation8 + $0xb8] sm:$0xf0]  ;;  %v9617_v50 = vld [vmem:[#allocation8 + $0x1ac] sm:$0xf] }
  0x51   :  { %735 = vmatpush.bf16.msrb.mxu1 %v6707_v37  ;;  %v6584_v37 = vld [vmem:[#allocation8 + $0xd8] sm:$0xf0]  ;;  %v6550_v54 = vld [vmem:[#allocation8 + $0x88] sm:$0xf]  ;;  %v9583_v55 = vld [vmem:[#allocation8 + $0x94] sm:$0xf0] }
  0x52   :  { %747 = vmatpush.bf16.msrb.mxu2 %v6599_v60  ;;  %v6587_v40 = vor.u32 %v9589_v36, %v6584_v37  ;;  %v6696_v51 = vld [vmem:[#allocation8 + $0x1b8] sm:$0xf0]  ;;  %v6678_v56 = vld [vmem:[#allocation8 + $0x188] sm:$0xf]  ;;  %v6551_v57 = vor.u32 %v9583_v55, %v6550_v54  ;;  %v9615_v58 = vld [vmem:[#allocation8 + $0x194] sm:$0xf0] }
  0x53   :  { %760 = vmatpush.bf16.msrb.mxu3 %v6727_v63  ;;  %v6699_v53 = vor.u32 %v9617_v50, %v6696_v51  ;;  %v9581_v59 = vld [vmem:[#allocation8 + $0x8c] sm:$0xf]  ;;  %v6552_v60 = vld [vmem:[#allocation8 + $0x98] sm:$0xf0]  ;;  %v9579_v3 = vld [vmem:[#allocation8 + $0x74] sm:$0xf0] }
  0x54   :  { %723 = vmatpush.bf16.msrb.mxu0 %v6563_v48  ;;  %v6695_v48 = vor.u32 %v9619_v46, %v6694_v44  ;;  %v6555_v62 = vor.u32 %v9581_v59, %v6552_v60  ;;  %v9613_v63 = vld [vmem:[#allocation8 + $0x18c] sm:$0xf]  ;;  %v6680_v0 = vld [vmem:[#allocation8 + $0x198] sm:$0xf0]  ;;  %v6662_v4 = vld [vmem:[#allocation8 + $0x168] sm:$0xf] }
  0x55   :  { %736 = vmatpush.bf16.msrb.mxu1 %v6691_v52  ;;  %v6571_v52 = vor.u32 %v9585_v47, %v6568_v49  ;;  %v6683_v1 = vor.u32 %v9613_v63, %v6680_v0  ;;  %v9611_v6 = vld [vmem:[#allocation8 + $0x174] sm:$0xf0]  ;;  %v9577_v7 = vld [vmem:[#allocation8 + $0x6c] sm:$0xf]  ;;  %v6664_v12 = vld [vmem:[#allocation8 + $0x178] sm:$0xf0] }
  0x56   :  { %748 = vmatpush.bf16.msrb.mxu2 %v6583_v8  ;;  %v6536_v8 = vld [vmem:[#allocation8 + $0x78] sm:$0xf0]  ;;  %v6518_v13 = vld [vmem:[#allocation8 + $0x48] sm:$0xf]  ;;  %v9575_v15 = vld [vmem:[#allocation8 + $0x54] sm:$0xf0] }
  0x57   :  { %761 = vmatpush.bf16.msrb.mxu3 %v6711_v10  ;;  %v6539_v10 = vor.u32 %v9577_v7, %v6536_v8  ;;  %v6519_v18 = vor.u32 %v9575_v15, %v6518_v13  ;;  %v9573_v20 = vld [vmem:[#allocation8 + $0x4c] sm:$0xf]  ;;  %v6520_v21 = vld [vmem:[#allocation8 + $0x58] sm:$0xf0]  ;;  %v6502_v25 = vld [vmem:[#allocation8 + $0x28] sm:$0xf] }
  0x58   :  { %724 = vmatpush.bf16.msrb.mxu0 %v6547_v61  ;;  %v6679_v61 = vor.u32 %v9615_v58, %v6678_v56  ;;  %v6648_v24 = vld [vmem:[#allocation8 + $0x158] sm:$0xf0]  ;;  %v9571_v26 = vld [vmem:[#allocation8 + $0x34] sm:$0xf0]  ;;  %v6630_v28 = vld [vmem:[#allocation8 + $0x128] sm:$0xf] }
  0x59   :  { %737 = vmatpush.bf16.msrb.mxu1 %v6675_v2  ;;  %v6534_v2 = vld [vmem:[#allocation8 + $0x68] sm:$0xf]  ;;  %v9603_v29 = vld [vmem:[#allocation8 + $0x134] sm:$0xf0]  ;;  %v9569_v30 = vld [vmem:[#allocation8 + $0x2c] sm:$0xf]  ;;  %v6503_v31 = vor.u32 %v9571_v26, %v6502_v25 }
  0x5a   :  { %749 = vmatpush.bf16.msrb.mxu2 %v6567_v45  ;;  %v6535_v5 = vor.u32 %v9579_v3, %v6534_v2  ;;  %v6486_v36 = vld [vmem:[#allocation8 + $0x8] sm:$0xf]  ;;  %v9567_v37 = vld [vmem:[#allocation8 + $0x14] sm:$0xf0]  ;;  %v9565_v42 = vld [vmem:[#allocation8 + $0xc] sm:$0xf] }
  0x5b   :  { %762 = vmatpush.bf16.msrb.mxu3 %v6695_v48  ;;  %v6488_v43 = vld [vmem:[#allocation8 + $0x18] sm:$0xf0]  ;;  %v9597_v44 = vld [vmem:[#allocation8 + $0x10c] sm:$0xf]  ;;  %v6487_v46 = vor.u32 %v9567_v37, %v6486_v36  ;;  %v7214_v56 = vld [vmem:[#allocation11 + $0x3c0] sm:$0xf] }
  0x5c   :  { %725 = vmatpush.bf16.msrb.mxu0 %v6531_v9  ;;  %v6663_v9 = vor.u32 %v9611_v6, %v6662_v4  ;;  %v6616_v45 = vld [vmem:[#allocation8 + $0x118] sm:$0xf0]  ;;  %v6491_v48 = vor.u32 %v9565_v42, %v6488_v43  ;;  %v6958_v58 = vld [vmem:[#allocation11 + $0x1c0] sm:$0xf]  ;;  %s6396_s8 = sshll.u32 %s10636_s6, 4  ;;  %s6398_s13 = sshll.u32 %s11000_s9, 4  ;;  %s6397_s8 = int_to_ptr.vmem [resolvable:$true] %s6396_s8  ;;  %s6399_s13 = int_to_ptr.hbm [resolvable:$true] %s6398_s13 }
  0x5d   :  { %738 = vmatpush.bf16.msrb.mxu1 %v6659_v11  ;;  %v9609_v11 = vld [vmem:[#allocation8 + $0x16c] sm:$0xf]  ;;  %v6619_v49 = vor.u32 %v9597_v44, %v6616_v45  ;;  %v181_v50 = vld [vmem:[#allocation7] sm:$0x3]  ;;  %v9688_v60 = vld [vmem:[#allocation11 + $0x1dc] sm:$0xf0] }
  0x5e   :  { %750 = vmatpush.bf16.msrb.mxu2 %v6551_v57  ;;  %v6667_v14 = vor.u32 %v9609_v11, %v6664_v12  ;;  %v183_v51 = vperm.slane %v181_v50, 0  ;;  %v9752_v57 = vld [vmem:[#allocation11 + $0x3dc] sm:$0xf0] }
  0x5f   :  { %763 = vmatpush.bf16.msrb.mxu3 %v6679_v61  ;;  %v7726_v61 = vld [vmem:[#allocation11 + $0x7c0] sm:$0xf]  ;;  %v7215_v6 = vor.u32 %v9752_v57, %v7214_v56 }
  0x60   :  { %726 = vmatpush.bf16.msrb.mxu0 %v6515_v16  ;;  %v6646_v16 = vld [vmem:[#allocation8 + $0x148] sm:$0xf]  ;;  %v7470_v0 = vld [vmem:[#allocation11 + $0x5c0] sm:$0xf] }
  0x61   :  { %739 = vmatpush.bf16.msrb.mxu1 %v6643_v17  ;;  %v9607_v17 = vld [vmem:[#allocation8 + $0x154] sm:$0xf0]  ;;  %v9816_v2 = vld [vmem:[#allocation11 + $0x5dc] sm:$0xf0] }
  0x62   :  { %751 = vmatpush.bf16.msrb.mxu2 %v6535_v5  ;;  %v6647_v19 = vor.u32 %v9607_v17, %v6646_v16  ;;  %v7182_v7 = vld [vmem:[#allocation11 + $0x380] sm:$0xf]  ;;  %v7471_v15 = vor.u32 %v9816_v2, %v7470_v0 }
  0x63   :  { %764 = vmatpush.bf16.msrb.mxu3 %v6663_v9  ;;  %v9744_v8 = vld [vmem:[#allocation11 + $0x39c] sm:$0xf0]  ;;  %v6959_v9 = vor.u32 %v9688_v60, %v6958_v58 }
  0x64   :  { %727 = vmatpush.bf16.msrb.mxu0 %v6499_v22  ;;  %v9605_v22 = vld [vmem:[#allocation8 + $0x14c] sm:$0xf]  ;;  %v6926_v11 = vld [vmem:[#allocation11 + $0x180] sm:$0xf] }
  0x65   :  { %740 = vmatpush.bf16.msrb.mxu1 %v6627_v23  ;;  %v6523_v23 = vor.u32 %v9573_v20, %v6520_v21  ;;  %v6651_v27 = vor.u32 %v9605_v22, %v6648_v24  ;;  %v9680_v12 = vld [vmem:[#allocation11 + $0x19c] sm:$0xf0]  ;;  %v7183_v21 = vor.u32 %v9744_v8, %v7182_v7 }
  0x66   :  { %752 = vmatpush.bf16.msrb.mxu2 %v6519_v18  ;;  %v9872_v17 = vld [vmem:[#allocation11 + $0x79c] sm:$0xf0]  ;;  %v6927_v24 = vor.u32 %v9680_v12, %v6926_v11 }
  0x67   :  { %765 = vmatpush.bf16.msrb.mxu3 %v6647_v19  ;;  %v7438_v18 = vld [vmem:[#allocation11 + $0x580] sm:$0xf] }
  0x68   :  { %728 = vmatpush.bf16.msrb.mxu0 %v6483_v32  ;;  %v6504_v32 = vld [vmem:[#allocation8 + $0x38] sm:$0xf0]  ;;  %v9808_v19 = vld [vmem:[#allocation11 + $0x59c] sm:$0xf0] }
  0x69   :  { %741 = vmatpush.bf16.msrb.mxu1 %v6611_v33  ;;  %v9601_v33 = vld [vmem:[#allocation8 + $0x12c] sm:$0xf]  ;;  %v6507_v38 = vor.u32 %v9569_v30, %v6504_v32  ;;  %v7150_v22 = vld [vmem:[#allocation11 + $0x340] sm:$0xf] }
  0x6a   :  { %753 = vmatpush.bf16.msrb.mxu2 %v6503_v31  ;;  %v6894_v25 = vld [vmem:[#allocation11 + $0x140] sm:$0xf] }
  0x6b   :  { %v9672_v26 = vld [vmem:[#allocation11 + $0x15c] sm:$0xf0] }
  0x6c   :  { %773 = vmatpush.bf16.msra.mxu0 %v6603_v34  ;;  %v6632_v34 = vld [vmem:[#allocation8 + $0x138] sm:$0xf0]  ;;  %v9864_v30 = vld [vmem:[#allocation11 + $0x75c] sm:$0xf0]  ;;  %v6895_v36 = vor.u32 %v9672_v26, %v6894_v25  ;;  %v7216_v26 = vld [vmem:[#allocation11 + $0x3e0] sm:$0xf0] }
  0x6d   :  { %786 = vmatpush.bf16.msra.mxu1 %v6731_v35  ;;  %v6631_v35 = vor.u32 %v9603_v29, %v6630_v28  ;;  %v6635_v39 = vor.u32 %v9601_v33, %v6632_v34  ;;  %v7662_v28 = vld [vmem:[#allocation11 + $0x740] sm:$0xf]  ;;  %v7439_v29 = vor.u32 %v9808_v19, %v7438_v18 }
  0x6e   :  { %754 = vmatpush.bf16.msrb.mxu2 %v6487_v46  ;;  %v7406_v31 = vld [vmem:[#allocation11 + $0x540] sm:$0xf] }
  0x6f   :  { %766 = vmatpush.bf16.msrb.mxu3 %v6631_v35  ;;  %v9800_v32 = vld [vmem:[#allocation11 + $0x55c] sm:$0xf0] }
  0x70   :  { %774 = vmatpush.bf16.msra.mxu0 %v6587_v40  ;;  %v6614_v40 = vld [vmem:[#allocation8 + $0x108] sm:$0xf]  ;;  %v7118_v34 = vld [vmem:[#allocation11 + $0x300] sm:$0xf] }
  0x71   :  { %787 = vmatpush.bf16.msra.mxu1 %v6715_v41  ;;  %v9599_v41 = vld [vmem:[#allocation8 + $0x114] sm:$0xf0]  ;;  %v9728_v35 = vld [vmem:[#allocation11 + $0x31c] sm:$0xf0] }
  0x72   :  { %v6615_v47 = vor.u32 %v9599_v41, %v6614_v40  ;;  %v6862_v37 = vld [vmem:[#allocation11 + $0x100] sm:$0xf]  ;;  %v7407_v41 = vor.u32 %v9800_v32, %v7406_v31  ;;  %v7119_v45 = vor.u32 %v9728_v35, %v7118_v34  ;;  %v7728_v34 = vld [vmem:[#allocation11 + $0x7e0] sm:$0xf0] }
  0x73   :  { %v7630_v40 = vld [vmem:[#allocation11 + $0x700] sm:$0xf] }
  0x74   :  { %775 = vmatpush.bf16.msra.mxu0 %v6571_v52  ;;  %767 = vmatpush.bf16.msrb.mxu3 %v6615_v47  ;;  %v184_v52 = vperm.slane %v181_v50, 1  ;;  %v9856_v42 = vld [vmem:[#allocation11 + $0x71c] sm:$0xf0] }
  0x75   :  { %788 = vmatpush.bf16.msra.mxu1 %v6699_v53  ;;  %v7374_v43 = vld [vmem:[#allocation11 + $0x500] sm:$0xf] }
  0x76   :  { %v9792_v44 = vld [vmem:[#allocation11 + $0x51c] sm:$0xf0] }
  0x77   :  { %v7086_v46 = vld [vmem:[#allocation11 + $0x2c0] sm:$0xf] }
  0x78   :  { %776 = vmatpush.bf16.msra.mxu0 %v6555_v62  ;;  %v9880_v62 = vld [vmem:[#allocation11 + $0x7dc] sm:$0xf0] }
  0x79   :  { %789 = vmatpush.bf16.msra.mxu1 %v6683_v1  ;;  %v7727_v13 = vor.u32 %v9880_v62, %v7726_v61  ;;  %v9720_v47 = vld [vmem:[#allocation11 + $0x2dc] sm:$0xf0] }
  0x7a   :  { %v9656_v50 = vld [vmem:[#allocation11 + $0xdc] sm:$0xf0]  ;;  %v7087_v57 = vor.u32 %v9720_v47, %v7086_v46  ;;  %v7152_v46 = vld [vmem:[#allocation11 + $0x360] sm:$0xf0] }
  0x7b   :  { %v9784_v56 = vld [vmem:[#allocation11 + $0x4dc] sm:$0xf0]  ;;  %v9668_v47 = vld [vmem:[#allocation11 + $0x144] sm:$0xf] }
  0x7c   :  { %777 = vmatpush.bf16.msra.mxu0 %v6539_v10  ;;  %v7054_v58 = vld [vmem:[#allocation11 + $0x280] sm:$0xf] }
  0x7d   :  { %790 = vmatpush.bf16.msra.mxu1 %v6667_v14  ;;  %v7694_v14 = vld [vmem:[#allocation11 + $0x780] sm:$0xf] }
  0x7e   :  { %v6798_v61 = vld [vmem:[#allocation11 + $0x80] sm:$0xf] }
  0x7f   :  { %v9648_v62 = vld [vmem:[#allocation11 + $0x9c] sm:$0xf0] }
  0x80   :  { %778 = vmatpush.bf16.msra.mxu0 %v6523_v23  ;;  %v9736_v23 = vld [vmem:[#allocation11 + $0x35c] sm:$0xf0] }
  0x81   :  { %791 = vmatpush.bf16.msra.mxu1 %v6651_v27  ;;  %v7695_v27 = vor.u32 %v9872_v17, %v7694_v14  ;;  %v7151_v33 = vor.u32 %v9736_v23, %v7150_v22  ;;  %v7566_v0 = vld [vmem:[#allocation11 + $0x680] sm:$0xf] }
  0x82   :  { %v9840_v2 = vld [vmem:[#allocation11 + $0x69c] sm:$0xf0] }
  0x83   :  { %v7022_v7 = vld [vmem:[#allocation11 + $0x240] sm:$0xf] }
  0x84   :  { %779 = vmatpush.bf16.msra.mxu0 %v6507_v38  ;;  %v9664_v38 = vld [vmem:[#allocation11 + $0x11c] sm:$0xf0] }
  0x85   :  { %792 = vmatpush.bf16.msra.mxu1 %v6635_v39  ;;  %v7663_v39 = vor.u32 %v9864_v30, %v7662_v28  ;;  %v9704_v8 = vld [vmem:[#allocation11 + $0x25c] sm:$0xf0]  ;;  %v6960_v28 = vld [vmem:[#allocation11 + $0x1e0] sm:$0xf0] }
  0x86   :  { %v6766_v11 = vld [vmem:[#allocation11 + $0x40] sm:$0xf]  ;;  %v7023_v18 = vor.u32 %v9704_v8, %v7022_v7  ;;  %v6832_v7 = vld [vmem:[#allocation11 + $0xe0] sm:$0xf0] }
  0x87   :  { %v9640_v12 = vld [vmem:[#allocation11 + $0x5c] sm:$0xf0]  ;;  %v9812_v8 = vld [vmem:[#allocation11 + $0x5c4] sm:$0xf] }
  0x88   :  { %780 = vmatpush.bf16.msra.mxu0 %v6491_v48  ;;  %v6863_v48 = vor.u32 %v9664_v38, %v6862_v37  ;;  %v7534_v14 = vld [vmem:[#allocation11 + $0x640] sm:$0xf]  ;;  %v7184_v38 = vld [vmem:[#allocation11 + $0x3a0] sm:$0xf0] }
  0x89   :  { %793 = vmatpush.bf16.msra.mxu1 %v6619_v49  ;;  %v6830_v49 = vld [vmem:[#allocation11 + $0xc0] sm:$0xf] }
  0x8a   :  { %v6831_v60 = vor.u32 %v9656_v50, %v6830_v49  ;;  %v9768_v17 = vld [vmem:[#allocation11 + $0x45c] sm:$0xf0]  ;;  %v9724_v50 = vld [vmem:[#allocation11 + $0x304] sm:$0xf] }
  0x8b   :  { %v9696_v19 = vld [vmem:[#allocation11 + $0x21c] sm:$0xf0] }
  0x8c   :  { %v6734_v22 = vld [vmem:[#allocation11] sm:$0xf] }
  0x8d   :  { %v9632_v23 = vld [vmem:[#allocation11 + $0x1c] sm:$0xf0] }
  0x8e   :  { %v9824_v30 = vld [vmem:[#allocation11 + $0x61c] sm:$0xf0]  ;;  %v6735_v32 = vor.u32 %v9632_v23, %v6734_v22  ;;  %v9692_v23 = vld [vmem:[#allocation11 + $0x204] sm:$0xf] }
  0xc8   :  { %v276_v53 = vpop.f32.mrf.mxu0 }
  0xc9   :  { %v277_v54 = vadd.f32 %v276_v53, %v183_v51  ;;  %v289_v55 = vpop.f32.mrf.mxu1  ;;  %v7631_v51 = vor.u32 %v9856_v42, %v7630_v40  ;;  %v7375_v53 = vor.u32 %v9792_v44, %v7374_v43  ;;  %v6928_v40 = vld [vmem:[#allocation11 + $0x1a0] sm:$0xf0] }
  0xca   :  { %v290_v59 = vadd.f32 %v289_v55, %v184_v52  ;;  %v7598_v52 = vld [vmem:[#allocation11 + $0x6c0] sm:$0xf]  ;;  %v9732_v44 = vld [vmem:[#allocation11 + $0x344] sm:$0xf] }
  0xcb   :  { %vm293_vm0 = vcmp.ge.f32.partialorder %v277_v54, 0.0  ;;  %v295_v63 = vmul.f32 0.2, %v277_v54  ;;  %v7342_v55 = vld [vmem:[#allocation11 + $0x4c0] sm:$0xf]  ;;  %v7155_v49 = vor.u32 %v9732_v44, %v7152_v46 }
  0xcc   :  { %vm294_vm1 = vcmp.ge.f32.partialorder %v290_v59, 0.0  ;;  %v296_v1 = vmul.f32 0.2, %v290_v59  ;;  %v9836_v44 = vld [vmem:[#allocation11 + $0x684] sm:$0xf] }
  0xcd   :  { %v297_v3 = vsel %vm293_vm0, %v277_v54, %v295_v63  ;;  %v9848_v54 = vld [vmem:[#allocation11 + $0x6dc] sm:$0xf0] }
  0xce   :  { %v10714_v4 = vpack.c.bf16 %v297_v3, %v297_v3  ;;  %v298_v5 = vsel %vm294_vm1, %v290_v59, %v296_v1  ;;  %v9712_v59 = vld [vmem:[#allocation11 + $0x29c] sm:$0xf0]  ;;  %v7599_v63 = vor.u32 %v9848_v54, %v7598_v52  ;;  %v7343_v1 = vor.u32 %v9784_v56, %v7342_v55  ;;  %v7120_v52 = vld [vmem:[#allocation11 + $0x320] sm:$0xf0] }
  0xcf   :  { %v10716_v10 = vpack.c.bf16 %v298_v5, %v298_v5  ;;  %v7310_v3 = vld [vmem:[#allocation11 + $0x480] sm:$0xf]  ;;  %v6864_v54 = vld [vmem:[#allocation11 + $0x120] sm:$0xf0]  ;;  %v7123_v55 = vor.u32 %v9724_v50, %v7120_v52 }
  0xd0   :  { %v278_v16 = vpop.f32.mrf.mxu0  ;;  %703 = vmatmul.bf16.vlgmr.msra.gmra.mxu2 %v10714_v4  ;;  %729 = vmatmul.bf16.vlgmr.msrb.gmra.mxu0 %v10714_v4  ;;  %v9776_v5 = vld [vmem:[#allocation11 + $0x49c] sm:$0xf0]  ;;  %v9828_v50 = vld [vmem:[#allocation11 + $0x644] sm:$0xf] }
  0xd1   :  { %v291_v20 = vpop.f32.mrf.mxu1  ;;  %716 = vmatmul.bf16.vlgmr.msra.gmra.mxu3 %v10716_v10  ;;  %742 = vmatmul.bf16.vlgmr.msrb.gmra.mxu1 %v10716_v10  ;;  %v7278_v16 = vld [vmem:[#allocation11 + $0x440] sm:$0xf] }
  0xd2   :  { %2382 = vmatpush.bf16.msra.mxu3 %v7215_v6  ;;  %2369 = vmatpush.bf16.msra.mxu2 %v6959_v9  ;;  %v7055_v6 = vor.u32 %v9712_v59, %v7054_v58  ;;  %v6799_v9 = vor.u32 %v9648_v62, %v6798_v61  ;;  %v6767_v20 = vor.u32 %v9640_v12, %v6766_v11  ;;  %v7088_v58 = vld [vmem:[#allocation11 + $0x2e0] sm:$0xf0] }
  0xd3   :  { %2408 = vmatpush.bf16.msrb.mxu1 %v7727_v13  ;;  %2395 = vmatpush.bf16.msrb.mxu0 %v7471_v15  ;;  %v7567_v13 = vor.u32 %v9840_v2, %v7566_v0  ;;  %v9832_v15 = vld [vmem:[#allocation11 + $0x65c] sm:$0xf0]  ;;  %v7279_v25 = vor.u32 %v9768_v17, %v7278_v16  ;;  %v7056_v61 = vld [vmem:[#allocation11 + $0x2a0] sm:$0xf0] }
  0xd4   :  { %v9868_v62 = vld [vmem:[#allocation11 + $0x784] sm:$0xf]  ;;  %v9760_v2 = vld [vmem:[#allocation11 + $0x41c] sm:$0xf0] }
  0xd5   :  { %v7696_v0 = vld [vmem:[#allocation11 + $0x7a0] sm:$0xf0] }
  0xd6   :  { %2383 = vmatpush.bf16.msra.mxu3 %v7183_v21  ;;  %2370 = vmatpush.bf16.msra.mxu2 %v6927_v24  ;;  %v9748_v21 = vld [vmem:[#allocation11 + $0x3c4] sm:$0xf]  ;;  %v7535_v24 = vor.u32 %v9832_v15, %v7534_v14 }
  0xd7   :  { %2409 = vmatpush.bf16.msrb.mxu1 %v7695_v27  ;;  %2396 = vmatpush.bf16.msrb.mxu0 %v7439_v29  ;;  %v9684_v27 = vld [vmem:[#allocation11 + $0x1c4] sm:$0xf]  ;;  %v7502_v29 = vld [vmem:[#allocation11 + $0x600] sm:$0xf]  ;;  %v7219_v35 = vor.u32 %v9748_v21, %v7216_v26 }
  0xd8   :  { %v6963_v37 = vor.u32 %v9684_v27, %v6960_v28  ;;  %v7472_v11 = vld [vmem:[#allocation11 + $0x5e0] sm:$0xf0] }
  0xd9   :  { %v7475_v12 = vor.u32 %v9812_v8, %v7472_v11  ;;  %v7024_v14 = vld [vmem:[#allocation11 + $0x260] sm:$0xf0]  ;;  %v9753_v11 = vld [vmem:[#allocation11 + $0x3e4] sm:$0xf0] }
  0xda   :  { %2384 = vmatpush.bf16.msra.mxu3 %v7151_v33  ;;  %2371 = vmatpush.bf16.msra.mxu2 %v6895_v36  ;;  %v9876_v33 = vld [vmem:[#allocation11 + $0x7c4] sm:$0xf] }
  0xdb   :  { %2410 = vmatpush.bf16.msrb.mxu1 %v7663_v39  ;;  %2397 = vmatpush.bf16.msrb.mxu0 %v7407_v41  ;;  %v9740_v36 = vld [vmem:[#allocation11 + $0x384] sm:$0xf]  ;;  %v7503_v41 = vor.u32 %v9824_v30, %v7502_v29  ;;  %v7731_v42 = vor.u32 %v9876_v33, %v7728_v34 }
  0xdc   :  { %v9676_v39 = vld [vmem:[#allocation11 + $0x184] sm:$0xf]  ;;  %v7187_v43 = vor.u32 %v9740_v36, %v7184_v38 }
  0xdd   :  { %v7664_v16 = vld [vmem:[#allocation11 + $0x760] sm:$0xf0] }
  0xde   :  { %2385 = vmatpush.bf16.msra.mxu3 %v7119_v45  ;;  %2372 = vmatpush.bf16.msra.mxu2 %v6863_v48  ;;  %v6931_v45 = vor.u32 %v9676_v39, %v6928_v40  ;;  %v6896_v48 = vld [vmem:[#allocation11 + $0x160] sm:$0xf0] }
  0xdf   :  { %2411 = vmatpush.bf16.msrb.mxu1 %v7631_v51  ;;  %2398 = vmatpush.bf16.msrb.mxu0 %v7375_v53  ;;  %v6899_v51 = vor.u32 %v9668_v47, %v6896_v48  ;;  %v9660_v53 = vld [vmem:[#allocation11 + $0x104] sm:$0xf] }
  0xe0   :  { %755 = vmatmul.bf16.vlgmr.msrb.gmra.mxu2 %v10714_v4  ;;  %781 = vmatmul.bf16.vlgmr.msra.gmra.mxu0 %v10714_v4  ;;  %v7311_v4 = vor.u32 %v9776_v5, %v7310_v3  ;;  %v6867_v56 = vor.u32 %v9660_v53, %v6864_v54  ;;  %v7699_v3 = vor.u32 %v9868_v62, %v7696_v0  ;;  %v7440_v21 = vld [vmem:[#allocation11 + $0x5a0] sm:$0xf0] }
  0xe1   :  { %768 = vmatmul.bf16.vlgmr.msrb.gmra.mxu3 %v10716_v10  ;;  %794 = vmatmul.bf16.vlgmr.msra.gmra.mxu1 %v10716_v10  ;;  %v6990_v10 = vld [vmem:[#allocation11 + $0x200] sm:$0xf]  ;;  %v7632_v27 = vld [vmem:[#allocation11 + $0x720] sm:$0xf0] }
  0xe2   :  { %2386 = vmatpush.bf16.msra.mxu3 %v7087_v57  ;;  %2373 = vmatpush.bf16.msra.mxu2 %v6831_v60  ;;  %v6991_v31 = vor.u32 %v9696_v19, %v6990_v10  ;;  %v9716_v57 = vld [vmem:[#allocation11 + $0x2c4] sm:$0xf] }
  0xe3   :  { %2412 = vmatpush.bf16.msrb.mxu1 %v7599_v63  ;;  %2399 = vmatpush.bf16.msrb.mxu0 %v7343_v1  ;;  %v7091_v59 = vor.u32 %v9716_v57, %v7088_v58  ;;  %v9708_v60 = vld [vmem:[#allocation11 + $0x284] sm:$0xf]  ;;  %v7246_v1 = vld [vmem:[#allocation11 + $0x400] sm:$0xf] }
  0xe4   :  { %v7059_v63 = vor.u32 %v9708_v60, %v7056_v61  ;;  %v7247_v5 = vor.u32 %v9760_v2, %v7246_v1  ;;  %v6800_v10 = vld [vmem:[#allocation11 + $0xa0] sm:$0xf0]  ;;  %v10726_v61 = vld [vmem:[#allocation10] sm:$0xf] }
  0xe5   :  { %v9804_v19 = vld [vmem:[#allocation11 + $0x584] sm:$0xf]  ;;  %v367_v8 = vperm.slane %v10726_v61, 0 }
  0xe6   :  { %2387 = vmatpush.bf16.msra.mxu3 %v7055_v6  ;;  %2374 = vmatpush.bf16.msra.mxu2 %v6799_v9  ;;  %v9652_v6 = vld [vmem:[#allocation11 + $0xc4] sm:$0xf]  ;;  %v7443_v22 = vor.u32 %v9804_v19, %v7440_v21  ;;  %v9745_v19 = vld [vmem:[#allocation11 + $0x3a4] sm:$0xf0] }
  0xe7   :  { %2413 = vmatpush.bf16.msrb.mxu1 %v7567_v13  ;;  %2400 = vmatpush.bf16.msrb.mxu0 %v7311_v4  ;;  %v6835_v9 = vor.u32 %v9652_v6, %v6832_v7  ;;  %v9700_v13 = vld [vmem:[#allocation11 + $0x244] sm:$0xf] }
  0xe8   :  { %v9860_v4 = vld [vmem:[#allocation11 + $0x744] sm:$0xf]  ;;  %v7027_v15 = vor.u32 %v9700_v13, %v7024_v14 }
  0xe9   :  { %v7667_v17 = vor.u32 %v9860_v4, %v7664_v16  ;;  %v9636_v29 = vld [vmem:[#allocation11 + $0x44] sm:$0xf] }
  0xea   :  { %2388 = vmatpush.bf16.msra.mxu3 %v7023_v18  ;;  %2375 = vmatpush.bf16.msra.mxu2 %v6767_v20  ;;  %v9644_v18 = vld [vmem:[#allocation11 + $0x84] sm:$0xf] }
  0xeb   :  { %2414 = vmatpush.bf16.msrb.mxu1 %v7535_v24  ;;  %2401 = vmatpush.bf16.msrb.mxu0 %v7279_v25  ;;  %v6803_v20 = vor.u32 %v9644_v18, %v6800_v10  ;;  %v6992_v24 = vld [vmem:[#allocation11 + $0x220] sm:$0xf0]  ;;  %v7190_v10 = vld [vmem:[#allocation11 + $0x388] sm:$0xf] }
  0xec   :  { %v9852_v25 = vld [vmem:[#allocation11 + $0x704] sm:$0xf]  ;;  %v6995_v26 = vor.u32 %v9692_v23, %v6992_v24  ;;  %v9689_v23 = vld [vmem:[#allocation11 + $0x1e4] sm:$0xf0] }
  0xed   :  { %v7635_v28 = vor.u32 %v9852_v25, %v7632_v27  ;;  %v6768_v30 = vld [vmem:[#allocation11 + $0x60] sm:$0xf0]  ;;  %v7191_v25 = vor.u32 %v9745_v19, %v7190_v10  ;;  %v9737_v27 = vld [vmem:[#allocation11 + $0x364] sm:$0xf0] }
  0xee   :  { %2389 = vmatpush.bf16.msra.mxu3 %v6991_v31  ;;  %2376 = vmatpush.bf16.msra.mxu2 %v6735_v32  ;;  %v9796_v31 = vld [vmem:[#allocation11 + $0x544] sm:$0xf]  ;;  %v6771_v32 = vor.u32 %v9636_v29, %v6768_v30  ;;  %v370_v29 = vperm.slane %v10726_v61, 3  ;;  %v9865_v10 = vld [vmem:[#allocation11 + $0x764] sm:$0xf0] }
  0xef   :  { %2415 = vmatpush.bf16.msrb.mxu1 %v7503_v41  ;;  %2402 = vmatpush.bf16.msrb.mxu0 %v7247_v5  ;;  %v7408_v33 = vld [vmem:[#allocation11 + $0x560] sm:$0xf0] }
  0xf0   :  { %v7411_v34 = vor.u32 %v9796_v31, %v7408_v33  ;;  %v7600_v36 = vld [vmem:[#allocation11 + $0x6e0] sm:$0xf0]  ;;  %v6934_v33 = vld [vmem:[#allocation11 + $0x188] sm:$0xf] }
  0xf1   :  { %v9628_v38 = vld [vmem:[#allocation11 + $0x4] sm:$0xf] }
  0xf2   :  { %2434 = vmatpush.bf16.msrb.mxu3 %v7219_v35  ;;  %2421 = vmatpush.bf16.msrb.mxu2 %v6963_v37  ;;  %v9844_v35 = vld [vmem:[#allocation11 + $0x6c4] sm:$0xf] }
  0xf3   :  { %2460 = vmatpush.bf16.msra.mxu1 %v7731_v42  ;;  %2447 = vmatpush.bf16.msra.mxu0 %v7475_v12  ;;  %v7603_v37 = vor.u32 %v9844_v35, %v7600_v36  ;;  %v6736_v39 = vld [vmem:[#allocation11 + $0x20] sm:$0xf0] }
  0xf4   :  { %v9788_v40 = vld [vmem:[#allocation11 + $0x504] sm:$0xf]  ;;  %v6739_v41 = vor.u32 %v9628_v38, %v6736_v39  ;;  %v7126_v38 = vld [vmem:[#allocation11 + $0x308] sm:$0xf] }
  0xf5   :  { %v7376_v42 = vld [vmem:[#allocation11 + $0x520] sm:$0xf0]  ;;  %v9729_v39 = vld [vmem:[#allocation11 + $0x324] sm:$0xf0] }
  0xf6   :  { %2435 = vmatpush.bf16.msrb.mxu3 %v7187_v43  ;;  %2422 = vmatpush.bf16.msrb.mxu2 %v6931_v45  ;;  %v7379_v43 = vor.u32 %v9788_v40, %v7376_v42  ;;  %v7568_v45 = vld [vmem:[#allocation11 + $0x6a0] sm:$0xf0] }
  0xf7   :  { %2461 = vmatpush.bf16.msra.mxu1 %v7699_v3  ;;  %2448 = vmatpush.bf16.msra.mxu0 %v7443_v22  ;;  %v7571_v46 = vor.u32 %v9836_v44, %v7568_v45  ;;  %v9780_v47 = vld [vmem:[#allocation11 + $0x4c4] sm:$0xf]  ;;  %v6966_v22 = vld [vmem:[#allocation11 + $0x1c8] sm:$0xf] }
  0xf8   :  { %v7344_v48 = vld [vmem:[#allocation11 + $0x4e0] sm:$0xf0]  ;;  %v6967_v30 = vor.u32 %v9689_v23, %v6966_v22  ;;  %v9673_v44 = vld [vmem:[#allocation11 + $0x164] sm:$0xf0] }
  0xf9   :  { %v9772_v53 = vld [vmem:[#allocation11 + $0x484] sm:$0xf]  ;;  %v6806_v22 = vld [vmem:[#allocation11 + $0x88] sm:$0xf] }
  0xfa   :  { %2436 = vmatpush.bf16.msrb.mxu3 %v7155_v49  ;;  %2423 = vmatpush.bf16.msrb.mxu2 %v6899_v51  ;;  %v7347_v49 = vor.u32 %v9780_v47, %v7344_v48  ;;  %v7536_v51 = vld [vmem:[#allocation11 + $0x660] sm:$0xf0]  ;;  %v7127_v47 = vor.u32 %v9729_v39, %v7126_v38  ;;  %v7094_v48 = vld [vmem:[#allocation11 + $0x2c8] sm:$0xf]  ;;  %v9749_v38 = vld [vmem:[#allocation11 + $0x3cc] sm:$0xf] }
  0xfb   :  { %2462 = vmatpush.bf16.msra.mxu1 %v7667_v17  ;;  %2449 = vmatpush.bf16.msra.mxu0 %v7411_v34  ;;  %v7539_v52 = vor.u32 %v9828_v50, %v7536_v51  ;;  %v7312_v54 = vld [vmem:[#allocation11 + $0x4a0] sm:$0xf0]  ;;  %v9681_v34 = vld [vmem:[#allocation11 + $0x1a4] sm:$0xf0]  ;;  %v7224_v39 = vld [vmem:[#allocation11 + $0x3e8] sm:$0xf0] }
  0xfc   :  { %v7504_v57 = vld [vmem:[#allocation11 + $0x620] sm:$0xf0]  ;;  %v6935_v42 = vor.u32 %v9681_v34, %v6934_v33  ;;  %v7734_v50 = vld [vmem:[#allocation11 + $0x7c8] sm:$0xf] }
  0xfd   :  { %v7280_v60 = vld [vmem:[#allocation11 + $0x460] sm:$0xf0]  ;;  %v9881_v51 = vld [vmem:[#allocation11 + $0x7e4] sm:$0xf0] }
  0xfe   :  { %2437 = vmatpush.bf16.msrb.mxu3 %v7123_v55  ;;  %2424 = vmatpush.bf16.msrb.mxu2 %v6867_v56  ;;  %v7315_v55 = vor.u32 %v9772_v53, %v7312_v54  ;;  %v9820_v56 = vld [vmem:[#allocation11 + $0x604] sm:$0xf]  ;;  %v9697_v33 = vld [vmem:[#allocation11 + $0x224] sm:$0xf0] }
  0xff   :  { %2463 = vmatpush.bf16.msra.mxu1 %v7635_v28  ;;  %2450 = vmatpush.bf16.msra.mxu0 %v7379_v43  ;;  %v7507_v58 = vor.u32 %v9820_v56, %v7504_v57  ;;  %v9756_v0 = vld [vmem:[#allocation11 + $0x404] sm:$0xf]  ;;  %v6902_v43 = vld [vmem:[#allocation11 + $0x148] sm:$0xf] }
 0x100   :  { %v7248_v1 = vld [vmem:[#allocation11 + $0x420] sm:$0xf0]  ;;  %v6903_v53 = vor.u32 %v9673_v44, %v6902_v43  ;;  %v9665_v56 = vld [vmem:[#allocation11 + $0x124] sm:$0xf0] }
 0x101   :  { %v7251_v2 = vor.u32 %v9756_v0, %v7248_v1  ;;  %v9713_v1 = vld [vmem:[#allocation11 + $0x2a4] sm:$0xf0] }
 0x102   :  { %2438 = vmatpush.bf16.msrb.mxu3 %v7091_v59  ;;  %2425 = vmatpush.bf16.msrb.mxu2 %v6835_v9  ;;  %v9764_v59 = vld [vmem:[#allocation11 + $0x444] sm:$0xf]  ;;  %v7222_v9 = vld [vmem:[#allocation11 + $0x3c8] sm:$0xf] }
 0x103   :  { %2464 = vmatpush.bf16.msra.mxu1 %v7603_v37  ;;  %2451 = vmatpush.bf16.msra.mxu0 %v7347_v49  ;;  %v7283_v62 = vor.u32 %v9764_v59, %v7280_v60  ;;  %v7223_v16 = vor.u32 %v9753_v11, %v7222_v9  ;;  %v9721_v49 = vld [vmem:[#allocation11 + $0x2e4] sm:$0xf0] }
 0x104   :  { %v7095_v60 = vor.u32 %v9721_v49, %v7094_v48  ;;  %v9657_v9 = vld [vmem:[#allocation11 + $0xe4] sm:$0xf0] }
 0x105   :  { %v7478_v11 = vld [vmem:[#allocation11 + $0x5c8] sm:$0xf] }
 0x106   :  { %2439 = vmatpush.bf16.msrb.mxu3 %v7059_v63  ;;  %2426 = vmatpush.bf16.msrb.mxu2 %v6803_v20  ;;  %v368_v63 = vperm.slane %v10726_v61, 1  ;;  %v7638_v34 = vld [vmem:[#allocation11 + $0x708] sm:$0xf] }
 0x107   :  { %2465 = vmatpush.bf16.msra.mxu1 %v7571_v46  ;;  %2452 = vmatpush.bf16.msra.mxu0 %v7315_v55  ;;  %v369_v46 = vperm.slane %v10726_v61, 2  ;;  %v6870_v55 = vld [vmem:[#allocation11 + $0x108] sm:$0xf] }
 0x108   :  { %v9801_v43 = vld [vmem:[#allocation11 + $0x564] sm:$0xf0] }
 0x109   :  { %v9849_v48 = vld [vmem:[#allocation11 + $0x6e4] sm:$0xf0] }
 0x10a   :  { %2440 = vmatpush.bf16.msrb.mxu3 %v7027_v15  ;;  %2427 = vmatpush.bf16.msrb.mxu2 %v6771_v32 }
 0x10b   :  { %2466 = vmatpush.bf16.msra.mxu1 %v7539_v52  ;;  %2453 = vmatpush.bf16.msra.mxu0 %v7283_v62  ;;  %v7735_v62 = vor.u32 %v9881_v51, %v7734_v50  ;;  %v9741_v51 = vld [vmem:[#allocation11 + $0x38c] sm:$0xf] }
 0x10e   :  { %2441 = vmatpush.bf16.msrb.mxu3 %v6995_v26  ;;  %2428 = vmatpush.bf16.msrb.mxu2 %v6739_v41  ;;  %v7158_v26 = vld [vmem:[#allocation11 + $0x348] sm:$0xf] }
 0x10f   :  { %2467 = vmatpush.bf16.msra.mxu1 %v7507_v58  ;;  %2454 = vmatpush.bf16.msra.mxu0 %v7251_v2  ;;  %v7159_v36 = vor.u32 %v9737_v27, %v7158_v26  ;;  %v7702_v2 = vld [vmem:[#allocation11 + $0x788] sm:$0xf] }
 0x110   :  { %v7446_v26 = vld [vmem:[#allocation11 + $0x588] sm:$0xf] }
 0x111   :  { %v9809_v27 = vld [vmem:[#allocation11 + $0x5a4] sm:$0xf0] }
 0x14d   :  { %v730_v3 = vpop.f32.mrf.mxu0 }
 0x14e   :  { %v731_v5 = vadd.f32 %v730_v3, %v368_v63  ;;  %v743_v6 = vpop.f32.mrf.mxu1  ;;  %v7062_v63 = vld [vmem:[#allocation11 + $0x288] sm:$0xf] }
 0x14f   :  { %v9873_v3 = vld [vmem:[#allocation11 + $0x7a4] sm:$0xf0] }
 0x150   :  { %v744_v7 = vadd.f32 %v743_v6, %v731_v5 }
 0x152   :  { %vm800_vm2 = vcmp.ge.f32.partialorder %v744_v7, 0.0  ;;  %v804_v12 = vmul.f32 0.2, %v744_v7 }
 0x153   :  { %v704_v13 = vpop.f32.mrf.mxu2 }
 0x154   :  { %v808_v14 = vsel %vm800_vm2, %v744_v7, %v804_v12  ;;  %v705_v4 = vadd.f32 %v704_v13, %v367_v8  ;;  %v717_v15 = vpop.f32.mrf.mxu3  ;;  %v6871_v7 = vor.u32 %v9665_v56, %v6870_v55  ;;  %v6838_v8 = vld [vmem:[#allocation11 + $0xc8] sm:$0xf] }
 0x155   :  { %v10730_v17 = vpack.c.bf16 %v808_v14, %v808_v14  ;;  %v732_v18 = vpop.f32.mrf.mxu0  ;;  %v9817_v12 = vld [vmem:[#allocation11 + $0x5e4] sm:$0xf0]  ;;  %v7063_v14 = vor.u32 %v9713_v1, %v7062_v63 }
 0x156   :  { %v718_v20 = vadd.f32 %v717_v15, %v705_v4  ;;  %v745_v21 = vpop.f32.mrf.mxu1  ;;  %v7703_v4 = vor.u32 %v9873_v3, %v7702_v2  ;;  %v7030_v15 = vld [vmem:[#allocation11 + $0x248] sm:$0xf]  ;;  %v9733_v2 = vld [vmem:[#allocation11 + $0x34c] sm:$0xf] }
 0x157   :  { %2390 = vmatmul.bf16.vlgmr.msra.gmra.mxu3 %v10730_v17  ;;  %v7670_v18 = vld [vmem:[#allocation11 + $0x748] sm:$0xf]  ;;  %v7479_v21 = vor.u32 %v9817_v12, %v7478_v11  ;;  %v7160_v3 = vld [vmem:[#allocation11 + $0x368] sm:$0xf0] }
 0x158   :  { %vm799_vm3 = vcmp.ge.f32.partialorder %v718_v20, 0.0  ;;  %v803_v24 = vmul.f32 0.2, %v718_v20  ;;  %2486 = vmatpush.bf16.msra.mxu3 %v7223_v16  ;;  %v9705_v16 = vld [vmem:[#allocation11 + $0x264] sm:$0xf0]  ;;  %v7163_v12 = vor.u32 %v9733_v2, %v7160_v3 }
 0x159   :  { %v7382_v55 = vld [vmem:[#allocation11 + $0x508] sm:$0xf]  ;;  %v6936_v11 = vld [vmem:[#allocation11 + $0x1a8] sm:$0xf0] }
 0x15a   :  { %v807_v28 = vsel %vm799_vm3, %v718_v20, %v803_v24  ;;  %v6839_v20 = vor.u32 %v9657_v9, %v6838_v8  ;;  %v9793_v56 = vld [vmem:[#allocation11 + $0x524] sm:$0xf0]  ;;  %v9677_v9 = vld [vmem:[#allocation11 + $0x18c] sm:$0xf] }
 0x15b   :  { %v10734_v31 = vpack.c.bf16 %v807_v28, %v807_v28  ;;  %v706_v32 = vpop.f32.mrf.mxu2  ;;  %v9841_v63 = vld [vmem:[#allocation11 + $0x6a4] sm:$0xf0]  ;;  %v7383_v1 = vor.u32 %v9793_v56, %v7382_v55  ;;  %v9701_v55 = vld [vmem:[#allocation11 + $0x24c] sm:$0xf] }
 0x15c   :  { %v719_v35 = vpop.f32.mrf.mxu3  ;;  %2487 = vmatpush.bf16.msra.mxu3 %v7191_v25  ;;  %v9649_v25 = vld [vmem:[#allocation11 + $0xa4] sm:$0xf0]  ;;  %v7448_v2 = vld [vmem:[#allocation11 + $0x5a8] sm:$0xf0] }
 0x15d   :  { %v782_v37 = vpop.f32.mrf.mxu0  ;;  %2377 = vmatmul.bf16.vlgmr.msra.gmra.mxu2 %v10734_v31  ;;  %v6998_v32 = vld [vmem:[#allocation11 + $0x208] sm:$0xf] }
 0x15e   :  { %v783_v40 = vadd.f32 %v782_v37, %v370_v29  ;;  %v795_v41 = vpop.f32.mrf.mxu1  ;;  %2473 = vmatpush.bf16.msra.mxu2 %v6967_v30  ;;  %v7031_v29 = vor.u32 %v9705_v16, %v7030_v15  ;;  %v7671_v30 = vor.u32 %v9865_v10, %v7670_v18  ;;  %v9857_v35 = vld [vmem:[#allocation11 + $0x724] sm:$0xf0]  ;;  %v7447_v37 = vor.u32 %v9809_v27, %v7446_v26  ;;  %v9725_v15 = vld [vmem:[#allocation11 + $0x30c] sm:$0xf] }
 0x15f   :  { %v6999_v44 = vor.u32 %v9697_v33, %v6998_v32  ;;  %v7128_v16 = vld [vmem:[#allocation11 + $0x328] sm:$0xf0]  ;;  %v6939_v18 = vor.u32 %v9677_v9, %v6936_v11  ;;  %v7318_v10 = vld [vmem:[#allocation11 + $0x488] sm:$0xf] }
 0x160   :  { %v796_v45 = vadd.f32 %v795_v41, %v783_v40  ;;  %2488 = vmatpush.bf16.msra.mxu3 %v7159_v36  ;;  %v6807_v36 = vor.u32 %v9649_v25, %v6806_v22  ;;  %v6774_v40 = vld [vmem:[#allocation11 + $0x48] sm:$0xf]  ;;  %v6904_v22 = vld [vmem:[#allocation11 + $0x168] sm:$0xf0] }
 0x161   :  { %v9641_v41 = vld [vmem:[#allocation11 + $0x64] sm:$0xf0]  ;;  %v9717_v27 = vld [vmem:[#allocation11 + $0x2cc] sm:$0xf] }
 0x162   :  { %vm802_vm4 = vcmp.ge.f32.partialorder %v796_v45, 0.0  ;;  %v806_v52 = vmul.f32 0.2, %v796_v45  ;;  %2474 = vmatpush.bf16.msra.mxu2 %v6935_v42  ;;  %v7414_v42 = vld [vmem:[#allocation11 + $0x548] sm:$0xf]  ;;  %v6775_v49 = vor.u32 %v9641_v41, %v6774_v40 }
 0x163   :  { %v756_v54 = vpop.f32.mrf.mxu2  ;;  %v7415_v50 = vor.u32 %v9801_v43, %v7414_v42  ;;  %v7510_v25 = vld [vmem:[#allocation11 + $0x608] sm:$0xf]  ;;  %v7736_v32 = vld [vmem:[#allocation11 + $0x7e8] sm:$0xf0] }
 0x164   :  { %v810_v57 = vsel %vm802_vm4, %v796_v45, %v806_v52  ;;  %v757_v58 = vadd.f32 %v756_v54, %v369_v46  ;;  %v769_v59 = vpop.f32.mrf.mxu3  ;;  %2489 = vmatpush.bf16.msra.mxu3 %v7127_v47  ;;  %v7639_v45 = vor.u32 %v9857_v35, %v7638_v34  ;;  %v7227_v46 = vor.u32 %v9749_v38, %v7224_v39  ;;  %v7606_v47 = vld [vmem:[#allocation11 + $0x6c8] sm:$0xf]  ;;  %v7192_v52 = vld [vmem:[#allocation11 + $0x3a8] sm:$0xf0] }
 0x165   :  { %v10738_v61 = vpack.c.bf16 %v810_v57, %v810_v57  ;;  %v784_v0 = vpop.f32.mrf.mxu0  ;;  %v9633_v54 = vld [vmem:[#allocation11 + $0x24] sm:$0xf0]  ;;  %v7607_v57 = vor.u32 %v9849_v48, %v7606_v47  ;;  %v6872_v38 = vld [vmem:[#allocation11 + $0x128] sm:$0xf0] }
 0x166   :  { %v770_v5 = vadd.f32 %v769_v59, %v757_v58  ;;  %v797_v6 = vpop.f32.mrf.mxu1  ;;  %2475 = vmatpush.bf16.msra.mxu2 %v6903_v53  ;;  %v6742_v53 = vld [vmem:[#allocation11 + $0x8] sm:$0xf]  ;;  %v9685_v58 = vld [vmem:[#allocation11 + $0x1cc] sm:$0xf] }
 0x167   :  { %2416 = vmatmul.bf16.vlgmr.msrb.gmra.mxu1 %v10738_v61  ;;  %2442 = vmatmul.bf16.vlgmr.msrb.gmra.mxu3 %v10730_v17  ;;  %v6968_v59 = vld [vmem:[#allocation11 + $0x1e8] sm:$0xf0]  ;;  %v6743_v0 = vor.u32 %v9633_v54, %v6742_v53  ;;  %v7350_v6 = vld [vmem:[#allocation11 + $0x4c8] sm:$0xf] }
 0x168   :  { %vm801_vm5 = vcmp.ge.f32.partialorder %v770_v5, 0.0  ;;  %v805_v13 = vmul.f32 0.2, %v770_v5  ;;  %2490 = vmatpush.bf16.msra.mxu3 %v7095_v60  ;;  %2512 = vmatpush.bf16.msrb.mxu1 %v7735_v62  ;;  %v7195_v60 = vor.u32 %v9741_v51, %v7192_v52  ;;  %v7574_v62 = vld [vmem:[#allocation11 + $0x688] sm:$0xf] }
 0x169   :  { %v7575_v8 = vor.u32 %v9841_v63, %v7574_v62  ;;  %v9825_v26 = vld [vmem:[#allocation11 + $0x624] sm:$0xf0]  ;;  %v9709_v41 = vld [vmem:[#allocation11 + $0x28c] sm:$0xf] }
 0x16a   :  { %v809_v19 = vsel %vm801_vm5, %v770_v5, %v805_v13  ;;  %2476 = vmatpush.bf16.msra.mxu2 %v6871_v7  ;;  %v6971_v5 = vor.u32 %v9685_v58, %v6968_v59  ;;  %v9785_v7 = vld [vmem:[#allocation11 + $0x4e4] sm:$0xf0]  ;;  %v7064_v43 = vld [vmem:[#allocation11 + $0x2a8] sm:$0xf0] }
 0x16b   :  { %v10742_v23 = vpack.c.bf16 %v809_v19, %v809_v19  ;;  %v758_v24 = vpop.f32.mrf.mxu2  ;;  %v7542_v13 = vld [vmem:[#allocation11 + $0x648] sm:$0xf]  ;;  %v9813_v51 = vld [vmem:[#allocation11 + $0x5cc] sm:$0xf]  ;;  %v7067_v53 = vor.u32 %v9709_v41, %v7064_v43  ;;  %v7166_v41 = vld [vmem:[#allocation11 + $0x350] sm:$0xf] }
 0x16c   :  { %v771_v28 = vpop.f32.mrf.mxu3  ;;  %2491 = vmatpush.bf16.msra.mxu3 %v7063_v14  ;;  %2513 = vmatpush.bf16.msrb.mxu1 %v7703_v4  ;;  %v9833_v14 = vld [vmem:[#allocation11 + $0x664] sm:$0xf0]  ;;  %v7351_v4 = vor.u32 %v9785_v7, %v7350_v6  ;;  %v7131_v24 = vor.u32 %v9725_v15, %v7128_v16  ;;  %v7480_v52 = vld [vmem:[#allocation11 + $0x5e8] sm:$0xf0] }
 0x16d   :  { %2403 = vmatmul.bf16.vlgmr.msrb.gmra.mxu0 %v10742_v23  ;;  %2429 = vmatmul.bf16.vlgmr.msrb.gmra.mxu2 %v10734_v31  ;;  %v9777_v19 = vld [vmem:[#allocation11 + $0x4a4] sm:$0xf0]  ;;  %v9861_v58 = vld [vmem:[#allocation11 + $0x74c] sm:$0xf]  ;;  %v7483_v62 = vor.u32 %v9813_v51, %v7480_v52 }
 0x16e   :  { %2477 = vmatpush.bf16.msra.mxu2 %v6839_v20  ;;  %2499 = vmatpush.bf16.msrb.mxu0 %v7479_v21  ;;  %v7543_v20 = vor.u32 %v9833_v14, %v7542_v13  ;;  %v9669_v21 = vld [vmem:[#allocation11 + $0x14c] sm:$0xf]  ;;  %v7319_v28 = vor.u32 %v9777_v19, %v7318_v10  ;;  %v7286_v34 = vld [vmem:[#allocation11 + $0x448] sm:$0xf]  ;;  %v7230_v13 = vld [vmem:[#allocation11 + $0x3d0] sm:$0xf] }
 0x16f   :  { %v6907_v33 = vor.u32 %v9669_v21, %v6904_v22  ;;  %v9769_v35 = vld [vmem:[#allocation11 + $0x464] sm:$0xf0]  ;;  %v7672_v59 = vld [vmem:[#allocation11 + $0x768] sm:$0xf0]  ;;  %v9754_v14 = vld [vmem:[#allocation11 + $0x3ec] sm:$0xf0] }
 0x170   :  { %2492 = vmatpush.bf16.msra.mxu3 %v7031_v29  ;;  %2514 = vmatpush.bf16.msrb.mxu1 %v7671_v30  ;;  %v7096_v29 = vld [vmem:[#allocation11 + $0x2e8] sm:$0xf0]  ;;  %v7287_v42 = vor.u32 %v9769_v35, %v7286_v34  ;;  %v7254_v47 = vld [vmem:[#allocation11 + $0x408] sm:$0xf]  ;;  %v6974_v34 = vld [vmem:[#allocation11 + $0x1d0] sm:$0xf] }
 0x171   :  { %v9877_v30 = vld [vmem:[#allocation11 + $0x7cc] sm:$0xf]  ;;  %v7099_v39 = vor.u32 %v9717_v27, %v7096_v29  ;;  %v9761_v48 = vld [vmem:[#allocation11 + $0x424] sm:$0xf0]  ;;  %v9746_v27 = vld [vmem:[#allocation11 + $0x3ac] sm:$0xf0] }
 0x172   :  { %2478 = vmatpush.bf16.msra.mxu2 %v6807_v36  ;;  %2500 = vmatpush.bf16.msrb.mxu0 %v7447_v37  ;;  %v7511_v36 = vor.u32 %v9825_v26, %v7510_v25  ;;  %v9661_v37 = vld [vmem:[#allocation11 + $0x10c] sm:$0xf]  ;;  %v7739_v40 = vor.u32 %v9877_v30, %v7736_v32  ;;  %v7255_v56 = vor.u32 %v9761_v48, %v7254_v47  ;;  %v7198_v26 = vld [vmem:[#allocation11 + $0x390] sm:$0xf] }
 0x173   :  { %v9645_v63 = vld [vmem:[#allocation11 + $0x8c] sm:$0xf]  ;;  %v9690_v35 = vld [vmem:[#allocation11 + $0x1ec] sm:$0xf0] }
 0x174   :  { %2493 = vmatpush.bf16.msra.mxu3 %v6999_v44  ;;  %2515 = vmatpush.bf16.msrb.mxu1 %v7639_v45  ;;  %v9869_v44 = vld [vmem:[#allocation11 + $0x78c] sm:$0xf]  ;;  %v6975_v43 = vor.u32 %v9690_v35, %v6974_v34  ;;  %v6942_v47 = vld [vmem:[#allocation11 + $0x190] sm:$0xf] }
 0x175   :  { %v7704_v45 = vld [vmem:[#allocation11 + $0x7a8] sm:$0xf0]  ;;  %v9682_v48 = vld [vmem:[#allocation11 + $0x1ac] sm:$0xf0] }
 0x176   :  { %2479 = vmatpush.bf16.msra.mxu2 %v6775_v49  ;;  %2501 = vmatpush.bf16.msrb.mxu0 %v7415_v50  ;;  %v9653_v49 = vld [vmem:[#allocation11 + $0xcc] sm:$0xf]  ;;  %v7707_v54 = vor.u32 %v9869_v44, %v7704_v45 }
 0x177   :  { %2468 = vmatmul.bf16.vlgmr.msra.gmra.mxu1 %v10738_v61  ;;  %2494 = vmatmul.bf16.vlgmr.msra.gmra.mxu3 %v10730_v17  ;;  %v6840_v50 = vld [vmem:[#allocation11 + $0xe8] sm:$0xf0] }
 0x178   :  { %2538 = vmatpush.bf16.msrb.mxu3 %v7227_v46  ;;  %2516 = vmatpush.bf16.msrb.mxu1 %v7607_v57  ;;  %v6875_v46 = vor.u32 %v9661_v37, %v6872_v38  ;;  %v7032_v57 = vld [vmem:[#allocation11 + $0x268] sm:$0xf0] }
 0x179   :  { %v7035_v3 = vor.u32 %v9701_v55, %v7032_v57  ;;  %v9693_v6 = vld [vmem:[#allocation11 + $0x20c] sm:$0xf]  ;;  %v6943_v55 = vor.u32 %v9682_v48, %v6942_v47  ;;  %v9858_v47 = vld [vmem:[#allocation11 + $0x72c] sm:$0xf0] }
 0x17a   :  { %2480 = vmatpush.bf16.msra.mxu2 %v6743_v0  ;;  %2502 = vmatpush.bf16.msrb.mxu0 %v7383_v1  ;;  %v6808_v0 = vld [vmem:[#allocation11 + $0xa8] sm:$0xf0] }
 0x17b   :  { %v9805_v1 = vld [vmem:[#allocation11 + $0x58c] sm:$0xf]  ;;  %v6811_v11 = vor.u32 %v9645_v63, %v6808_v0 }
 0x17c   :  { %2539 = vmatpush.bf16.msrb.mxu3 %v7195_v60  ;;  %2517 = vmatpush.bf16.msrb.mxu1 %v7575_v8  ;;  %v6843_v60 = vor.u32 %v9653_v49, %v6840_v50  ;;  %v7000_v7 = vld [vmem:[#allocation11 + $0x228] sm:$0xf0] }
 0x17d   :  { %2455 = vmatmul.bf16.vlgmr.msra.gmra.mxu0 %v10742_v23  ;;  %2481 = vmatmul.bf16.vlgmr.msra.gmra.mxu2 %v10734_v31  ;;  %v9853_v8 = vld [vmem:[#allocation11 + $0x70c] sm:$0xf]  ;;  %v7003_v10 = vor.u32 %v9693_v6, %v7000_v7  ;;  %v9882_v6 = vld [vmem:[#allocation11 + $0x7ec] sm:$0xf0] }
 0x17e   :  { %2525 = vmatpush.bf16.msrb.mxu2 %v6971_v5  ;;  %2503 = vmatpush.bf16.msrb.mxu0 %v7351_v4  ;;  %v7675_v5 = vor.u32 %v9861_v58, %v7672_v59  ;;  %v7640_v9 = vld [vmem:[#allocation11 + $0x728] sm:$0xf0]  ;;  %v6910_v59 = vld [vmem:[#allocation11 + $0x150] sm:$0xf] }
 0x17f   :  { %v9637_v4 = vld [vmem:[#allocation11 + $0x4c] sm:$0xf]  ;;  %v7643_v19 = vor.u32 %v9853_v8, %v7640_v9 }
 0x180   :  { %2540 = vmatpush.bf16.msrb.mxu3 %v7163_v12  ;;  %2518 = vmatpush.bf16.msrb.mxu1 %v7543_v20  ;;  %v7451_v12 = vor.u32 %v9805_v1, %v7448_v2  ;;  %v6776_v15 = vld [vmem:[#allocation11 + $0x68] sm:$0xf0]  ;;  %v7231_v20 = vor.u32 %v9754_v14, %v7230_v13  ;;  %v7102_v1 = vld [vmem:[#allocation11 + $0x2d0] sm:$0xf] }
 0x181   :  { %v9797_v16 = vld [vmem:[#allocation11 + $0x54c] sm:$0xf]  ;;  %v9666_v13 = vld [vmem:[#allocation11 + $0x12c] sm:$0xf0] }
 0x182   :  { %2526 = vmatpush.bf16.msrb.mxu2 %v6939_v18  ;;  %2504 = vmatpush.bf16.msrb.mxu0 %v7319_v28  ;;  %v7416_v18 = vld [vmem:[#allocation11 + $0x568] sm:$0xf0] }
 0x183   :  { %v9845_v21 = vld [vmem:[#allocation11 + $0x6cc] sm:$0xf]  ;;  %v7419_v25 = vor.u32 %v9797_v16, %v7416_v18  ;;  %v9714_v18 = vld [vmem:[#allocation11 + $0x2ac] sm:$0xf0] }
 0x184   :  { %2541 = vmatpush.bf16.msrb.mxu3 %v7131_v24  ;;  %2519 = vmatpush.bf16.msrb.mxu1 %v7511_v36  ;;  %v7608_v22 = vld [vmem:[#allocation11 + $0x6e8] sm:$0xf0]  ;;  %v6779_v24 = vor.u32 %v9637_v4, %v6776_v15  ;;  %v7199_v36 = vor.u32 %v9746_v27, %v7198_v26  ;;  %v7070_v15 = vld [vmem:[#allocation11 + $0x290] sm:$0xf] }
 0x185   :  { %v9629_v28 = vld [vmem:[#allocation11 + $0xc] sm:$0xf]  ;;  %v7486_v26 = vld [vmem:[#allocation11 + $0x5d0] sm:$0xf] }
 0x186   :  { %2527 = vmatpush.bf16.msrb.mxu2 %v6907_v33  ;;  %2505 = vmatpush.bf16.msrb.mxu0 %v7287_v42  ;;  %v6744_v29 = vld [vmem:[#allocation11 + $0x28] sm:$0xf0]  ;;  %v7611_v33 = vor.u32 %v9845_v21, %v7608_v22  ;;  %v9738_v42 = vld [vmem:[#allocation11 + $0x36c] sm:$0xf0] }
 0x187   :  { %2520 = vmatmul.bf16.vlgmr.msrb.gmra.mxu1 %v10738_v61  ;;  %v9789_v30 = vld [vmem:[#allocation11 + $0x50c] sm:$0xf]  ;;  %v7167_v49 = vor.u32 %v9738_v42, %v7166_v41  ;;  %v9818_v27 = vld [vmem:[#allocation11 + $0x5ec] sm:$0xf0] }
 0x188   :  { %2542 = vmatpush.bf16.msrb.mxu3 %v7099_v39  ;;  %2564 = vmatpush.bf16.msra.mxu1 %v7739_v40  ;;  %v7384_v32 = vld [vmem:[#allocation11 + $0x528] sm:$0xf0]  ;;  %v6747_v39 = vor.u32 %v9629_v28, %v6744_v29  ;;  %v7071_v28 = vor.u32 %v9714_v18, %v7070_v15  ;;  %v7487_v35 = vor.u32 %v9818_v27, %v7486_v26  ;;  %v9810_v41 = vld [vmem:[#allocation11 + $0x5ac] sm:$0xf0]  ;;  %v9734_v15 = vld [vmem:[#allocation11 + $0x354] sm:$0xf] }
 0x189   :  { %v9837_v37 = vld [vmem:[#allocation11 + $0x68c] sm:$0xf]  ;;  %v7387_v40 = vor.u32 %v9789_v30, %v7384_v32  ;;  %v7038_v32 = vld [vmem:[#allocation11 + $0x250] sm:$0xf]  ;;  %v7168_v18 = vld [vmem:[#allocation11 + $0x370] sm:$0xf0] }
 0x18a   :  { %2528 = vmatpush.bf16.msrb.mxu2 %v6875_v46  ;;  %2506 = vmatpush.bf16.msrb.mxu0 %v7255_v56  ;;  %v7576_v38 = vld [vmem:[#allocation11 + $0x6a8] sm:$0xf0]  ;;  %v7550_v26 = vld [vmem:[#allocation11 + $0x650] sm:$0xf] }
 0x18b   :  { %v9781_v44 = vld [vmem:[#allocation11 + $0x4cc] sm:$0xf]  ;;  %v7579_v46 = vor.u32 %v9837_v37, %v7576_v38  ;;  %v9866_v37 = vld [vmem:[#allocation11 + $0x76c] sm:$0xf0] }
 0x18c   :  { %2543 = vmatpush.bf16.msrb.mxu3 %v7067_v53  ;;  %2565 = vmatpush.bf16.msra.mxu1 %v7707_v54  ;;  %v7352_v45 = vld [vmem:[#allocation11 + $0x4e8] sm:$0xf0]  ;;  %v7134_v53 = vld [vmem:[#allocation11 + $0x310] sm:$0xf] }
 0x18d   :  { %2507 = vmatmul.bf16.vlgmr.msrb.gmra.mxu0 %v10742_v23  ;;  %v9829_v50 = vld [vmem:[#allocation11 + $0x64c] sm:$0xf]  ;;  %v7355_v52 = vor.u32 %v9781_v44, %v7352_v45  ;;  %v9730_v54 = vld [vmem:[#allocation11 + $0x32c] sm:$0xf0] }
 0x18e   :  { %2529 = vmatpush.bf16.msrb.mxu2 %v6843_v60  ;;  %2551 = vmatpush.bf16.msra.mxu0 %v7483_v62  ;;  %v7544_v51 = vld [vmem:[#allocation11 + $0x668] sm:$0xf0]  ;;  %v9674_v60 = vld [vmem:[#allocation11 + $0x16c] sm:$0xf0]  ;;  %v7135_v62 = vor.u32 %v9730_v54, %v7134_v53 }
 0x18f   :  { %v9773_v56 = vld [vmem:[#allocation11 + $0x48c] sm:$0xf]  ;;  %v7547_v58 = vor.u32 %v9829_v50, %v7544_v51  ;;  %v6911_v7 = vor.u32 %v9674_v60, %v6910_v59  ;;  %v6814_v38 = vld [vmem:[#allocation11 + $0x90] sm:$0xf]  ;;  %v9750_v50 = vld [vmem:[#allocation11 + $0x3d4] sm:$0xf] }
 0x190   :  { %2544 = vmatpush.bf16.msrb.mxu3 %v7035_v3  ;;  %2566 = vmatpush.bf16.msra.mxu1 %v7675_v5  ;;  %v7320_v57 = vld [vmem:[#allocation11 + $0x4a8] sm:$0xf0]  ;;  %v9722_v3 = vld [vmem:[#allocation11 + $0x2ec] sm:$0xf0]  ;;  %v7232_v51 = vld [vmem:[#allocation11 + $0x3f0] sm:$0xf0] }
 0x191   :  { %v9821_v63 = vld [vmem:[#allocation11 + $0x60c] sm:$0xf]  ;;  %v7323_v2 = vor.u32 %v9773_v56, %v7320_v57  ;;  %v7742_v5 = vld [vmem:[#allocation11 + $0x7d0] sm:$0xf]  ;;  %v7103_v14 = vor.u32 %v9722_v3, %v7102_v1  ;;  %v7200_v1 = vld [vmem:[#allocation11 + $0x3b0] sm:$0xf0] }
 0x192   :  { %2530 = vmatpush.bf16.msrb.mxu2 %v6811_v11  ;;  %2552 = vmatpush.bf16.msra.mxu0 %v7451_v12  ;;  %v7512_v0 = vld [vmem:[#allocation11 + $0x628] sm:$0xf0]  ;;  %v6878_v12 = vld [vmem:[#allocation11 + $0x110] sm:$0xf]  ;;  %v7743_v4 = vor.u32 %v9882_v6, %v7742_v5 }
 0x193   :  { %v9765_v8 = vld [vmem:[#allocation11 + $0x44c] sm:$0xf]  ;;  %v7515_v11 = vor.u32 %v9821_v63, %v7512_v0  ;;  %v9698_v45 = vld [vmem:[#allocation11 + $0x22c] sm:$0xf0]  ;;  %v9742_v0 = vld [vmem:[#allocation11 + $0x394] sm:$0xf] }
 0x194   :  { %2545 = vmatpush.bf16.msrb.mxu3 %v7003_v10  ;;  %2567 = vmatpush.bf16.msra.mxu1 %v7643_v19  ;;  %v7288_v9 = vld [vmem:[#allocation11 + $0x468] sm:$0xf0]  ;;  %v7710_v10 = vld [vmem:[#allocation11 + $0x790] sm:$0xf] }
 0x195   :  { %v7291_v16 = vor.u32 %v9765_v8, %v7288_v9  ;;  %v9874_v19 = vld [vmem:[#allocation11 + $0x7ac] sm:$0xf0]  ;;  %v9757_v21 = vld [vmem:[#allocation11 + $0x40c] sm:$0xf]  ;;  %v6976_v8 = vld [vmem:[#allocation11 + $0x1f0] sm:$0xf0] }
 0x196   :  { %2531 = vmatpush.bf16.msrb.mxu2 %v6779_v24  ;;  %2553 = vmatpush.bf16.msra.mxu0 %v7419_v25  ;;  %v7256_v22 = vld [vmem:[#allocation11 + $0x428] sm:$0xf0]  ;;  %v6846_v24 = vld [vmem:[#allocation11 + $0xd0] sm:$0xf]  ;;  %v7711_v29 = vor.u32 %v9874_v19, %v7710_v10 }
 0x197   :  { %2546 = vmatmul.bf16.vlgmr.msrb.gmra.mxu3 %v10730_v17  ;;  %v9658_v25 = vld [vmem:[#allocation11 + $0xec] sm:$0xf0]  ;;  %v7259_v30 = vor.u32 %v9757_v21, %v7256_v22  ;;  %v6944_v21 = vld [vmem:[#allocation11 + $0x1b0] sm:$0xf0] }
 0x198   :  { %2590 = vmatpush.bf16.msra.mxu3 %v7231_v20  ;;  %2568 = vmatpush.bf16.msra.mxu1 %v7611_v33  ;;  %v6879_v20 = vor.u32 %v9666_v13, %v6878_v12  ;;  %v9706_v33 = vld [vmem:[#allocation11 + $0x26c] sm:$0xf0]  ;;  %v6847_v34 = vor.u32 %v9658_v25, %v6846_v24  ;;  %v7171_v24 = vor.u32 %v9734_v15, %v7168_v18  ;;  %v7456_v15 = vld [vmem:[#allocation11 + $0x5b0] sm:$0xf0] }
 0x199   :  { %v7039_v42 = vor.u32 %v9706_v33, %v7038_v32  ;;  %v9642_v53 = vld [vmem:[#allocation11 + $0x6c] sm:$0xf0]  ;;  %v9694_v18 = vld [vmem:[#allocation11 + $0x214] sm:$0xf] }
 0x19a   :  { %2532 = vmatpush.bf16.msrb.mxu2 %v6747_v39  ;;  %2554 = vmatpush.bf16.msra.mxu0 %v7387_v40  ;;  %v9650_v39 = vld [vmem:[#allocation11 + $0xac] sm:$0xf0] }
 0x19b   :  { %v7454_v40 = vld [vmem:[#allocation11 + $0x590] sm:$0xf]  ;;  %v6815_v48 = vor.u32 %v9650_v39, %v6814_v38 }
 0x19c   :  { %2591 = vmatpush.bf16.msra.mxu3 %v7199_v36  ;;  %2569 = vmatpush.bf16.msra.mxu1 %v7579_v46  ;;  %v7678_v36 = vld [vmem:[#allocation11 + $0x750] sm:$0xf] }
 0x19d   :  { %2533 = vmatmul.bf16.vlgmr.msrb.gmra.mxu2 %v10734_v31  ;;  %v7679_v44 = vor.u32 %v9866_v37, %v7678_v36  ;;  %v7646_v46 = vld [vmem:[#allocation11 + $0x710] sm:$0xf] }
 0x19e   :  { %2577 = vmatpush.bf16.msra.mxu2 %v6975_v43  ;;  %2555 = vmatpush.bf16.msra.mxu0 %v7355_v52  ;;  %v7006_v43 = vld [vmem:[#allocation11 + $0x210] sm:$0xf]  ;;  %v7647_v57 = vor.u32 %v9858_v47, %v7646_v46 }
 0x19f   :  { %v6782_v52 = vld [vmem:[#allocation11 + $0x50] sm:$0xf]  ;;  %v7007_v56 = vor.u32 %v9698_v45, %v7006_v43  ;;  %v7744_v45 = vld [vmem:[#allocation11 + $0x7f0] sm:$0xf0] }
 0x1a0   :  { %2592 = vmatpush.bf16.msra.mxu3 %v7167_v49  ;;  %2570 = vmatpush.bf16.msra.mxu1 %v7547_v58  ;;  %v7455_v49 = vor.u32 %v9810_v41, %v7454_v40  ;;  %v7422_v54 = vld [vmem:[#allocation11 + $0x550] sm:$0xf]  ;;  %v7235_v58 = vor.u32 %v9750_v50, %v7232_v51  ;;  %v9718_v41 = vld [vmem:[#allocation11 + $0x2d4] sm:$0xf] }
 0x1a1   :  { %v7614_v59 = vld [vmem:[#allocation11 + $0x6d0] sm:$0xf] }
 0x1a2   :  { %2578 = vmatpush.bf16.msra.mxu2 %v6943_v55  ;;  %2556 = vmatpush.bf16.msra.mxu0 %v7323_v2  ;;  %v9802_v55 = vld [vmem:[#allocation11 + $0x56c] sm:$0xf0] }
 0x1a3   :  { %v9850_v60 = vld [vmem:[#allocation11 + $0x6ec] sm:$0xf0]  ;;  %v7423_v63 = vor.u32 %v9802_v55, %v7422_v54  ;;  %v7072_v54 = vld [vmem:[#allocation11 + $0x2b0] sm:$0xf0] }
 0x1a4   :  { %2593 = vmatpush.bf16.msra.mxu3 %v7135_v62  ;;  %2571 = vmatpush.bf16.msra.mxu1 %v7515_v11  ;;  %v6783_v62 = vor.u32 %v9642_v53, %v6782_v52  ;;  %v6750_v2 = vld [vmem:[#allocation11 + $0x10] sm:$0xf]  ;;  %v7615_v9 = vor.u32 %v9850_v60, %v7614_v59  ;;  %v7203_v11 = vor.u32 %v9742_v0, %v7200_v1  ;;  %v9710_v53 = vld [vmem:[#allocation11 + $0x294] sm:$0xf] }
 0x1a5   :  { %v9634_v3 = vld [vmem:[#allocation11 + $0x2c] sm:$0xf0]  ;;  %v9814_v0 = vld [vmem:[#allocation11 + $0x5d4] sm:$0xf] }
 0x1a6   :  { %2579 = vmatpush.bf16.msra.mxu2 %v6911_v7  ;;  %2557 = vmatpush.bf16.msra.mxu0 %v7291_v16  ;;  %v7390_v5 = vld [vmem:[#allocation11 + $0x510] sm:$0xf]  ;;  %v9686_v7 = vld [vmem:[#allocation11 + $0x1d4] sm:$0xf]  ;;  %v6751_v12 = vor.u32 %v9634_v3, %v6750_v2  ;;  %v7075_v2 = vor.u32 %v9710_v53, %v7072_v54  ;;  %v7174_v53 = vld [vmem:[#allocation11 + $0x358] sm:$0xf] }
 0x1a7   :  { %2572 = vmatmul.bf16.vlgmr.msra.gmra.mxu1 %v10738_v61  ;;  %v9794_v6 = vld [vmem:[#allocation11 + $0x52c] sm:$0xf0]  ;;  %v6979_v16 = vor.u32 %v9686_v7, %v6976_v8  ;;  %v7488_v1 = vld [vmem:[#allocation11 + $0x5f0] sm:$0xf0] }
 0x1a8   :  { %2594 = vmatpush.bf16.msra.mxu3 %v7103_v14  ;;  %2616 = vmatpush.bf16.msrb.mxu1 %v7743_v4  ;;  %v7391_v13 = vor.u32 %v9794_v6, %v7390_v5  ;;  %v7582_v14 = vld [vmem:[#allocation11 + $0x690] sm:$0xf]  ;;  %v9702_v7 = vld [vmem:[#allocation11 + $0x254] sm:$0xf] }
 0x1a9   :  { %v9842_v4 = vld [vmem:[#allocation11 + $0x6ac] sm:$0xf0]  ;;  %v7040_v8 = vld [vmem:[#allocation11 + $0x270] sm:$0xf0] }
 0x1aa   :  { %2580 = vmatpush.bf16.msra.mxu2 %v6879_v20  ;;  %2558 = vmatpush.bf16.msra.mxu0 %v7259_v30  ;;  %v7358_v10 = vld [vmem:[#allocation11 + $0x4d0] sm:$0xf]  ;;  %v9678_v20 = vld [vmem:[#allocation11 + $0x194] sm:$0xf]  ;;  %v7583_v22 = vor.u32 %v9842_v4, %v7582_v14 }
 0x1ab   :  { %v9786_v19 = vld [vmem:[#allocation11 + $0x4ec] sm:$0xf0]  ;;  %v7136_v30 = vld [vmem:[#allocation11 + $0x330] sm:$0xf0] }
 0x1ac   :  { %2595 = vmatpush.bf16.msra.mxu3 %v7071_v28  ;;  %2617 = vmatpush.bf16.msrb.mxu1 %v7711_v29  ;;  %v7359_v25 = vor.u32 %v9786_v19, %v7358_v10  ;;  %v9834_v27 = vld [vmem:[#allocation11 + $0x66c] sm:$0xf0]  ;;  %v9726_v28 = vld [vmem:[#allocation11 + $0x314] sm:$0xf]  ;;  %v6947_v29 = vor.u32 %v9678_v20, %v6944_v21 }
 0x1ad   :  { %2559 = vmatmul.bf16.vlgmr.msra.gmra.mxu0 %v10742_v23  ;;  %v7326_v32 = vld [vmem:[#allocation11 + $0x490] sm:$0xf]  ;;  %v7551_v36 = vor.u32 %v9834_v27, %v7550_v26  ;;  %v7139_v38 = vor.u32 %v9726_v28, %v7136_v30  ;;  %v6816_v14 = vld [vmem:[#allocation11 + $0xb0] sm:$0xf0]  ;;  %v9755_v26 = vld [vmem:[#allocation11 + $0x3f4] sm:$0xf0] }
 0x1ae   :  { %2581 = vmatpush.bf16.msra.mxu2 %v6847_v34  ;;  %2603 = vmatpush.bf16.msrb.mxu0 %v7487_v35  ;;  %v9778_v33 = vld [vmem:[#allocation11 + $0x4ac] sm:$0xf0]  ;;  %v9670_v34 = vld [vmem:[#allocation11 + $0x154] sm:$0xf] }
 0x1af   :  { %v6912_v35 = vld [vmem:[#allocation11 + $0x170] sm:$0xf0]  ;;  %v7518_v37 = vld [vmem:[#allocation11 + $0x610] sm:$0xf]  ;;  %v7327_v39 = vor.u32 %v9778_v33, %v7326_v32 }
 0x1b0   :  { %2596 = vmatpush.bf16.msra.mxu3 %v7039_v42  ;;  %2618 = vmatpush.bf16.msrb.mxu1 %v7679_v44  ;;  %v9826_v40 = vld [vmem:[#allocation11 + $0x62c] sm:$0xf0]  ;;  %v7104_v42 = vld [vmem:[#allocation11 + $0x2f0] sm:$0xf0]  ;;  %v6915_v43 = vor.u32 %v9670_v34, %v6912_v35 }
 0x1b1   :  { %v9878_v44 = vld [vmem:[#allocation11 + $0x7d4] sm:$0xf]  ;;  %v7294_v46 = vld [vmem:[#allocation11 + $0x450] sm:$0xf]  ;;  %v7519_v50 = vor.u32 %v9826_v40, %v7518_v37  ;;  %v7107_v51 = vor.u32 %v9718_v41, %v7104_v42  ;;  %v9747_v40 = vld [vmem:[#allocation11 + $0x3b4] sm:$0xf0] }
 0x1b2   :  { %2582 = vmatpush.bf16.msra.mxu2 %v6815_v48  ;;  %2604 = vmatpush.bf16.msrb.mxu0 %v7455_v49  ;;  %v9770_v47 = vld [vmem:[#allocation11 + $0x46c] sm:$0xf0]  ;;  %v9662_v48 = vld [vmem:[#allocation11 + $0x114] sm:$0xf]  ;;  %v7747_v52 = vor.u32 %v9878_v44, %v7744_v45  ;;  %v6982_v45 = vld [vmem:[#allocation11 + $0x1d8] sm:$0xf] }
 0x1b3   :  { %v6880_v49 = vld [vmem:[#allocation11 + $0x130] sm:$0xf0]  ;;  %v7295_v55 = vor.u32 %v9770_v47, %v7294_v46  ;;  %v7262_v59 = vld [vmem:[#allocation11 + $0x410] sm:$0xf]  ;;  %v9691_v46 = vld [vmem:[#allocation11 + $0x1f4] sm:$0xf0] }
 0x1b4   :  { %2597 = vmatpush.bf16.msra.mxu3 %v7007_v56  ;;  %2619 = vmatpush.bf16.msrb.mxu1 %v7647_v57  ;;  %v6883_v56 = vor.u32 %v9662_v48, %v6880_v49  ;;  %v9870_v57 = vld [vmem:[#allocation11 + $0x794] sm:$0xf]  ;;  %v9762_v60 = vld [vmem:[#allocation11 + $0x42c] sm:$0xf0]  ;;  %v6983_v54 = vor.u32 %v9691_v46, %v6982_v45 }
 0x1b5   :  { %v7263_v5 = vor.u32 %v9762_v60, %v7262_v59  ;;  %v9806_v4 = vld [vmem:[#allocation11 + $0x594] sm:$0xf]  ;;  %v9683_v59 = vld [vmem:[#allocation11 + $0x1b4] sm:$0xf0] }
 0x1b6   :  { %2583 = vmatpush.bf16.msra.mxu2 %v6783_v62  ;;  %2605 = vmatpush.bf16.msrb.mxu0 %v7423_v63  ;;  %v9654_v62 = vld [vmem:[#allocation11 + $0xd4] sm:$0xf] }
 0x1b7   :  { %2598 = vmatmul.bf16.vlgmr.msra.gmra.mxu3 %v10730_v17  ;;  %v6848_v63 = vld [vmem:[#allocation11 + $0xf0] sm:$0xf0] }
 0x1b8   :  { %2642 = vmatpush.bf16.msrb.mxu3 %v7235_v58  ;;  %2620 = vmatpush.bf16.msrb.mxu1 %v7615_v9  ;;  %v7712_v58 = vld [vmem:[#allocation11 + $0x7b0] sm:$0xf0]  ;;  %v6851_v6 = vor.u32 %v9654_v62, %v6848_v63 }
 0x1b9   :  { %v7715_v3 = vor.u32 %v9870_v57, %v7712_v58  ;;  %v9862_v9 = vld [vmem:[#allocation11 + $0x754] sm:$0xf]  ;;  %v6950_v58 = vld [vmem:[#allocation11 + $0x198] sm:$0xf] }
 0x1ba   :  { %2584 = vmatpush.bf16.msra.mxu2 %v6751_v12  ;;  %2606 = vmatpush.bf16.msrb.mxu0 %v7391_v13  ;;  %v7680_v12 = vld [vmem:[#allocation11 + $0x770] sm:$0xf0] }
 0x1bb   :  { %v9646_v13 = vld [vmem:[#allocation11 + $0x94] sm:$0xf]  ;;  %v7683_v10 = vor.u32 %v9862_v9, %v7680_v12  ;;  %v9675_v9 = vld [vmem:[#allocation11 + $0x174] sm:$0xf0] }
 0x1bc   :  { %2643 = vmatpush.bf16.msrb.mxu3 %v7203_v11  ;;  %2621 = vmatpush.bf16.msrb.mxu1 %v7583_v22  ;;  %v7491_v11 = vor.u32 %v9814_v0, %v7488_v1  ;;  %v6819_v19 = vor.u32 %v9646_v13, %v6816_v14  ;;  %v7008_v20 = vld [vmem:[#allocation11 + $0x230] sm:$0xf0] }
 0x1bd   :  { %2585 = vmatmul.bf16.vlgmr.msra.gmra.mxu2 %v10734_v31  ;;  %v9854_v21 = vld [vmem:[#allocation11 + $0x714] sm:$0xf]  ;;  %v7011_v32 = vor.u32 %v9694_v18, %v7008_v20 }
 0x1be   :  { %2629 = vmatpush.bf16.msrb.mxu2 %v6979_v16  ;;  %2607 = vmatpush.bf16.msrb.mxu0 %v7359_v25  ;;  %v7043_v16 = vor.u32 %v9702_v7, %v7040_v8  ;;  %v7648_v22 = vld [vmem:[#allocation11 + $0x730] sm:$0xf0]  ;;  %v7238_v25 = vld [vmem:[#allocation11 + $0x3d8] sm:$0xf] }
 0x1bf   :  { %v9638_v27 = vld [vmem:[#allocation11 + $0x54] sm:$0xf]  ;;  %v7651_v33 = vor.u32 %v9854_v21, %v7648_v22  ;;  %v7239_v34 = vor.u32 %v9755_v26, %v7238_v25  ;;  %v6918_v8 = vld [vmem:[#allocation11 + $0x158] sm:$0xf] }
 0x1c0   :  { %2644 = vmatpush.bf16.msrb.mxu3 %v7171_v24  ;;  %2622 = vmatpush.bf16.msrb.mxu1 %v7551_v36  ;;  %v7459_v24 = vor.u32 %v9806_v4, %v7456_v15  ;;  %v6784_v28 = vld [vmem:[#allocation11 + $0x70] sm:$0xf0]  ;;  %v7110_v15 = vld [vmem:[#allocation11 + $0x2d8] sm:$0xf]  ;;  %v6919_v18 = vor.u32 %v9675_v9, %v6918_v8  ;;  %v9751_v8 = vld [vmem:[#allocation11 + $0x3dc] sm:$0xf] }
 0x1c1   :  { %v7424_v30 = vld [vmem:[#allocation11 + $0x570] sm:$0xf0]  ;;  %v6787_v37 = vor.u32 %v9638_v27, %v6784_v28  ;;  %v6886_v22 = vld [vmem:[#allocation11 + $0x118] sm:$0xf]  ;;  %v7240_v9 = vld [vmem:[#allocation11 + $0x3f8] sm:$0xf0] }
 0x1c2   :  { %2630 = vmatpush.bf16.msrb.mxu2 %v6947_v29  ;;  %2608 = vmatpush.bf16.msrb.mxu0 %v7327_v39  ;;  %v9798_v29 = vld [vmem:[#allocation11 + $0x554] sm:$0xf]  ;;  %v7206_v39 = vld [vmem:[#allocation11 + $0x398] sm:$0xf] }
 0x1c3   :  { %v9846_v35 = vld [vmem:[#allocation11 + $0x6d4] sm:$0xf]  ;;  %v7207_v48 = vor.u32 %v9747_v40, %v7206_v39  ;;  %v6854_v39 = vld [vmem:[#allocation11 + $0xd8] sm:$0xf] }
 0x1c4   :  { %2645 = vmatpush.bf16.msrb.mxu3 %v7139_v38  ;;  %2623 = vmatpush.bf16.msrb.mxu1 %v7519_v50  ;;  %v7616_v36 = vld [vmem:[#allocation11 + $0x6f0] sm:$0xf0]  ;;  %v7427_v38 = vor.u32 %v9798_v29, %v7424_v30  ;;  %v7078_v29 = vld [vmem:[#allocation11 + $0x298] sm:$0xf] }
 0x1c5   :  { %v9630_v41 = vld [vmem:[#allocation11 + $0x14] sm:$0xf]  ;;  %v7619_v47 = vor.u32 %v9846_v35, %v7616_v36  ;;  %v9715_v30 = vld [vmem:[#allocation11 + $0x2b4] sm:$0xf0] }
 0x1c6   :  { %2631 = vmatpush.bf16.msrb.mxu2 %v6915_v43  ;;  %2609 = vmatpush.bf16.msrb.mxu0 %v7295_v55  ;;  %v6752_v42 = vld [vmem:[#allocation11 + $0x30] sm:$0xf0]  ;;  %v9739_v55 = vld [vmem:[#allocation11 + $0x374] sm:$0xf0] }
 0x1c7   :  { %2624 = vmatmul.bf16.vlgmr.msrb.gmra.mxu1 %v10738_v61  ;;  %v9790_v43 = vld [vmem:[#allocation11 + $0x514] sm:$0xf]  ;;  %v6755_v49 = vor.u32 %v9630_v41, %v6752_v42  ;;  %v7175_v62 = vor.u32 %v9739_v55, %v7174_v53  ;;  %v7718_v35 = vld [vmem:[#allocation11 + $0x798] sm:$0xf] }
 0x1c8   :  { %2646 = vmatpush.bf16.msrb.mxu3 %v7107_v51  ;;  %2668 = vmatpush.bf16.msra.mxu1 %v7747_v52  ;;  %v7392_v44 = vld [vmem:[#allocation11 + $0x530] sm:$0xf0]  ;;  %v9875_v36 = vld [vmem:[#allocation11 + $0x7b4] sm:$0xf0] }
 0x1c9   :  { %v7395_v50 = vor.u32 %v9790_v43, %v7392_v44  ;;  %v9838_v51 = vld [vmem:[#allocation11 + $0x694] sm:$0xf]  ;;  %v9659_v40 = vld [vmem:[#allocation11 + $0xf4] sm:$0xf0]  ;;  %v7079_v44 = vor.u32 %v9715_v30, %v7078_v29  ;;  %v7719_v45 = vor.u32 %v9875_v36, %v7718_v35 }
 0x1ca   :  { %2632 = vmatpush.bf16.msrb.mxu2 %v6883_v56  ;;  %2610 = vmatpush.bf16.msrb.mxu0 %v7263_v5  ;;  %v7584_v52 = vld [vmem:[#allocation11 + $0x6b0] sm:$0xf0]  ;;  %v9731_v5 = vld [vmem:[#allocation11 + $0x334] sm:$0xf0] }
 0x1cb   :  { %v9782_v56 = vld [vmem:[#allocation11 + $0x4d4] sm:$0xf]  ;;  %v7587_v60 = vor.u32 %v9838_v51, %v7584_v52  ;;  %v7494_v42 = vld [vmem:[#allocation11 + $0x5d8] sm:$0xf] }
 0x1cc   :  { %2647 = vmatpush.bf16.msrb.mxu3 %v7075_v2  ;;  %2669 = vmatpush.bf16.msra.mxu1 %v7715_v3  ;;  %v7360_v57 = vld [vmem:[#allocation11 + $0x4f0] sm:$0xf0]  ;;  %v7142_v2 = vld [vmem:[#allocation11 + $0x318] sm:$0xf]  ;;  %v6951_v3 = vor.u32 %v9683_v59, %v6950_v58 }
 0x1cd   :  { %2611 = vmatmul.bf16.vlgmr.msrb.gmra.mxu0 %v10742_v23  ;;  %v7363_v63 = vor.u32 %v9782_v56, %v7360_v57  ;;  %v9830_v0 = vld [vmem:[#allocation11 + $0x654] sm:$0xf]  ;;  %v7143_v13 = vor.u32 %v9731_v5, %v7142_v2  ;;  %v9819_v43 = vld [vmem:[#allocation11 + $0x5f4] sm:$0xf0] }
 0x1ce   :  { %2633 = vmatpush.bf16.msrb.mxu2 %v6851_v6  ;;  %2655 = vmatpush.bf16.msra.mxu0 %v7491_v11  ;;  %v7552_v1 = vld [vmem:[#allocation11 + $0x670] sm:$0xf0]  ;;  %v7495_v52 = vor.u32 %v9819_v43, %v7494_v42  ;;  %v9867_v53 = vld [vmem:[#allocation11 + $0x774] sm:$0xf0]  ;;  %v9735_v43 = vld [vmem:[#allocation11 + $0x35c] sm:$0xf] }
 0x1cf   :  { %v9774_v6 = vld [vmem:[#allocation11 + $0x494] sm:$0xf]  ;;  %v7555_v11 = vor.u32 %v9830_v0, %v7552_v1  ;;  %v9651_v55 = vld [vmem:[#allocation11 + $0xb4] sm:$0xf0] }
 0x1d0   :  { %2648 = vmatpush.bf16.msrb.mxu3 %v7043_v16  ;;  %2670 = vmatpush.bf16.msra.mxu1 %v7683_v10  ;;  %v7328_v7 = vld [vmem:[#allocation11 + $0x4b0] sm:$0xf0]  ;;  %v9723_v16 = vld [vmem:[#allocation11 + $0x2f4] sm:$0xf0] }
 0x1d1   :  { %v9822_v12 = vld [vmem:[#allocation11 + $0x614] sm:$0xf]  ;;  %v7331_v14 = vor.u32 %v9774_v6, %v7328_v7  ;;  %v7750_v10 = vld [vmem:[#allocation11 + $0x7d8] sm:$0xf]  ;;  %v7111_v27 = vor.u32 %v9723_v16, %v7110_v15  ;;  %v7243_v16 = vor.u32 %v9751_v8, %v7240_v9 }
 0x1d2   :  { %2634 = vmatpush.bf16.msrb.mxu2 %v6819_v19  ;;  %2656 = vmatpush.bf16.msra.mxu0 %v7459_v24  ;;  %v7520_v4 = vld [vmem:[#allocation11 + $0x630] sm:$0xf0]  ;;  %v9883_v19 = vld [vmem:[#allocation11 + $0x7f4] sm:$0xf0] }
 0x1d3   :  { %v9766_v20 = vld [vmem:[#allocation11 + $0x454] sm:$0xf]  ;;  %v9667_v24 = vld [vmem:[#allocation11 + $0x134] sm:$0xf0]  ;;  %v7523_v25 = vor.u32 %v9822_v12, %v7520_v4  ;;  %v7751_v28 = vor.u32 %v9883_v19, %v7750_v10 }
 0x1d4   :  { %2649 = vmatpush.bf16.msrb.mxu3 %v7011_v32  ;;  %2671 = vmatpush.bf16.msra.mxu1 %v7651_v33  ;;  %v7296_v21 = vld [vmem:[#allocation11 + $0x470] sm:$0xf0]  ;;  %v10762_v32 = vld [vmem:[#allocation13] sm:$0xff]  ;;  %v7462_v57 = vld [vmem:[#allocation11 + $0x598] sm:$0xf] }
 0x1d5   :  { %v7299_v33 = vor.u32 %v9766_v20, %v7296_v21  ;;  %v1073_v41 = vperm.slane %v10762_v32, 0  ;;  %v9811_v58 = vld [vmem:[#allocation11 + $0x5b4] sm:$0xf0] }
 0x1d6   :  { %2635 = vmatpush.bf16.msrb.mxu2 %v6787_v37  ;;  %2657 = vmatpush.bf16.msra.mxu0 %v7427_v38  ;;  %v9758_v37 = vld [vmem:[#allocation11 + $0x414] sm:$0xf]  ;;  %v9699_v1 = vld [vmem:[#allocation11 + $0x234] sm:$0xf0]  ;;  %v7463_v7 = vor.u32 %v9811_v58, %v7462_v57  ;;  %v9727_v57 = vld [vmem:[#allocation11 + $0x31c] sm:$0xf] }
 0x1d7   :  { %2650 = vmatmul.bf16.vlgmr.msrb.gmra.mxu3 %v10730_v17  ;;  %v7264_v38 = vld [vmem:[#allocation11 + $0x430] sm:$0xf0]  ;;  %v7654_v2 = vld [vmem:[#allocation11 + $0x718] sm:$0xf] }
 0x1d8   :  { %2694 = vmatpush.bf16.msra.mxu3 %v7239_v34  ;;  %2672 = vmatpush.bf16.msra.mxu1 %v7619_v47  ;;  %v6887_v34 = vor.u32 %v9667_v24, %v6886_v22  ;;  %v7267_v46 = vor.u32 %v9758_v37, %v7264_v38  ;;  %v6855_v47 = vor.u32 %v9659_v40, %v6854_v39  ;;  %v9643_v12 = vld [vmem:[#allocation11 + $0x74] sm:$0xf0]  ;;  %v9743_v22 = vld [vmem:[#allocation11 + $0x39c] sm:$0xf] }
 0x1d9   :  { %v9851_v10 = vld [vmem:[#allocation11 + $0x6f4] sm:$0xf0]  ;;  %v7208_v24 = vld [vmem:[#allocation11 + $0x3b8] sm:$0xf0] }
 0x1da   :  { %2636 = vmatpush.bf16.msrb.mxu2 %v6755_v49  ;;  %2658 = vmatpush.bf16.msra.mxu0 %v7395_v50  ;;  %v2391_v26 = vpop.f32.mrf.mxu3  ;;  %v9707_v49 = vld [vmem:[#allocation11 + $0x274] sm:$0xf0]  ;;  %v7211_v37 = vor.u32 %v9743_v22, %v7208_v24  ;;  %v9711_v24 = vld [vmem:[#allocation11 + $0x29c] sm:$0xf] }
 0x1db   :  { %v7686_v50 = vld [vmem:[#allocation11 + $0x758] sm:$0xf] }
 0x1dc   :  { %2695 = vmatpush.bf16.msra.mxu3 %v7207_v48  ;;  %2673 = vmatpush.bf16.msra.mxu1 %v7587_v60  ;;  %v7046_v48 = vld [vmem:[#allocation11 + $0x258] sm:$0xf] }
 0x1dd   :  { %2637 = vmatmul.bf16.vlgmr.msrb.gmra.mxu2 %v10734_v31  ;;  %v7047_v60 = vor.u32 %v9707_v49, %v7046_v48  ;;  %v9843_v42 = vld [vmem:[#allocation11 + $0x6b4] sm:$0xf0]  ;;  %v9679_v49 = vld [vmem:[#allocation11 + $0x19c] sm:$0xf] }
 0x1de   :  { %2681 = vmatpush.bf16.msra.mxu2 %v6983_v54  ;;  %2659 = vmatpush.bf16.msra.mxu0 %v7363_v63  ;;  %v6822_v54 = vld [vmem:[#allocation11 + $0x98] sm:$0xf]  ;;  %v7687_v63 = vor.u32 %v9867_v53, %v7686_v50  ;;  %v6952_v50 = vld [vmem:[#allocation11 + $0x1b8] sm:$0xf0] }
 0x1df   :  { %v6823_v0 = vor.u32 %v9651_v55, %v6822_v54  ;;  %v9787_v48 = vld [vmem:[#allocation11 + $0x4f4] sm:$0xf0]  ;;  %v6955_v58 = vor.u32 %v9679_v49, %v6952_v50  ;;  %v9863_v49 = vld [vmem:[#allocation11 + $0x75c] sm:$0xf] }
 0x1e0   :  { %2696 = vmatpush.bf16.msra.mxu3 %v7175_v62  ;;  %2674 = vmatpush.bf16.msra.mxu1 %v7555_v11  ;;  %v2378_v51 = vpop.f32.mrf.mxu2  ;;  %v7014_v62 = vld [vmem:[#allocation11 + $0x218] sm:$0xf] }
 0x1e1   :  { %v2379_v56 = vadd.f32 %v2378_v51, %v1073_v41  ;;  %v6790_v11 = vld [vmem:[#allocation11 + $0x58] sm:$0xf]  ;;  %v7015_v4 = vor.u32 %v9699_v1, %v7014_v62  ;;  %v9671_v1 = vld [vmem:[#allocation11 + $0x15c] sm:$0xf] }
 0x1e2   :  { %2682 = vmatpush.bf16.msra.mxu2 %v6951_v3  ;;  %2660 = vmatpush.bf16.msra.mxu0 %v7331_v14  ;;  %v2393_v59 = vpop.f32.mrf.mxu3  ;;  %v9859_v3 = vld [vmem:[#allocation11 + $0x734] sm:$0xf0]  ;;  %v6791_v20 = vor.u32 %v9643_v12, %v6790_v11  ;;  %v9719_v11 = vld [vmem:[#allocation11 + $0x2dc] sm:$0xf] }
 0x1e3   :  { %v2392_v5 = vadd.f32 %v2391_v26, %v2379_v56  ;;  %v9803_v14 = vld [vmem:[#allocation11 + $0x574] sm:$0xf0]  ;;  %v7655_v15 = vor.u32 %v9859_v3, %v7654_v2  ;;  %v7144_v59 = vld [vmem:[#allocation11 + $0x338] sm:$0xf0] }
 0x1e4   :  { %2697 = vmatpush.bf16.msra.mxu3 %v7143_v13  ;;  %2675 = vmatpush.bf16.msra.mxu1 %v7523_v25  ;;  %v2417_v6 = vpop.f32.mrf.mxu1  ;;  %v7430_v13 = vld [vmem:[#allocation11 + $0x558] sm:$0xf]  ;;  %v6920_v2 = vld [vmem:[#allocation11 + $0x178] sm:$0xf0] }
 0x1e5   :  { %v7431_v21 = vor.u32 %v9803_v14, %v7430_v13  ;;  %v6758_v25 = vld [vmem:[#allocation11 + $0x18] sm:$0xf]  ;;  %v7112_v12 = vld [vmem:[#allocation11 + $0x2f8] sm:$0xf0]  ;;  %v6923_v13 = vor.u32 %v9671_v1, %v6920_v2 }
 0x1e6   :  { %2683 = vmatpush.bf16.msra.mxu2 %v6919_v18  ;;  %2661 = vmatpush.bf16.msra.mxu0 %v7299_v33  ;;  %v7622_v18 = vld [vmem:[#allocation11 + $0x6d8] sm:$0xf]  ;;  %v9687_v33 = vld [vmem:[#allocation11 + $0x1dc] sm:$0xf] }
 0x1e7   :  { %2676 = vmatmul.bf16.vlgmr.msra.gmra.mxu1 %v10738_v61  ;;  %v9635_v26 = vld [vmem:[#allocation11 + $0x34] sm:$0xf0]  ;;  %v7623_v36 = vor.u32 %v9851_v10, %v7622_v18  ;;  %v9879_v14 = vld [vmem:[#allocation11 + $0x7dc] sm:$0xf] }
 0x1e8   :  { %2698 = vmatpush.bf16.msra.mxu3 %v7111_v27  ;;  %2720 = vmatpush.bf16.msrb.mxu1 %v7751_v28  ;;  %v2380_v19 = vpop.f32.mrf.mxu2  ;;  %v7398_v27 = vld [vmem:[#allocation11 + $0x518] sm:$0xf]  ;;  %v6759_v39 = vor.u32 %v9635_v26, %v6758_v25  ;;  %v9663_v18 = vld [vmem:[#allocation11 + $0x11c] sm:$0xf] }
 0x1e9   :  { %v9795_v28 = vld [vmem:[#allocation11 + $0x534] sm:$0xf0]  ;;  %v6888_v10 = vld [vmem:[#allocation11 + $0x138] sm:$0xf0] }
 0x1ea   :  { %2684 = vmatpush.bf16.msra.mxu2 %v6887_v34  ;;  %2662 = vmatpush.bf16.msra.mxu0 %v7267_v46  ;;  %v2404_v29 = vpop.f32.mrf.mxu0  ;;  %v10767_v30 = vpop.f32.mrf.mxu3  ;;  %v6984_v34 = vld [vmem:[#allocation11 + $0x1f8] sm:$0xf0]  ;;  %v7399_v40 = vor.u32 %v9795_v28, %v7398_v27  ;;  %v7590_v41 = vld [vmem:[#allocation11 + $0x698] sm:$0xf]  ;;  %v6891_v27 = vor.u32 %v9663_v18, %v6888_v10 }
 0x1eb   :  { %v2405_v35 = vadd.f32 %v2404_v29, %v2392_v5  ;;  %v7176_v46 = vld [vmem:[#allocation11 + $0x378] sm:$0xf0]  ;;  %v7591_v51 = vor.u32 %v9843_v42, %v7590_v41  ;;  %v7558_v55 = vld [vmem:[#allocation11 + $0x658] sm:$0xf] }
 0x1ec   :  { %2699 = vmatpush.bf16.msra.mxu3 %v7079_v44  ;;  %2721 = vmatpush.bf16.msrb.mxu1 %v7719_v45  ;;  %v2419_v38 = vpop.f32.mrf.mxu1  ;;  %v6987_v45 = vor.u32 %v9687_v33, %v6984_v34  ;;  %v7179_v53 = vor.u32 %v9735_v43, %v7176_v46  ;;  %v9835_v56 = vld [vmem:[#allocation11 + $0x674] sm:$0xf0]  ;;  %v7080_v25 = vld [vmem:[#allocation11 + $0x2b8] sm:$0xf0] }
 0x1ed   :  { %2663 = vmatmul.bf16.vlgmr.msra.gmra.mxu0 %v10742_v23  ;;  %v10769_v44 = vadd.f32 %v2417_v6, %v2405_v35  ;;  %v9779_v62 = vld [vmem:[#allocation11 + $0x4b4] sm:$0xf0]  ;;  %v7559_v3 = vor.u32 %v9835_v56, %v7558_v55  ;;  %v9871_v28 = vld [vmem:[#allocation11 + $0x79c] sm:$0xf]  ;;  %v7083_v42 = vor.u32 %v9711_v24, %v7080_v25 }
 0x1ee   :  { %2685 = vmatpush.bf16.msra.mxu2 %v6855_v47  ;;  %2707 = vmatpush.bf16.msrb.mxu0 %v7495_v52  ;;  %v7366_v47 = vld [vmem:[#allocation11 + $0x4d8] sm:$0xf]  ;;  %v7720_v29 = vld [vmem:[#allocation11 + $0x7b8] sm:$0xf0] }
 0x1ef   :  { %v7367_v54 = vor.u32 %v9787_v48, %v7366_v47  ;;  %v7526_v5 = vld [vmem:[#allocation11 + $0x618] sm:$0xf]  ;;  %v6856_v38 = vld [vmem:[#allocation11 + $0xf8] sm:$0xf0]  ;;  %v7723_v43 = vor.u32 %v9871_v28, %v7720_v29  ;;  %v7954_v28 = vld [vmem:[#allocation14 + $0x188] sm:$0xf] }
 0x1f0   :  { %2700 = vmatpush.bf16.msra.mxu3 %v7047_v60  ;;  %2722 = vmatpush.bf16.msrb.mxu1 %v7687_v63  ;;  %v10772_v52 = vpop.f32.mrf.mxu2  ;;  %v7334_v60 = vld [vmem:[#allocation11 + $0x498] sm:$0xf]  ;;  %v9703_v47 = vld [vmem:[#allocation11 + $0x25c] sm:$0xf]  ;;  %v9936_v29 = vld [vmem:[#allocation14 + $0x1a0] sm:$0xf0] }
 0x1f1   :  { %v7335_v8 = vor.u32 %v9779_v62, %v7334_v60  ;;  %v9827_v9 = vld [vmem:[#allocation11 + $0x634] sm:$0xf0]  ;;  %v7048_v48 = vld [vmem:[#allocation11 + $0x278] sm:$0xf0]  ;;  %vm2785_vm7 = vcmp.ge.f32.partialorder %v10769_v44, 0.0 }
 0x1f2   :  { %2686 = vmatpush.bf16.msra.mxu2 %v6823_v0  ;;  %2708 = vmatpush.bf16.msrb.mxu0 %v7463_v7  ;;  %v2406_v63 = vpop.f32.mrf.mxu0  ;;  %v2445_v0 = vpop.f32.mrf.mxu3  ;;  %v7147_v7 = vor.u32 %v9727_v57, %v7144_v59  ;;  %v7527_v19 = vor.u32 %v9827_v9, %v7526_v5  ;;  %v7270_v33 = vld [vmem:[#allocation11 + $0x418] sm:$0xf]  ;;  %v9807_v55 = vld [vmem:[#allocation11 + $0x59c] sm:$0xf]  ;;  %v7051_v57 = vor.u32 %v9703_v47, %v7048_v48 }
 0x1f3   :  { %v7464_v56 = vld [vmem:[#allocation11 + $0x5b8] sm:$0xf0] }
 0x1f4   :  { %2701 = vmatpush.bf16.msra.mxu3 %v7015_v4  ;;  %2723 = vmatpush.bf16.msrb.mxu1 %v7655_v15  ;;  %v10775_v6 = vpop.f32.mrf.mxu1  ;;  %v7752_v4 = vld [vmem:[#allocation11 + $0x7f8] sm:$0xf0]  ;;  %v7302_v15 = vld [vmem:[#allocation11 + $0x458] sm:$0xf]  ;;  %v7467_v5 = vor.u32 %v9807_v55, %v7464_v56 }
 0x1f5   :  { %v7755_v22 = vor.u32 %v9879_v14, %v7752_v4  ;;  %v7016_v63 = vld [vmem:[#allocation11 + $0x238] sm:$0xf0] }
 0x1f6   :  { %2687 = vmatpush.bf16.msra.mxu2 %v6791_v20  ;;  %2709 = vmatpush.bf16.msrb.mxu0 %v7431_v21  ;;  %v7115_v21 = vor.u32 %v9719_v11, %v7112_v12  ;;  %v9855_v0 = vld [vmem:[#allocation11 + $0x71c] sm:$0xf] }
 0x1f7   :  { %2702 = vmatmul.bf16.vlgmr.msra.gmra.mxu3 %v10730_v17  ;;  %v7656_v1 = vld [vmem:[#allocation11 + $0x738] sm:$0xf0] }
 0x1f8   :  { %2746 = vmatpush.bf16.msrb.mxu3 %v7243_v16  ;;  %2724 = vmatpush.bf16.msrb.mxu1 %v7623_v36  ;;  %v9771_v16 = vld [vmem:[#allocation11 + $0x474] sm:$0xf0]  ;;  %v2432_v20 = vpop.f32.mrf.mxu2  ;;  %v9639_v9 = vld [vmem:[#allocation11 + $0x5c] sm:$0xf] }
 0x1f9   :  { %v7303_v26 = vor.u32 %v9771_v16, %v7302_v15  ;;  %v9763_v36 = vld [vmem:[#allocation11 + $0x434] sm:$0xf0]  ;;  %v6792_v11 = vld [vmem:[#allocation11 + $0x78] sm:$0xf0]  ;;  %v7659_v15 = vor.u32 %v9855_v0, %v7656_v1 }
 0x1fa   :  { %2688 = vmatpush.bf16.msra.mxu2 %v6759_v39  ;;  %2710 = vmatpush.bf16.msrb.mxu0 %v7399_v40  ;;  %v10777_v34 = vpop.f32.mrf.mxu0  ;;  %v10779_v35 = vpop.f32.mrf.mxu3  ;;  %v9815_v39 = vld [vmem:[#allocation11 + $0x5dc] sm:$0xf] }
 0x1fb   :  { %v7496_v40 = vld [vmem:[#allocation11 + $0x5f8] sm:$0xf0] }
 0x1fc   :  { %2747 = vmatpush.bf16.msrb.mxu3 %v7211_v37  ;;  %2725 = vmatpush.bf16.msrb.mxu1 %v7591_v51  ;;  %v9655_v37 = vld [vmem:[#allocation11 + $0xdc] sm:$0xf]  ;;  %v2471_v41 = vpop.f32.mrf.mxu1  ;;  %v7499_v50 = vor.u32 %v9815_v39, %v7496_v40 }
 0x1fd   :  { %2689 = vmatmul.bf16.vlgmr.msra.gmra.mxu2 %v10734_v31  ;;  %v6859_v46 = vor.u32 %v9655_v37, %v6856_v38  ;;  %v7688_v51 = vld [vmem:[#allocation11 + $0x778] sm:$0xf0] }
 0x1fe   :  { %2733 = vmatpush.bf16.msrb.mxu2 %v6987_v45  ;;  %2711 = vmatpush.bf16.msrb.mxu0 %v7367_v54  ;;  %v7271_v45 = vor.u32 %v9763_v36, %v7270_v33  ;;  %v6824_v54 = vld [vmem:[#allocation11 + $0xb8] sm:$0xf0]  ;;  %v7691_v60 = vor.u32 %v9863_v49, %v7688_v51  ;;  %v1074_v49 = vperm.slane %v10762_v32, 1  ;;  %v7926_v51 = vld [vmem:[#allocation14 + $0x150] sm:$0xf] }
 0x1ff   :  { %v9799_v12 = vld [vmem:[#allocation11 + $0x55c] sm:$0xf] }
 0x200   :  { %2748 = vmatpush.bf16.msrb.mxu3 %v7179_v53  ;;  %2726 = vmatpush.bf16.msrb.mxu1 %v7559_v3  ;;  %v9647_v53 = vld [vmem:[#allocation11 + $0x9c] sm:$0xf]  ;;  %v10782_v59 = vpop.f32.mrf.mxu2  ;;  %v2431_v1 = vadd.f32 %v10772_v52, %v1074_v49  ;;  %v8010_v49 = vld [vmem:[#allocation14 + $0x1f8] sm:$0xf] }
 0x201   :  { %v6827_v62 = vor.u32 %v9647_v53, %v6824_v54  ;;  %v9847_v18 = vld [vmem:[#allocation11 + $0x6dc] sm:$0xf]  ;;  %v9929_v53 = vld [vmem:[#allocation14 + $0x168] sm:$0xf0] }
 0x202   :  { %2734 = vmatpush.bf16.msrb.mxu2 %v6955_v58  ;;  %2712 = vmatpush.bf16.msrb.mxu0 %v7335_v8  ;;  %v9695_v58 = vld [vmem:[#allocation11 + $0x21c] sm:$0xf]  ;;  %v2458_v2 = vpop.f32.mrf.mxu0  ;;  %v2497_v3 = vpop.f32.mrf.mxu3  ;;  %v9992_v8 = vld [vmem:[#allocation14 + $0x360] sm:$0xf0] }
 0x203   :  { %v7019_v4 = vor.u32 %v9695_v58, %v7016_v63  ;;  %v7624_v10 = vld [vmem:[#allocation11 + $0x6f8] sm:$0xf0]  ;;  %v8094_v58 = vld [vmem:[#allocation14 + $0x2a0] sm:$0xf]  ;;  %v7898_v2 = vld [vmem:[#allocation14 + $0x118] sm:$0xf] }
 0x204   :  { %2749 = vmatpush.bf16.msrb.mxu3 %v7147_v7  ;;  %2727 = vmatpush.bf16.msrb.mxu1 %v7527_v19  ;;  %v8178_v7 = vld [vmem:[#allocation14 + $0x348] sm:$0xf]  ;;  %v10785_v14 = vpop.f32.mrf.mxu1  ;;  %v6795_v19 = vor.u32 %v9639_v9, %v6792_v11  ;;  %v9631_v24 = vld [vmem:[#allocation11 + $0x1c] sm:$0xf]  ;;  %v7627_v36 = vor.u32 %v9847_v18, %v7624_v10  ;;  %v10104_v18 = vld [vmem:[#allocation14 + $0x6e0] sm:$0xf0]  ;;  %v2444_v10 = vadd.f32 %v10767_v30, %v2431_v1 }
 0x205   :  { %v8179_v16 = vor.u32 %v9992_v8, %v8178_v7  ;;  %v6760_v25 = vld [vmem:[#allocation11 + $0x38] sm:$0xf0]  ;;  %v10097_v30 = vld [vmem:[#allocation14 + $0x6a8] sm:$0xf0] }
 0x206   :  { %2735 = vmatpush.bf16.msrb.mxu2 %v6923_v13  ;;  %2713 = vmatpush.bf16.msrb.mxu0 %v7303_v26  ;;  %v7432_v13 = vld [vmem:[#allocation11 + $0x578] sm:$0xf0]  ;;  %v6763_v38 = vor.u32 %v9631_v24, %v6760_v25 }
 0x207   :  { %2728 = vmatmul.bf16.vlgmr.msrb.gmra.mxu1 %v10738_v61  ;;  %v7435_v20 = vor.u32 %v9799_v12, %v7432_v13  ;;  %v9791_v26 = vld [vmem:[#allocation11 + $0x51c] sm:$0xf]  ;;  %v8066_v12 = vld [vmem:[#allocation14 + $0x268] sm:$0xf]  ;;  %v9964_v13 = vld [vmem:[#allocation14 + $0x280] sm:$0xf0] }
 0x208   :  { %2750 = vmatpush.bf16.msrb.mxu3 %v7115_v21  ;;  %2772 = vmatpush.bf16.msra.mxu1 %v7755_v22  ;;  %v8150_v21 = vld [vmem:[#allocation14 + $0x310] sm:$0xf]  ;;  %v9985_v22 = vld [vmem:[#allocation14 + $0x328] sm:$0xf0]  ;;  %v2484_v33 = vpop.f32.mrf.mxu2  ;;  %v9839_v40 = vld [vmem:[#allocation11 + $0x69c] sm:$0xf]  ;;  %v8067_v24 = vor.u32 %v9964_v13, %v8066_v12 }
 0x209   :  { %v8151_v37 = vor.u32 %v9985_v22, %v8150_v21  ;;  %v7592_v41 = vld [vmem:[#allocation11 + $0x6b8] sm:$0xf0]  ;;  %v2457_v22 = vadd.f32 %v10777_v34, %v2444_v10  ;;  %v10048_v34 = vld [vmem:[#allocation14 + $0x520] sm:$0xf0]  ;;  %v2793_v10 = vmul.f32 0.2, %v10769_v44 }
 0x20a   :  { %2736 = vmatpush.bf16.msrb.mxu2 %v6891_v27  ;;  %2714 = vmatpush.bf16.msrb.mxu0 %v7271_v45  ;;  %v7400_v27 = vld [vmem:[#allocation11 + $0x538] sm:$0xf0]  ;;  %v7955_v45 = vor.u32 %v9936_v29, %v7954_v28  ;;  %v7595_v54 = vor.u32 %v9839_v40, %v7592_v41  ;;  %v9908_v40 = vld [vmem:[#allocation14 + $0xc0] sm:$0xf0]  ;;  %v8402_v41 = vld [vmem:[#allocation14 + $0x508] sm:$0xf] }
 0x20b   :  { %v7403_v39 = vor.u32 %v9791_v26, %v7400_v27  ;;  %v9783_v47 = vld [vmem:[#allocation11 + $0x4dc] sm:$0xf]  ;;  %v8038_v26 = vld [vmem:[#allocation14 + $0x230] sm:$0xf]  ;;  %v9957_v27 = vld [vmem:[#allocation14 + $0x248] sm:$0xf0] }
 0x20c   :  { %2751 = vmatpush.bf16.msrb.mxu3 %v7083_v42  ;;  %2773 = vmatpush.bf16.msra.mxu1 %v7723_v43  ;;  %v8122_v42 = vld [vmem:[#allocation14 + $0x2d8] sm:$0xf]  ;;  %v10788_v43 = vpop.f32.mrf.mxu0  ;;  %v7368_v48 = vld [vmem:[#allocation11 + $0x4f8] sm:$0xf0] }
 0x20d   :  { %2715 = vmatmul.bf16.vlgmr.msrb.gmra.mxu0 %v10742_v23  ;;  %v7371_v56 = vor.u32 %v9783_v47, %v7368_v48  ;;  %v9775_v63 = vld [vmem:[#allocation11 + $0x49c] sm:$0xf] }
 0x20e   :  { %2737 = vmatpush.bf16.msrb.mxu2 %v6859_v46  ;;  %2759 = vmatpush.bf16.msra.mxu0 %v7499_v50  ;;  %v9978_v46 = vld [vmem:[#allocation14 + $0x2f0] sm:$0xf0]  ;;  %v2523_v50 = vpop.f32.mrf.mxu1 }
 0x20f   :  { %v8123_v55 = vor.u32 %v9978_v46, %v8122_v42  ;;  %v7336_v0 = vld [vmem:[#allocation11 + $0x4b8] sm:$0xf0]  ;;  %v2470_v42 = vadd.f32 %v10775_v6, %v2457_v22  ;;  %v10041_v6 = vld [vmem:[#allocation14 + $0x4e8] sm:$0xf0]  ;;  %v10076_v22 = vld [vmem:[#allocation14 + $0x600] sm:$0xf0] }
 0x210   :  { %2752 = vmatpush.bf16.msrb.mxu3 %v7051_v57  ;;  %2774 = vmatpush.bf16.msra.mxu1 %v7691_v60  ;;  %v9831_v57 = vld [vmem:[#allocation11 + $0x65c] sm:$0xf]  ;;  %v7927_v60 = vor.u32 %v9929_v53, %v7926_v51  ;;  %v7339_v9 = vor.u32 %v9775_v63, %v7336_v0  ;;  %v8570_v51 = vld [vmem:[#allocation14 + $0x658] sm:$0xf]  ;;  %v8403_v53 = vor.u32 %v10048_v34, %v8402_v41  ;;  %v7982_v63 = vld [vmem:[#allocation14 + $0x1c0] sm:$0xf] }
 0x211   :  { %v9922_v3 = vld [vmem:[#allocation14 + $0x130] sm:$0xf0]  ;;  %vm2786_vm6 = vcmp.ge.f32.partialorder %v2470_v42, 0.0 }
 0x212   :  { %2738 = vmatpush.bf16.msrb.mxu2 %v6827_v62  ;;  %2760 = vmatpush.bf16.msra.mxu0 %v7467_v5  ;;  %v9971_v62 = vld [vmem:[#allocation14 + $0x2b8] sm:$0xf0]  ;;  %v9823_v7 = vld [vmem:[#allocation11 + $0x61c] sm:$0xf] }
 0x213   :  { %v8095_v8 = vor.u32 %v9971_v62, %v8094_v58  ;;  %v7528_v11 = vld [vmem:[#allocation11 + $0x638] sm:$0xf0]  ;;  %v2794_v58 = vmul.f32 0.2, %v2470_v42 }
 0x214   :  { %2753 = vmatpush.bf16.msrb.mxu3 %v7019_v4  ;;  %2775 = vmatpush.bf16.msra.mxu1 %v7659_v15  ;;  %v2510_v4 = vpop.f32.mrf.mxu0  ;;  %v7899_v15 = vor.u32 %v9922_v3, %v7898_v2  ;;  %v9767_v52 = vld [vmem:[#allocation11 + $0x45c] sm:$0xf]  ;;  %v7531_v21 = vor.u32 %v9823_v7, %v7528_v11  ;;  %v9943_v2 = vld [vmem:[#allocation14 + $0x1d8] sm:$0xf0]  ;;  %v8542_v3 = vld [vmem:[#allocation14 + $0x620] sm:$0xf] }
 0x215   :  { %v9950_v50 = vld [vmem:[#allocation14 + $0x210] sm:$0xf0]  ;;  %v8346_v11 = vld [vmem:[#allocation14 + $0x498] sm:$0xf]  ;;  %v9074_v4 = vld [vmem:[#allocation14 + $0xa48] sm:$0xf] }
 0x216   :  { %2739 = vmatpush.bf16.msrb.mxu2 %v6795_v19  ;;  %2761 = vmatpush.bf16.msra.mxu0 %v7435_v20  ;;  %v7304_v19 = vld [vmem:[#allocation11 + $0x478] sm:$0xf0]  ;;  %v7870_v20 = vld [vmem:[#allocation14 + $0xe0] sm:$0xf]  ;;  %v8011_v62 = vor.u32 %v9950_v50, %v8010_v49  ;;  %v8486_v49 = vld [vmem:[#allocation14 + $0x5b0] sm:$0xf] }
 0x217   :  { %2754 = vmatmul.bf16.vlgmr.msrb.gmra.mxu3 %v10730_v17  ;;  %v7560_v17 = vld [vmem:[#allocation11 + $0x678] sm:$0xf0]  ;;  %v7307_v29 = vor.u32 %v9767_v52, %v7304_v19  ;;  %v7983_v52 = vor.u32 %v9943_v2, %v7982_v63  ;;  %v10069_v50 = vld [vmem:[#allocation14 + $0x5c8] sm:$0xf0] }
 0x218   :  { %5662 = vmatpush.bf16.msra.mxu3 %v8179_v16  ;;  %2776 = vmatpush.bf16.msra.mxu1 %v7627_v36  ;;  %v7563_v5 = vor.u32 %v9831_v57, %v7560_v17  ;;  %v8626_v16 = vld [vmem:[#allocation14 + $0x6c8] sm:$0xf]  ;;  %v8598_v36 = vld [vmem:[#allocation14 + $0x690] sm:$0xf]  ;;  %v10034_v13 = vld [vmem:[#allocation14 + $0x4b0] sm:$0xf0] }
 0x219   :  { %v8627_v25 = vor.u32 %v10104_v18, %v8626_v16  ;;  %v8599_v46 = vor.u32 %v10097_v30, %v8598_v36  ;;  %v8374_v17 = vld [vmem:[#allocation14 + $0x4d0] sm:$0xf]  ;;  %v2802_v16 = vsel %vm2786_vm6, %v2470_v42, %v2794_v58  ;;  %v1075_v18 = vperm.slane %v10762_v32, 2  ;;  %v10027_v36 = vld [vmem:[#allocation14 + $0x478] sm:$0xf0] }
 0x21a   :  { %2740 = vmatpush.bf16.msrb.mxu2 %v6763_v38  ;;  %2762 = vmatpush.bf16.msra.mxu0 %v7403_v39  ;;  %v10795_v28 = vpop.f32.mrf.mxu3  ;;  %v7272_v38 = vld [vmem:[#allocation11 + $0x438] sm:$0xf0]  ;;  %v7842_v39 = vld [vmem:[#allocation14 + $0xa8] sm:$0xf]  ;;  %v8375_v7 = vor.u32 %v10041_v6, %v8374_v17  ;;  %v10160_v30 = vld [vmem:[#allocation14 + $0x8a0] sm:$0xf0]  ;;  %v8487_v58 = vor.u32 %v10069_v50, %v8486_v49 }
 0x21b   :  { %v7843_v48 = vor.u32 %v9908_v40, %v7842_v39  ;;  %v9046_v39 = vld [vmem:[#allocation14 + $0xa10] sm:$0xf]  ;;  %v10209_v40 = vld [vmem:[#allocation14 + $0xa28] sm:$0xf0]  ;;  %v9018_v17 = vld [vmem:[#allocation14 + $0x9d8] sm:$0xf] }
 0x21c   :  { %5663 = vmatpush.bf16.msra.mxu3 %v8151_v37  ;;  %2777 = vmatpush.bf16.msra.mxu1 %v7595_v54  ;;  %v9759_v37 = vld [vmem:[#allocation11 + $0x41c] sm:$0xf]  ;;  %v8906_v50 = vld [vmem:[#allocation14 + $0x8f8] sm:$0xf] }
 0x21d   :  { %2741 = vmatmul.bf16.vlgmr.msrb.gmra.mxu2 %v10734_v31  ;;  %v9915_v31 = vld [vmem:[#allocation14 + $0xf8] sm:$0xf0]  ;;  %v7275_v47 = vor.u32 %v9759_v37, %v7272_v38  ;;  %v10090_v54 = vld [vmem:[#allocation14 + $0x670] sm:$0xf0]  ;;  %v10807_v37 = vpack.c.bf16 %v2802_v16, %v2802_v16  ;;  %v2483_v38 = vadd.f32 %v10782_v59, %v1075_v18  ;;  %v8290_v59 = vld [vmem:[#allocation14 + $0x428] sm:$0xf] }
 0x21e   :  { %5649 = vmatpush.bf16.msra.mxu2 %v7955_v45  ;;  %2763 = vmatpush.bf16.msra.mxu0 %v7371_v56  ;;  %v7871_v33 = vor.u32 %v9915_v31, %v7870_v20  ;;  %v8039_v45 = vor.u32 %v9957_v27, %v8038_v26  ;;  %v9901_v56 = vld [vmem:[#allocation14 + $0x88] sm:$0xf0]  ;;  %v8571_v0 = vor.u32 %v10090_v54, %v8570_v51  ;;  %v9887_v26 = vld [vmem:[#allocation14 + $0x18] sm:$0xf0]  ;;  %v8318_v27 = vld [vmem:[#allocation14 + $0x460] sm:$0xf] }
 0x21f   :  { %v10020_v54 = vld [vmem:[#allocation14 + $0x440] sm:$0xf0]  ;;  %v10202_v6 = vld [vmem:[#allocation14 + $0x9f0] sm:$0xf0]  ;;  %v8234_v18 = vld [vmem:[#allocation14 + $0x3b8] sm:$0xf] }
 0x220   :  { %5664 = vmatpush.bf16.msra.mxu3 %v8123_v55  ;;  %2778 = vmatpush.bf16.msra.mxu1 %v7563_v5  ;;  %v7814_v55 = vld [vmem:[#allocation14 + $0x70] sm:$0xf]  ;;  %v2534_v57 = vpop.f32.mrf.mxu2  ;;  %v10083_v5 = vld [vmem:[#allocation14 + $0x638] sm:$0xf0] }
 0x221   :  { %v8543_v20 = vor.u32 %v10083_v5, %v8542_v3  ;;  %v10013_v3 = vld [vmem:[#allocation14 + $0x408] sm:$0xf0]  ;;  %v10146_v5 = vld [vmem:[#allocation14 + $0x830] sm:$0xf0] }
 0x222   :  { %5650 = vmatpush.bf16.msra.mxu2 %v7927_v60  ;;  %2764 = vmatpush.bf16.msra.mxu0 %v7339_v9  ;;  %v1076_v60 = vperm.slane %v10762_v32, 3  ;;  %v2549_v1 = vpop.f32.mrf.mxu3  ;;  %v9894_v9 = vld [vmem:[#allocation14 + $0x50] sm:$0xf0] }
 0x223   :  { %v10062_v1 = vld [vmem:[#allocation14 + $0x590] sm:$0xf0] }
 0x224   :  { %5665 = vmatpush.bf16.msra.mxu3 %v8095_v8  ;;  %2779 = vmatpush.bf16.msra.mxu1 %v7531_v21  ;;  %v7786_v8 = vld [vmem:[#allocation14 + $0x38] sm:$0xf]  ;;  %v10800_v12 = vpop.f32.mrf.mxu1  ;;  %v2535_v19 = vadd.f32 %v2534_v57, %v1076_v60  ;;  %v8514_v21 = vld [vmem:[#allocation14 + $0x5e8] sm:$0xf]  ;;  %v2496_v57 = vadd.f32 %v10779_v35, %v2483_v38 }
 0x225   :  { %v7787_v31 = vor.u32 %v9894_v9, %v7786_v8  ;;  %v8515_v41 = vor.u32 %v10076_v22, %v8514_v21  ;;  %v8794_v35 = vld [vmem:[#allocation14 + $0x818] sm:$0xf]  ;;  %v8990_v8 = vld [vmem:[#allocation14 + $0x9a0] sm:$0xf]  ;;  %v10195_v9 = vld [vmem:[#allocation14 + $0x9b8] sm:$0xf0] }
 0x226   :  { %5651 = vmatpush.bf16.msra.mxu2 %v7899_v15  ;;  %2765 = vmatpush.bf16.msra.mxu0 %v7307_v29  ;;  %v10216_v15 = vld [vmem:[#allocation14 + $0xa60] sm:$0xf0]  ;;  %v2548_v34 = vadd.f32 %v10795_v28, %v2535_v19  ;;  %v10153_v28 = vld [vmem:[#allocation14 + $0x868] sm:$0xf0]  ;;  %v2509_v60 = vadd.f32 %v10788_v43, %v2496_v57  ;;  %v8795_v16 = vor.u32 %v10146_v5, %v8794_v35  ;;  %v8766_v19 = vld [vmem:[#allocation14 + $0x7e0] sm:$0xf] }
 0x227   :  { %2780 = vmatmul.bf16.vlgmr.msra.gmra.mxu1 %v10738_v61  ;;  %v7815_v61 = vor.u32 %v9901_v56, %v7814_v55  ;;  %v9075_v29 = vor.u32 %v10216_v15, %v9074_v4  ;;  %v8822_v55 = vld [vmem:[#allocation14 + $0x850] sm:$0xf]  ;;  %v9047_v56 = vor.u32 %v10209_v40, %v9046_v39  ;;  %v8962_v21 = vld [vmem:[#allocation14 + $0x968] sm:$0xf]  ;;  %v10188_v22 = vld [vmem:[#allocation14 + $0x980] sm:$0xf0] }
 0x228   :  { %5666 = vmatpush.bf16.msra.mxu3 %v8067_v24  ;;  %5688 = vmatpush.bf16.msrb.mxu1 %v8627_v25  ;;  %v8347_v24 = vor.u32 %v10034_v13, %v8346_v11  ;;  %v7758_v25 = vld [vmem:[#allocation14] sm:$0xf]  ;;  %v8823_v63 = vor.u32 %v10153_v28, %v8822_v55  ;;  %v2522_v4 = vadd.f32 %v10785_v14, %v2509_v60  ;;  %v8934_v39 = vld [vmem:[#allocation14 + $0x930] sm:$0xf]  ;;  %v10181_v40 = vld [vmem:[#allocation14 + $0x948] sm:$0xf0] }
 0x229   :  { %v8430_v13 = vld [vmem:[#allocation14 + $0x540] sm:$0xf]  ;;  %v8963_v38 = vor.u32 %v10188_v22, %v8962_v21  ;;  %v8935_v49 = vor.u32 %v10181_v40, %v8934_v39  ;;  %v9270_v55 = vld [vmem:[#allocation14 + $0xbd0] sm:$0xf]  ;;  %v10265_v28 = vld [vmem:[#allocation14 + $0xbe8] sm:$0xf0] }
 0x22a   :  { %5652 = vmatpush.bf16.msra.mxu2 %v7871_v33  ;;  %2766 = vmatpush.bf16.msra.mxu0 %v7275_v47  ;;  %v2536_v33 = vpop.f32.mrf.mxu2  ;;  %v2560_v42 = vpop.f32.mrf.mxu0  ;;  %v8319_v47 = vor.u32 %v10027_v36, %v8318_v27  ;;  %vm2787_vm9 = vcmp.ge.f32.partialorder %v2522_v4, 0.0  ;;  %v10118_v60 = vld [vmem:[#allocation14 + $0x750] sm:$0xf0]  ;;  %v9989_v35 = vld [vmem:[#allocation14 + $0x34c] sm:$0xf] }
 0x22b   :  { %v2561_v51 = vadd.f32 %v2560_v42, %v2548_v34  ;;  %v9999_v33 = vld [vmem:[#allocation14 + $0x398] sm:$0xf0]  ;;  %v10272_v34 = vld [vmem:[#allocation14 + $0xc20] sm:$0xf0]  ;;  %v8180_v5 = vld [vmem:[#allocation14 + $0x364] sm:$0xf0] }
 0x22c   :  { %5667 = vmatpush.bf16.msra.mxu3 %v8039_v45  ;;  %5689 = vmatpush.bf16.msrb.mxu1 %v8599_v46  ;;  %v7759_v45 = vor.u32 %v9887_v26, %v7758_v25  ;;  %v2801_v46 = vsel %vm2785_vm7, %v10769_v44, %v2793_v10  ;;  %v2795_v25 = vmul.f32 0.2, %v2522_v4  ;;  %v9926_v22 = vld [vmem:[#allocation14 + $0x154] sm:$0xf]  ;;  %v9919_v39 = vld [vmem:[#allocation14 + $0x11c] sm:$0xf] }
 0x22d   :  { %2767 = vmatmul.bf16.vlgmr.msra.gmra.mxu0 %v10742_v23  ;;  %v8850_v23 = vld [vmem:[#allocation14 + $0x888] sm:$0xf]  ;;  %v10816_v44 = vpack.c.bf16 %v2801_v46, %v2801_v46  ;;  %v2574_v2 = vadd.f32 %v10800_v12, %v2561_v51  ;;  %v10055_v12 = vld [vmem:[#allocation14 + $0x558] sm:$0xf0]  ;;  %v7900_v40 = vld [vmem:[#allocation14 + $0x134] sm:$0xf0] }
 0x22e   :  { %5653 = vmatpush.bf16.msra.mxu2 %v7843_v48  ;;  %5675 = vmatpush.bf16.msrb.mxu0 %v8403_v53  ;;  %v8851_v48 = vor.u32 %v10160_v30, %v8850_v23  ;;  %v2575_v53 = vpop.f32.mrf.mxu1  ;;  %v8738_v23 = vld [vmem:[#allocation14 + $0x7a8] sm:$0xf]  ;;  %v10132_v30 = vld [vmem:[#allocation14 + $0x7c0] sm:$0xf0]  ;;  %v2803_v51 = vsel %vm2787_vm9, %v2522_v4, %v2795_v25 }
 0x22f   :  { %v2796_v10 = vmul.f32 0.2, %v2574_v2  ;;  %vm2788_vm8 = vcmp.ge.f32.partialorder %v2574_v2, 0.0  ;;  %v8739_v46 = vor.u32 %v10132_v30, %v8738_v23  ;;  %v9975_v23 = vld [vmem:[#allocation14 + $0x2dc] sm:$0xf] }
 0x230   :  { %5668 = vmatpush.bf16.msra.mxu3 %v8011_v62  ;;  %5690 = vmatpush.bf16.msrb.mxu1 %v8571_v0  ;;  %v8291_v62 = vor.u32 %v10020_v54, %v8290_v59  ;;  %v8458_v0 = vld [vmem:[#allocation14 + $0x578] sm:$0xf]  ;;  %v10174_v54 = vld [vmem:[#allocation14 + $0x910] sm:$0xf0] }
 0x231   :  { %v8459_v43 = vor.u32 %v10062_v1, %v8458_v0  ;;  %v2804_v36 = vsel %vm2788_vm8, %v2574_v2, %v2796_v10  ;;  %v9271_v0 = vor.u32 %v10265_v28, %v9270_v55  ;;  %v10167_v1 = vld [vmem:[#allocation14 + $0x8d8] sm:$0xf0]  ;;  %v10258_v2 = vld [vmem:[#allocation14 + $0xbb0] sm:$0xf0]  ;;  %v8152_v10 = vld [vmem:[#allocation14 + $0x32c] sm:$0xf0] }
 0x232   :  { %5654 = vmatpush.bf16.msra.mxu2 %v7815_v61  ;;  %5676 = vmatpush.bf16.msrb.mxu0 %v8375_v7  ;;  %v8262_v61 = vld [vmem:[#allocation14 + $0x3f0] sm:$0xf]  ;;  %v9019_v7 = vor.u32 %v10202_v6, %v9018_v17  ;;  %v2562_v11 = vpop.f32.mrf.mxu0  ;;  %v10824_v42 = vpack.c.bf16 %v2804_v36, %v2804_v36  ;;  %v10828_v6 = vpack.c.bf16 %v2803_v51, %v2803_v51  ;;  %v8124_v30 = vld [vmem:[#allocation14 + $0x2f4] sm:$0xf0]  ;;  %v9522_v28 = vld [vmem:[#allocation14 + $0xdc8] sm:$0xf] }
 0x233   :  { %v8263_v15 = vor.u32 %v10013_v3, %v8262_v61  ;;  %v9242_v61 = vld [vmem:[#allocation14 + $0xb98] sm:$0xf] }
 0x234   :  { %5669 = vmatpush.bf16.msra.mxu3 %v7983_v52  ;;  %5691 = vmatpush.bf16.msrb.mxu1 %v8543_v20  ;;  %v10006_v52 = vld [vmem:[#allocation14 + $0x3d0] sm:$0xf0]  ;;  %v10139_v20 = vld [vmem:[#allocation14 + $0x7f8] sm:$0xf0] }
 0x235   :  { %v8235_v26 = vor.u32 %v10006_v52, %v8234_v18  ;;  %v8767_v27 = vor.u32 %v10139_v20, %v8766_v19  ;;  %v10251_v18 = vld [vmem:[#allocation14 + $0xb78] sm:$0xf0]  ;;  %v9982_v52 = vld [vmem:[#allocation14 + $0x314] sm:$0xf] }
 0x236   :  { %5655 = vmatpush.bf16.msra.mxu2 %v7787_v31  ;;  %5677 = vmatpush.bf16.msrb.mxu0 %v8347_v24  ;;  %v8991_v31 = vor.u32 %v10195_v9, %v8990_v8  ;;  %v8431_v24 = vor.u32 %v10055_v12, %v8430_v13  ;;  %v8654_v8 = vld [vmem:[#allocation14 + $0x700] sm:$0xf]  ;;  %v10111_v9 = vld [vmem:[#allocation14 + $0x718] sm:$0xf0]  ;;  %v9243_v13 = vor.u32 %v10258_v2, %v9242_v61  ;;  %v9494_v61 = vld [vmem:[#allocation14 + $0xd90] sm:$0xf] }
 0x237   :  { %5670 = vmatmul.bf16.vlgmr.msra.gmra.mxu3 %v10807_v37  ;;  %v9214_v12 = vld [vmem:[#allocation14 + $0xb60] sm:$0xf]  ;;  %v8655_v20 = vor.u32 %v10111_v9, %v8654_v8  ;;  %v10321_v2 = vld [vmem:[#allocation14 + $0xda8] sm:$0xf0] }
 0x238   :  { %5714 = vmatpush.bf16.msrb.mxu3 %v9075_v29  ;;  %5692 = vmatpush.bf16.msrb.mxu1 %v8515_v41  ;;  %v8206_v29 = vld [vmem:[#allocation14 + $0x380] sm:$0xf]  ;;  %v9298_v41 = vld [vmem:[#allocation14 + $0xc08] sm:$0xf]  ;;  %v9495_v8 = vor.u32 %v10321_v2, %v9494_v61  ;;  %v9382_v2 = vld [vmem:[#allocation14 + $0xcb0] sm:$0xf] }
 0x239   :  { %v9299_v59 = vor.u32 %v10272_v34, %v9298_v41  ;;  %v9158_v34 = vld [vmem:[#allocation14 + $0xaf0] sm:$0xf] }
 0x23a   :  { %5656 = vmatpush.bf16.msra.mxu2 %v7759_v45  ;;  %5678 = vmatpush.bf16.msrb.mxu0 %v8319_v47  ;;  %v10822_v14 = vpop.f32.mrf.mxu3  ;;  %v8207_v45 = vor.u32 %v9999_v33, %v8206_v29  ;;  %v8710_v47 = vld [vmem:[#allocation14 + $0x770] sm:$0xf]  ;;  %v9186_v29 = vld [vmem:[#allocation14 + $0xb28] sm:$0xf]  ;;  %v10244_v33 = vld [vmem:[#allocation14 + $0xb40] sm:$0xf0] }
 0x23b   :  { %v9187_v41 = vor.u32 %v10244_v33, %v9186_v29  ;;  %v9438_v29 = vld [vmem:[#allocation14 + $0xd20] sm:$0xf]  ;;  %v10307_v33 = vld [vmem:[#allocation14 + $0xd38] sm:$0xf0] }
 0x23c   :  { %5715 = vmatpush.bf16.msrb.mxu3 %v9047_v56  ;;  %5693 = vmatpush.bf16.msrb.mxu1 %v8487_v58  ;;  %v1077_v56 = vperm.slane %v10762_v32, 4  ;;  %v8682_v58 = vld [vmem:[#allocation14 + $0x738] sm:$0xf] }
 0x23d   :  { %5657 = vmatmul.bf16.vlgmr.msra.gmra.mxu2 %v10816_v44 }
 0x23e   :  { %5701 = vmatpush.bf16.msrb.mxu2 %v8851_v48  ;;  %5679 = vmatpush.bf16.msrb.mxu0 %v8291_v62  ;;  %v10125_v48 = vld [vmem:[#allocation14 + $0x788] sm:$0xf0]  ;;  %v8907_v62 = vor.u32 %v10174_v54, %v8906_v50  ;;  %v9912_v54 = vld [vmem:[#allocation14 + $0xe4] sm:$0xf] }
 0x23f   :  { %v8711_v17 = vor.u32 %v10125_v48, %v8710_v47  ;;  %v10237_v47 = vld [vmem:[#allocation14 + $0xb08] sm:$0xf0]  ;;  %v9968_v48 = vld [vmem:[#allocation14 + $0x2a4] sm:$0xf] }
 0x240   :  { %5716 = vmatpush.bf16.msrb.mxu3 %v9019_v7  ;;  %5694 = vmatpush.bf16.msrb.mxu1 %v8459_v43  ;;  %v2586_v53 = vpop.f32.mrf.mxu2  ;;  %v8683_v7 = vor.u32 %v10118_v60, %v8682_v58  ;;  %v9933_v43 = vld [vmem:[#allocation14 + $0x18c] sm:$0xf]  ;;  %v9159_v55 = vor.u32 %v10237_v47, %v9158_v34  ;;  %v9130_v58 = vld [vmem:[#allocation14 + $0xab8] sm:$0xf]  ;;  %v10230_v60 = vld [vmem:[#allocation14 + $0xad0] sm:$0xf0] }
 0x241   :  { %v2587_v32 = vadd.f32 %v2586_v53, %v1077_v56  ;;  %v7903_v53 = vor.u32 %v9919_v39, %v7900_v40  ;;  %v10328_v56 = vld [vmem:[#allocation14 + $0xde0] sm:$0xf0]  ;;  %v9439_v39 = vor.u32 %v10307_v33, %v9438_v29  ;;  %v10031_v47 = vld [vmem:[#allocation14 + $0x49c] sm:$0xf] }
 0x242   :  { %5702 = vmatpush.bf16.msrb.mxu2 %v8823_v63  ;;  %5680 = vmatpush.bf16.msrb.mxu0 %v8263_v15  ;;  %v2601_v57 = vpop.f32.mrf.mxu3  ;;  %v8878_v63 = vld [vmem:[#allocation14 + $0x8c0] sm:$0xf]  ;;  %v7956_v15 = vld [vmem:[#allocation14 + $0x1a4] sm:$0xf0]  ;;  %v9940_v34 = vld [vmem:[#allocation14 + $0x1c4] sm:$0xf] }
 0x243   :  { %v8879_v11 = vor.u32 %v10167_v1, %v8878_v63  ;;  %v2600_v19 = vadd.f32 %v10822_v14, %v2587_v32  ;;  %v7959_v21 = vor.u32 %v9933_v43, %v7956_v15  ;;  %v7872_v57 = vld [vmem:[#allocation14 + $0xfc] sm:$0xf0]  ;;  %v9961_v63 = vld [vmem:[#allocation14 + $0x26c] sm:$0xf]  ;;  %v8040_v32 = vld [vmem:[#allocation14 + $0x24c] sm:$0xf0] }
 0x244   :  { %5717 = vmatpush.bf16.msrb.mxu3 %v8991_v31  ;;  %5695 = vmatpush.bf16.msrb.mxu1 %v8431_v24  ;;  %v2625_v3 = vpop.f32.mrf.mxu1  ;;  %v9215_v24 = vor.u32 %v10251_v18, %v9214_v12  ;;  %v9905_v1 = vld [vmem:[#allocation14 + $0xac] sm:$0xf]  ;;  %v10314_v12 = vld [vmem:[#allocation14 + $0xd70] sm:$0xf0]  ;;  %v10279_v29 = vld [vmem:[#allocation14 + $0xc58] sm:$0xf0] }
 0x245   :  { %v10045_v15 = vld [vmem:[#allocation14 + $0x50c] sm:$0xf] }
 0x246   :  { %5703 = vmatpush.bf16.msrb.mxu2 %v8795_v16  ;;  %5681 = vmatpush.bf16.msrb.mxu0 %v8235_v26  ;;  %v8183_v16 = vor.u32 %v9989_v35, %v8180_v5  ;;  %v7928_v26 = vld [vmem:[#allocation14 + $0x16c] sm:$0xf0]  ;;  %v7844_v35 = vld [vmem:[#allocation14 + $0xc4] sm:$0xf0]  ;;  %v9954_v5 = vld [vmem:[#allocation14 + $0x234] sm:$0xf] }
 0x247   :  { %5696 = vmatmul.bf16.vlgmr.msrb.gmra.mxu1 %v10824_v42  ;;  %v7931_v14 = vor.u32 %v9926_v22, %v7928_v26  ;;  %v8376_v26 = vld [vmem:[#allocation14 + $0x4ec] sm:$0xf0] }
 0x248   :  { %5718 = vmatpush.bf16.msrb.mxu3 %v8963_v38  ;;  %v2588_v4 = vpop.f32.mrf.mxu2 }
 0x249   :  { %v9466_v4 = vld [vmem:[#allocation14 + $0xd58] sm:$0xf] }
 0x24a   :  { %5704 = vmatpush.bf16.msrb.mxu2 %v8767_v27  ;;  %5682 = vmatpush.bf16.msrb.mxu0 %v8207_v45  ;;  %v2612_v31 = vpop.f32.mrf.mxu0  ;;  %v8155_v27 = vor.u32 %v9982_v52, %v8152_v10  ;;  %v9467_v18 = vor.u32 %v10314_v12, %v9466_v4  ;;  %v7847_v52 = vor.u32 %v9905_v1, %v7844_v35  ;;  %v9354_v12 = vld [vmem:[#allocation14 + $0xc78] sm:$0xf] }
 0x24b   :  { %v2613_v25 = vadd.f32 %v2612_v31, %v2600_v19  ;;  %v9898_v19 = vld [vmem:[#allocation14 + $0x74] sm:$0xf]  ;;  %v8043_v31 = vor.u32 %v9954_v5, %v8040_v32  ;;  %v8824_v32 = vld [vmem:[#allocation14 + $0x86c] sm:$0xf0] }
 0x24c   :  { %5719 = vmatpush.bf16.msrb.mxu3 %v8935_v49  ;;  %v2627_v36 = vpop.f32.mrf.mxu1  ;;  %v8096_v49 = vld [vmem:[#allocation14 + $0x2bc] sm:$0xf0]  ;;  %v10150_v5 = vld [vmem:[#allocation14 + $0x854] sm:$0xf] }
 0x24d   :  { %5683 = vmatmul.bf16.vlgmr.msrb.gmra.mxu0 %v10828_v6  ;;  %v2626_v38 = vadd.f32 %v2625_v3, %v2613_v25  ;;  %v7875_v3 = vor.u32 %v9912_v54, %v7872_v57  ;;  %v10038_v25 = vld [vmem:[#allocation14 + $0x4d4] sm:$0xf]  ;;  %v10837_v36 = vld [vmem:[#allocation13] sm:$0xff]  ;;  %v10157_v57 = vld [vmem:[#allocation14 + $0x88c] sm:$0xf] }
 0x24e   :  { %5705 = vmatpush.bf16.msrb.mxu2 %v8739_v46  ;;  %5727 = vmatpush.bf16.msra.mxu0 %v9299_v59  ;;  %v8127_v46 = vor.u32 %v9975_v23, %v8124_v30  ;;  %v1078_v23 = vperm.slane %v10837_v36, 5 }
 0x24f   :  { %vm2789_vm10 = vcmp.ge.f32.partialorder %v2626_v38, 0.0  ;;  %v2797_v45 = vmul.f32 0.2, %v2626_v38 }
 0x250   :  { %5720 = vmatpush.bf16.msrb.mxu3 %v8907_v62  ;;  %v9523_v62 = vor.u32 %v10328_v56, %v9522_v28  ;;  %v7760_v56 = vld [vmem:[#allocation14 + $0x1c] sm:$0xf0] }
 0x251   :  { %v2805_v50 = vsel %vm2789_vm10, %v2626_v38, %v2797_v45  ;;  %v9891_v38 = vld [vmem:[#allocation14 + $0x3c] sm:$0xf]  ;;  %v7984_v45 = vld [vmem:[#allocation14 + $0x1dc] sm:$0xf0] }
 0x252   :  { %5706 = vmatpush.bf16.msrb.mxu2 %v8711_v17  ;;  %5728 = vmatpush.bf16.msra.mxu0 %v9271_v0  ;;  %v10832_v59 = vpack.c.bf16 %v2805_v50, %v2805_v50  ;;  %v2614_v51 = vpop.f32.mrf.mxu0  ;;  %v8099_v17 = vor.u32 %v9968_v48, %v8096_v49  ;;  %v8068_v0 = vld [vmem:[#allocation14 + $0x284] sm:$0xf0]  ;;  %v8348_v48 = vld [vmem:[#allocation14 + $0x4b4] sm:$0xf0]  ;;  %v10300_v50 = vld [vmem:[#allocation14 + $0xd00] sm:$0xf0] }
 0x253   :  { %5740 = vmatpush.bf16.msra.mxu1 %v9523_v62  ;;  %v8071_v43 = vor.u32 %v9961_v63, %v8068_v0  ;;  %v9410_v49 = vld [vmem:[#allocation14 + $0xce8] sm:$0xf]  ;;  %v10024_v62 = vld [vmem:[#allocation14 + $0x464] sm:$0xf]  ;;  %v8320_v63 = vld [vmem:[#allocation14 + $0x47c] sm:$0xf0] }
 0x254   :  { %5721 = vmatpush.bf16.msrb.mxu3 %v8879_v11  ;;  %v9102_v11 = vld [vmem:[#allocation14 + $0xa80] sm:$0xf]  ;;  %v9411_v51 = vor.u32 %v10300_v50, %v9410_v49  ;;  %v8236_v49 = vld [vmem:[#allocation14 + $0x3d4] sm:$0xf0] }
 0x256   :  { %5707 = vmatpush.bf16.msrb.mxu2 %v8683_v7  ;;  %5729 = vmatpush.bf16.msra.mxu0 %v9243_v13  ;;  %v9131_v7 = vor.u32 %v10230_v60, %v9130_v58  ;;  %v10223_v13 = vld [vmem:[#allocation14 + $0xa98] sm:$0xf0]  ;;  %v7987_v58 = vor.u32 %v9940_v34, %v7984_v45  ;;  %v8351_v60 = vor.u32 %v10031_v47, %v8348_v48  ;;  %v9048_v34 = vld [vmem:[#allocation14 + $0xa2c] sm:$0xf0]  ;;  %v8628_v47 = vld [vmem:[#allocation14 + $0x6e4] sm:$0xf0] }
 0x257   :  { %5741 = vmatpush.bf16.msra.mxu1 %v9495_v8  ;;  %v9103_v10 = vor.u32 %v10223_v13, %v9102_v11  ;;  %v10017_v11 = vld [vmem:[#allocation14 + $0x42c] sm:$0xf]  ;;  %v8292_v13 = vld [vmem:[#allocation14 + $0x444] sm:$0xf0]  ;;  %v10003_v48 = vld [vmem:[#allocation14 + $0x3bc] sm:$0xf] }
 0x258   :  { %5766 = vmatpush.bf16.msra.mxu3 %v8183_v16  ;;  %v8404_v16 = vld [vmem:[#allocation14 + $0x524] sm:$0xf0] }
 0x259   :  { %v8407_v22 = vor.u32 %v10045_v15, %v8404_v16  ;;  %v8827_v16 = vor.u32 %v10150_v5, %v8824_v32  ;;  %v8712_v5 = vld [vmem:[#allocation14 + $0x78c] sm:$0xf0]  ;;  %v10192_v32 = vld [vmem:[#allocation14 + $0x9a4] sm:$0xf] }
 0x25a   :  { %5708 = vmatpush.bf16.msrb.mxu2 %v8655_v20  ;;  %5730 = vmatpush.bf16.msra.mxu0 %v9215_v24  ;;  %v10835_v9 = vpop.f32.mrf.mxu3  ;;  %v7816_v20 = vld [vmem:[#allocation14 + $0x8c] sm:$0xf0]  ;;  %v8012_v24 = vld [vmem:[#allocation14 + $0x214] sm:$0xf0] }
 0x25b   :  { %5742 = vmatpush.bf16.msra.mxu1 %v9467_v18  ;;  %v7819_v30 = vor.u32 %v9898_v19, %v7816_v20  ;;  %v10286_v18 = vld [vmem:[#allocation14 + $0xc90] sm:$0xf0]  ;;  %v8295_v19 = vor.u32 %v10017_v11, %v8292_v13 }
 0x25c   :  { %5767 = vmatpush.bf16.msra.mxu3 %v8155_v27  ;;  %v9355_v20 = vor.u32 %v10286_v18, %v9354_v12  ;;  %v8544_v12 = vld [vmem:[#allocation14 + $0x63c] sm:$0xf0]  ;;  %v8684_v18 = vld [vmem:[#allocation14 + $0x754] sm:$0xf0] }
 0x25d   :  { %5709 = vmatmul.bf16.vlgmr.msrb.gmra.mxu2 %v10832_v59 }
 0x25e   :  { %5753 = vmatpush.bf16.msra.mxu2 %v7959_v21  ;;  %5731 = vmatpush.bf16.msra.mxu0 %v9187_v41  ;;  %v9947_v21 = vld [vmem:[#allocation14 + $0x1fc] sm:$0xf] }
 0x25f   :  { %v8015_v41 = vor.u32 %v9947_v21, %v8012_v24  ;;  %5743 = vmatpush.bf16.msra.mxu1 %v9439_v39  ;;  %v9076_v21 = vld [vmem:[#allocation14 + $0xa64] sm:$0xf0] }
 0x260   :  { %5768 = vmatpush.bf16.msra.mxu3 %v8127_v46  ;;  %v2638_v27 = vpop.f32.mrf.mxu2  ;;  %v8379_v46 = vor.u32 %v10038_v25, %v8376_v26  ;;  %v8264_v25 = vld [vmem:[#allocation14 + $0x40c] sm:$0xf0] }
 0x261   :  { %v2639_v28 = vadd.f32 %v2638_v27, %v1078_v23  ;;  %v9326_v27 = vld [vmem:[#allocation14 + $0xc40] sm:$0xf] }
 0x262   :  { %5754 = vmatpush.bf16.msra.mxu2 %v7931_v14  ;;  %5732 = vmatpush.bf16.msra.mxu0 %v9159_v55  ;;  %v7788_v14 = vld [vmem:[#allocation14 + $0x54] sm:$0xf0]  ;;  %v2653_v40 = vpop.f32.mrf.mxu3  ;;  %v9884_v55 = vld [vmem:[#allocation14 + $0x4] sm:$0xf]  ;;  %v9327_v39 = vor.u32 %v10279_v29, %v9326_v27  ;;  %v8656_v27 = vld [vmem:[#allocation14 + $0x71c] sm:$0xf0] }
 0x263   :  { %v7791_v54 = vor.u32 %v9891_v38, %v7788_v14  ;;  %5744 = vmatpush.bf16.msra.mxu1 %v9411_v51  ;;  %v7763_v1 = vor.u32 %v9884_v55, %v7760_v56  ;;  %v2652_v35 = vadd.f32 %v10835_v9, %v2639_v28  ;;  %v8796_v9 = vld [vmem:[#allocation14 + $0x834] sm:$0xf0]  ;;  %v8768_v38 = vld [vmem:[#allocation14 + $0x7fc] sm:$0xf0]  ;;  %v10206_v14 = vld [vmem:[#allocation14 + $0xa14] sm:$0xf] }
 0x264   :  { %5769 = vmatpush.bf16.msra.mxu3 %v8099_v17  ;;  %v8852_v17 = vld [vmem:[#allocation14 + $0x8a4] sm:$0xf0]  ;;  %v10094_v55 = vld [vmem:[#allocation14 + $0x694] sm:$0xf]  ;;  %v8600_v28 = vld [vmem:[#allocation14 + $0x6ac] sm:$0xf0] }
 0x265   :  { %v8855_v61 = vor.u32 %v10157_v57, %v8852_v17  ;;  %v8740_v56 = vld [vmem:[#allocation14 + $0x7c4] sm:$0xf0]  ;;  %v10199_v57 = vld [vmem:[#allocation14 + $0x9dc] sm:$0xf]  ;;  %v9020_v17 = vld [vmem:[#allocation14 + $0x9f4] sm:$0xf0] }
 0x266   :  { %5755 = vmatpush.bf16.msra.mxu2 %v7903_v53  ;;  %5733 = vmatpush.bf16.msra.mxu0 %v9131_v7  ;;  %v2677_v53 = vpop.f32.mrf.mxu1  ;;  %v8323_v7 = vor.u32 %v10024_v62, %v8320_v63  ;;  %v9996_v63 = vld [vmem:[#allocation14 + $0x384] sm:$0xf]  ;;  %v10178_v29 = vld [vmem:[#allocation14 + $0x934] sm:$0xf] }
 0x268   :  { %5770 = vmatpush.bf16.msra.mxu3 %v8071_v43  ;;  %v2640_v0 = vpop.f32.mrf.mxu2 }
 0x269   :  { %v8208_v0 = vld [vmem:[#allocation14 + $0x39c] sm:$0xf0] }
 0x26a   :  { %5756 = vmatpush.bf16.msra.mxu2 %v7875_v3  ;;  %5734 = vmatpush.bf16.msra.mxu0 %v9103_v10  ;;  %v10293_v3 = vld [vmem:[#allocation14 + $0xcc8] sm:$0xf0]  ;;  %v2664_v43 = vpop.f32.mrf.mxu0  ;;  %v10143_v10 = vld [vmem:[#allocation14 + $0x81c] sm:$0xf] }
 0x26b   :  { %v9383_v8 = vor.u32 %v10293_v3, %v9382_v2  ;;  %v2665_v4 = vadd.f32 %v2664_v43, %v2652_v35  ;;  %v8799_v26 = vor.u32 %v10143_v10, %v8796_v9  ;;  %v9023_v3 = vor.u32 %v10199_v57, %v9020_v17  ;;  %v10122_v35 = vld [vmem:[#allocation14 + $0x774] sm:$0xf]  ;;  %v8964_v10 = vld [vmem:[#allocation14 + $0x984] sm:$0xf0]  ;;  %v10059_v57 = vld [vmem:[#allocation14 + $0x57c] sm:$0xf] }
 0x26c   :  { %5771 = vmatpush.bf16.msra.mxu3 %v8043_v31  ;;  %v10213_v31 = vld [vmem:[#allocation14 + $0xa4c] sm:$0xf]  ;;  %v8715_v13 = vor.u32 %v10122_v35, %v8712_v5  ;;  %v8460_v17 = vld [vmem:[#allocation14 + $0x594] sm:$0xf0]  ;;  %v9300_v35 = vld [vmem:[#allocation14 + $0xc24] sm:$0xf0] }
 0x26d   :  { %5745 = vmatpush.bf16.msra.mxu1 %v9383_v8  ;;  %v9079_v23 = vor.u32 %v10213_v31, %v9076_v21  ;;  %v8211_v8 = vor.u32 %v9996_v63, %v8208_v0  ;;  %v10164_v63 = vld [vmem:[#allocation14 + $0x8c4] sm:$0xf]  ;;  %v8880_v0 = vld [vmem:[#allocation14 + $0x8dc] sm:$0xf0]  ;;  %v8186_v5 = vld [vmem:[#allocation14 + $0x350] sm:$0xf] }
 0x26e   :  { %5757 = vmatpush.bf16.msra.mxu2 %v7847_v52  ;;  %5779 = vmatpush.bf16.msrb.mxu0 %v8407_v22  ;;  %v2679_v15 = vpop.f32.mrf.mxu1  ;;  %v2678_v52 = vadd.f32 %v2677_v53, %v2665_v4  ;;  %v10010_v22 = vld [vmem:[#allocation14 + $0x3f4] sm:$0xf]  ;;  %v9051_v53 = vor.u32 %v10206_v14, %v9048_v34  ;;  %v9937_v14 = vld [vmem:[#allocation14 + $0x1a8] sm:$0xf0] }
 0x26f   :  { %v8267_v45 = vor.u32 %v10010_v22, %v8264_v25  ;;  %v10115_v15 = vld [vmem:[#allocation14 + $0x73c] sm:$0xf]  ;;  %v10108_v22 = vld [vmem:[#allocation14 + $0x704] sm:$0xf]  ;;  %v8516_v25 = vld [vmem:[#allocation14 + $0x604] sm:$0xf0] }
 0x270   :  { %5772 = vmatpush.bf16.msra.mxu3 %v8015_v41  ;;  %vm2790_vm11 = vcmp.ge.f32.partialorder %v2678_v52, 0.0  ;;  %v2798_v24 = vmul.f32 0.2, %v2678_v52  ;;  %v8687_v31 = vor.u32 %v10115_v15, %v8684_v18  ;;  %v7878_v18 = vld [vmem:[#allocation14 + $0xe8] sm:$0xf] }
 0x271   :  { %5746 = vmatpush.bf16.msra.mxu1 %v9355_v20 }
 0x272   :  { %5758 = vmatpush.bf16.msra.mxu2 %v7819_v30  ;;  %5780 = vmatpush.bf16.msrb.mxu0 %v8379_v46  ;;  %v2806_v33 = vsel %vm2790_vm11, %v2678_v52, %v2798_v24  ;;  %v10136_v30 = vld [vmem:[#allocation14 + $0x7e4] sm:$0xf]  ;;  %v2666_v41 = vpop.f32.mrf.mxu0  ;;  %v10101_v46 = vld [vmem:[#allocation14 + $0x6cc] sm:$0xf] }
 0x273   :  { %v10842_v40 = vpack.c.bf16 %v2806_v33, %v2806_v33  ;;  %v8631_v50 = vor.u32 %v10101_v46, %v8628_v47  ;;  %v8771_v51 = vor.u32 %v10136_v30, %v8768_v38  ;;  %v10185_v52 = vld [vmem:[#allocation14 + $0x96c] sm:$0xf]  ;;  %v8936_v33 = vld [vmem:[#allocation14 + $0x94c] sm:$0xf0]  ;;  %v8659_v41 = vor.u32 %v10108_v22, %v8656_v27 }
 0x274   :  { %5773 = vmatpush.bf16.msra.mxu3 %v7987_v58  ;;  %v8239_v58 = vor.u32 %v10003_v48, %v8236_v49  ;;  %v8967_v21 = vor.u32 %v10185_v52, %v8964_v10  ;;  %v10073_v24 = vld [vmem:[#allocation14 + $0x5ec] sm:$0xf]  ;;  %v7962_v38 = vld [vmem:[#allocation14 + $0x190] sm:$0xf]  ;;  %v8939_v34 = vor.u32 %v10178_v29, %v8936_v33  ;;  %v10171_v48 = vld [vmem:[#allocation14 + $0x8fc] sm:$0xf] }
 0x275   :  { %5747 = vmatpush.bf16.msra.mxu1 %v9327_v39  ;;  %5722 = vmatmul.bf16.vlgmr.msrb.gmra.mxu3 %v10842_v40  ;;  %v8488_v46 = vld [vmem:[#allocation14 + $0x5cc] sm:$0xf0]  ;;  %v7963_v47 = vor.u32 %v9937_v14, %v7962_v38  ;;  %v8908_v49 = vld [vmem:[#allocation14 + $0x914] sm:$0xf0]  ;;  %v9916_v52 = vld [vmem:[#allocation14 + $0x100] sm:$0xf0] }
 0x276   :  { %5759 = vmatpush.bf16.msra.mxu2 %v7791_v54  ;;  %5781 = vmatpush.bf16.msrb.mxu0 %v8351_v60  ;;  %v10129_v54 = vld [vmem:[#allocation14 + $0x7ac] sm:$0xf]  ;;  %v8603_v60 = vor.u32 %v10094_v55, %v8600_v28  ;;  %v7879_v22 = vor.u32 %v9916_v52, %v7878_v18  ;;  %v7850_v27 = vld [vmem:[#allocation14 + $0xb0] sm:$0xf]  ;;  %v9244_v33 = vld [vmem:[#allocation14 + $0xbb4] sm:$0xf0] }
 0x277   :  { %v8743_v2 = vor.u32 %v10129_v54, %v8740_v56  ;;  %v9930_v54 = vld [vmem:[#allocation14 + $0x170] sm:$0xf0]  ;;  %v8911_v56 = vor.u32 %v10171_v48, %v8908_v49  ;;  %v9909_v29 = vld [vmem:[#allocation14 + $0xc8] sm:$0xf0]  ;;  %v8102_v48 = vld [vmem:[#allocation14 + $0x2a8] sm:$0xf] }
 0x278   :  { %5818 = vmatpush.bf16.msrb.mxu3 %v9079_v23  ;;  %v8519_v23 = vor.u32 %v10073_v24, %v8516_v25  ;;  %v7851_v14 = vor.u32 %v9909_v29, %v7850_v27  ;;  %v9972_v49 = vld [vmem:[#allocation14 + $0x2c0] sm:$0xf0]  ;;  %v9132_v18 = vld [vmem:[#allocation14 + $0xad4] sm:$0xf0]  ;;  %v8018_v52 = vld [vmem:[#allocation14 + $0x200] sm:$0xf] }
 0x279   :  { %5792 = vmatpush.bf16.msrb.mxu1 %v8631_v50  ;;  %v9104_v27 = vld [vmem:[#allocation14 + $0xa9c] sm:$0xf0] }
 0x27a   :  { %5760 = vmatpush.bf16.msra.mxu2 %v7763_v1  ;;  %5782 = vmatpush.bf16.msrb.mxu0 %v8323_v7  ;;  %v2703_v62 = vpop.f32.mrf.mxu3  ;;  %v10087_v1 = vld [vmem:[#allocation14 + $0x65c] sm:$0xf]  ;;  %v8992_v7 = vld [vmem:[#allocation14 + $0x9bc] sm:$0xf0] }
 0x27b   :  { %v8995_v4 = vor.u32 %v10192_v32, %v8992_v7  ;;  %v9993_v32 = vld [vmem:[#allocation14 + $0x368] sm:$0xf0] }
 0x27c   :  { %5819 = vmatpush.bf16.msrb.mxu3 %v9051_v53  ;;  %v7934_v53 = vld [vmem:[#allocation14 + $0x158] sm:$0xf] }
 0x27d   :  { %5761 = vmatmul.bf16.vlgmr.msra.gmra.mxu2 %v10816_v44  ;;  %5793 = vmatpush.bf16.msrb.mxu1 %v8603_v60  ;;  %v7935_v60 = vor.u32 %v9930_v54, %v7934_v53  ;;  %v8103_v54 = vor.u32 %v9972_v49, %v8102_v48 }
 0x27e   :  { %5805 = vmatpush.bf16.msrb.mxu2 %v8855_v61  ;;  %5783 = vmatpush.bf16.msrb.mxu0 %v8295_v19  ;;  %v8572_v61 = vld [vmem:[#allocation14 + $0x674] sm:$0xf0]  ;;  %v1079_v19 = vperm.slane %v10837_v36, 6 }
 0x27f   :  { %v8575_v43 = vor.u32 %v10087_v1, %v8572_v61  ;;  %v8463_v1 = vor.u32 %v10059_v57, %v8460_v17  ;;  %v9188_v57 = vld [vmem:[#allocation14 + $0xb44] sm:$0xf0]  ;;  %v8074_v17 = vld [vmem:[#allocation14 + $0x270] sm:$0xf] }
 0x280   :  { %5820 = vmatpush.bf16.msrb.mxu3 %v9023_v3  ;;  %v2690_v11 = vpop.f32.mrf.mxu2  ;;  %v7906_v3 = vld [vmem:[#allocation14 + $0x120] sm:$0xf] }
 0x281   :  { %5794 = vmatpush.bf16.msrb.mxu1 %v8575_v43  ;;  %v2691_v30 = vadd.f32 %v2690_v11, %v1079_v19  ;;  %v10052_v43 = vld [vmem:[#allocation14 + $0x544] sm:$0xf]  ;;  %v9272_v19 = vld [vmem:[#allocation14 + $0xbec] sm:$0xf0] }
 0x282   :  { %5806 = vmatpush.bf16.msrb.mxu2 %v8827_v16  ;;  %5784 = vmatpush.bf16.msrb.mxu0 %v8267_v45  ;;  %v10080_v16 = vld [vmem:[#allocation14 + $0x624] sm:$0xf]  ;;  %v2705_v20 = vpop.f32.mrf.mxu3  ;;  %v10066_v45 = vld [vmem:[#allocation14 + $0x5b4] sm:$0xf] }
 0x283   :  { %v8547_v9 = vor.u32 %v10080_v16, %v8544_v12  ;;  %v8491_v50 = vor.u32 %v10066_v45, %v8488_v46  ;;  %v8187_v16 = vor.u32 %v9993_v32, %v8186_v5  ;;  %v10262_v12 = vld [vmem:[#allocation14 + $0xbd4] sm:$0xf]  ;;  %v8158_v20 = vld [vmem:[#allocation14 + $0x318] sm:$0xf]  ;;  %v9160_v5 = vld [vmem:[#allocation14 + $0xb0c] sm:$0xf0] }
 0x284   :  { %5821 = vmatpush.bf16.msrb.mxu3 %v8995_v4  ;;  %v9275_v24 = vor.u32 %v10262_v12, %v9272_v19  ;;  %v7822_v45 = vld [vmem:[#allocation14 + $0x78] sm:$0xf]  ;;  %v9902_v46 = vld [vmem:[#allocation14 + $0x90] sm:$0xf0] }
 0x285   :  { %5795 = vmatpush.bf16.msrb.mxu1 %v8547_v9  ;;  %5774 = vmatmul.bf16.vlgmr.msra.gmra.mxu3 %v10807_v37  ;;  %v8046_v32 = vld [vmem:[#allocation14 + $0x238] sm:$0xf] }
 0x286   :  { %5807 = vmatpush.bf16.msrb.mxu2 %v8799_v26  ;;  %5785 = vmatpush.bf16.msrb.mxu0 %v8239_v58  ;;  %v2729_v26 = vpop.f32.mrf.mxu1 }
 0x288   :  { %5822 = vmatpush.bf16.msrb.mxu3 %v8967_v21  ;;  %v2692_v39 = vpop.f32.mrf.mxu2 }
 0x289   :  { %5796 = vmatpush.bf16.msrb.mxu1 %v8519_v23  ;;  %v8130_v23 = vld [vmem:[#allocation14 + $0x2e0] sm:$0xf] }
 0x28a   :  { %5808 = vmatpush.bf16.msrb.mxu2 %v8771_v51  ;;  %5786 = vmatpush.bf16.msrb.mxu0 %v8211_v8  ;;  %v2704_v51 = vadd.f32 %v2703_v62, %v2691_v30  ;;  %v2716_v55 = vpop.f32.mrf.mxu0  ;;  %v9923_v62 = vld [vmem:[#allocation14 + $0x138] sm:$0xf0]  ;;  %v8883_v8 = vor.u32 %v10164_v63, %v8880_v0 }
 0x28b   :  { %v7907_v11 = vor.u32 %v9923_v62, %v7906_v3  ;;  %v9979_v30 = vld [vmem:[#allocation14 + $0x2f8] sm:$0xf0]  ;;  %v7766_v3 = vld [vmem:[#allocation14 + $0x8] sm:$0xf]  ;;  %v9888_v62 = vld [vmem:[#allocation14 + $0x20] sm:$0xf0] }
 0x28c   :  { %v2717_v28 = vadd.f32 %v2716_v55, %v2704_v51  ;;  %5823 = vmatpush.bf16.msrb.mxu3 %v8939_v34  ;;  %v10248_v34 = vld [vmem:[#allocation14 + $0xb64] sm:$0xf]  ;;  %v10241_v55 = vld [vmem:[#allocation14 + $0xb2c] sm:$0xf] }
 0x28d   :  { %5797 = vmatpush.bf16.msrb.mxu1 %v8491_v50  ;;  %v7823_v50 = vor.u32 %v9902_v46, %v7822_v45  ;;  %v8802_v45 = vld [vmem:[#allocation14 + $0x820] sm:$0xf]  ;;  %v10147_v46 = vld [vmem:[#allocation14 + $0x838] sm:$0xf0] }
 0x28e   :  { %5809 = vmatpush.bf16.msrb.mxu2 %v8743_v2  ;;  %v2731_v58 = vpop.f32.mrf.mxu1  ;;  %v2730_v61 = vadd.f32 %v2729_v26, %v2717_v28  ;;  %v10269_v2 = vld [vmem:[#allocation14 + $0xc0c] sm:$0xf]  ;;  %v10255_v26 = vld [vmem:[#allocation14 + $0xb9c] sm:$0xf]  ;;  %v7794_v28 = vld [vmem:[#allocation14 + $0x40] sm:$0xf] }
 0x28f   :  { %v9303_v15 = vor.u32 %v10269_v2, %v9300_v35  ;;  %v9247_v39 = vor.u32 %v10255_v26, %v9244_v33  ;;  %v9965_v58 = vld [vmem:[#allocation14 + $0x288] sm:$0xf0]  ;;  %v10234_v2 = vld [vmem:[#allocation14 + $0xaf4] sm:$0xf]  ;;  %v10220_v26 = vld [vmem:[#allocation14 + $0xa84] sm:$0xf] }
 0x290   :  { %vm2791_vm12 = vcmp.ge.f32.partialorder %v2730_v61, 0.0  ;;  %v2799_v7 = vmul.f32 0.2, %v2730_v61  ;;  %5824 = vmatpush.bf16.msrb.mxu3 %v8911_v56  ;;  %v9895_v56 = vld [vmem:[#allocation14 + $0x58] sm:$0xf0]  ;;  %v9107_v49 = vor.u32 %v10220_v26, %v9104_v27 }
 0x291   :  { %5798 = vmatpush.bf16.msrb.mxu1 %v8463_v1  ;;  %v7795_v0 = vor.u32 %v9895_v56, %v7794_v28  ;;  %v9191_v1 = vor.u32 %v10241_v55, %v9188_v57  ;;  %v8803_v28 = vor.u32 %v10147_v46, %v8802_v45  ;;  %v10318_v56 = vld [vmem:[#allocation14 + $0xd94] sm:$0xf]  ;;  %v8382_v57 = vld [vmem:[#allocation14 + $0x4d8] sm:$0xf]  ;;  %v8998_v27 = vld [vmem:[#allocation14 + $0x9a8] sm:$0xf] }
 0x292   :  { %5810 = vmatpush.bf16.msrb.mxu2 %v8715_v13  ;;  %v8432_v13 = vld [vmem:[#allocation14 + $0x55c] sm:$0xf0]  ;;  %v2807_v4 = vsel %vm2791_vm12, %v2730_v61, %v2799_v7  ;;  %v2718_v9 = vpop.f32.mrf.mxu0  ;;  %v8075_v61 = vor.u32 %v9965_v58, %v8074_v17  ;;  %v9958_v7 = vld [vmem:[#allocation14 + $0x250] sm:$0xf0]  ;;  %v9412_v46 = vld [vmem:[#allocation14 + $0xd04] sm:$0xf0] }
 0x293   :  { %v10848_v10 = vpack.c.bf16 %v2807_v4, %v2807_v4  ;;  %v8435_v21 = vor.u32 %v10052_v43, %v8432_v13  ;;  %v8858_v43 = vld [vmem:[#allocation14 + $0x890] sm:$0xf]  ;;  %v9163_v4 = vor.u32 %v10234_v2, %v9160_v5  ;;  %v9951_v9 = vld [vmem:[#allocation14 + $0x218] sm:$0xf0]  ;;  %v10042_v17 = vld [vmem:[#allocation14 + $0x4f0] sm:$0xf0] }
 0x294   :  { %5825 = vmatpush.bf16.msrb.mxu3 %v8883_v8  ;;  %v9054_v2 = vld [vmem:[#allocation14 + $0xa18] sm:$0xf]  ;;  %v10126_v26 = vld [vmem:[#allocation14 + $0x790] sm:$0xf0] }
 0x295   :  { %5735 = vmatmul.bf16.vlgmr.msra.gmra.mxu0 %v10848_v10  ;;  %5799 = vmatpush.bf16.msrb.mxu1 %v8435_v21 }
 0x296   :  { %5811 = vmatpush.bf16.msrb.mxu2 %v8687_v31  ;;  %v9986_v31 = vld [vmem:[#allocation14 + $0x330] sm:$0xf0]  ;;  %5831 = vmatpush.bf16.msra.mxu0 %v9303_v15  ;;  %v8047_v15 = vor.u32 %v9958_v7, %v8046_v32  ;;  %v8354_v7 = vld [vmem:[#allocation14 + $0x4a0] sm:$0xf] }
 0x297   :  { %v8159_v25 = vor.u32 %v9986_v31, %v8158_v20  ;;  %5826 = vmatmul.bf16.vlgmr.msrb.gmra.mxu3 %v10842_v40  ;;  %v8830_v20 = vld [vmem:[#allocation14 + $0x858] sm:$0xf]  ;;  %v10154_v31 = vld [vmem:[#allocation14 + $0x870] sm:$0xf0] }
 0x298   :  { %5870 = vmatpush.bf16.msra.mxu3 %v8187_v16  ;;  %v10227_v16 = vld [vmem:[#allocation14 + $0xabc] sm:$0xf]  ;;  %v8831_v33 = vor.u32 %v10154_v31, %v8830_v20  ;;  %v10304_v20 = vld [vmem:[#allocation14 + $0xd24] sm:$0xf]  ;;  %v8326_v31 = vld [vmem:[#allocation14 + $0x468] sm:$0xf] }
 0x29a   :  { %5812 = vmatpush.bf16.msrb.mxu2 %v8659_v41  ;;  %v2755_v38 = vpop.f32.mrf.mxu3  ;;  %5832 = vmatpush.bf16.msra.mxu0 %v9275_v24  ;;  %v8131_v41 = vor.u32 %v9979_v30, %v8130_v23  ;;  %v9135_v24 = vor.u32 %v10227_v16, %v9132_v18  ;;  %v7990_v23 = vld [vmem:[#allocation14 + $0x1c8] sm:$0xf]  ;;  %v9944_v30 = vld [vmem:[#allocation14 + $0x1e0] sm:$0xf0]  ;;  %v9026_v16 = vld [vmem:[#allocation14 + $0x9e0] sm:$0xf] }
 0x29c   :  { %5871 = vmatpush.bf16.msra.mxu3 %v8159_v25  ;;  %v8019_v25 = vor.u32 %v9951_v9, %v8018_v52 }
 0x29d   :  { %5813 = vmatmul.bf16.vlgmr.msrb.gmra.mxu2 %v10832_v59 }
 0x29e   :  { %5857 = vmatpush.bf16.msra.mxu2 %v7963_v47  ;;  %v9216_v47 = vld [vmem:[#allocation14 + $0xb7c] sm:$0xf0]  ;;  %5833 = vmatpush.bf16.msra.mxu0 %v9247_v39 }
 0x29f   :  { %v9219_v53 = vor.u32 %v10248_v34, %v9216_v47  ;;  %v10049_v34 = vld [vmem:[#allocation14 + $0x528] sm:$0xf0]  ;;  %v9082_v47 = vld [vmem:[#allocation14 + $0xa50] sm:$0xf] }
 0x2a0   :  { %5872 = vmatpush.bf16.msra.mxu3 %v8131_v41  ;;  %v2742_v51 = vpop.f32.mrf.mxu2  ;;  %v8410_v41 = vld [vmem:[#allocation14 + $0x510] sm:$0xf] }
 0x2a2   :  { %5858 = vmatpush.bf16.msra.mxu2 %v7935_v60  ;;  %v1080_v60 = vperm.slane %v10837_v36, 7  ;;  %v2757_v63 = vpop.f32.mrf.mxu3  ;;  %5834 = vmatpush.bf16.msra.mxu0 %v9219_v53  ;;  %v7767_v36 = vor.u32 %v9888_v62, %v7766_v3  ;;  %v8411_v53 = vor.u32 %v10049_v34, %v8410_v41  ;;  %v10210_v3 = vld [vmem:[#allocation14 + $0xa30] sm:$0xf0]  ;;  %v8383_v62 = vor.u32 %v10042_v17, %v8382_v57  ;;  %v8298_v41 = vld [vmem:[#allocation14 + $0x430] sm:$0xf] }
 0x2a3   :  { %v10021_v34 = vld [vmem:[#allocation14 + $0x448] sm:$0xf0]  ;;  %v9384_v57 = vld [vmem:[#allocation14 + $0xccc] sm:$0xf0]  ;;  %v8270_v17 = vld [vmem:[#allocation14 + $0x3f8] sm:$0xf] }
 0x2a4   :  { %5873 = vmatpush.bf16.msra.mxu3 %v8103_v54  ;;  %v2781_v35 = vpop.f32.mrf.mxu1  ;;  %v2743_v8 = vadd.f32 %v2742_v51, %v1080_v60  ;;  %v10217_v51 = vld [vmem:[#allocation14 + $0xa68] sm:$0xf0] }
 0x2a5   :  { %5787 = vmatmul.bf16.vlgmr.msrb.gmra.mxu0 %v10828_v6  ;;  %v9083_v63 = vor.u32 %v10217_v51, %v9082_v47  ;;  %v8690_v47 = vld [vmem:[#allocation14 + $0x740] sm:$0xf]  ;;  %v10189_v51 = vld [vmem:[#allocation14 + $0x988] sm:$0xf0] }
 0x2a6   :  { %5859 = vmatpush.bf16.msra.mxu2 %v7907_v11  ;;  %v10161_v11 = vld [vmem:[#allocation14 + $0x8a8] sm:$0xf0]  ;;  %5835 = vmatpush.bf16.msra.mxu0 %v9191_v1  ;;  %v2756_v19 = vadd.f32 %v2755_v38, %v2743_v8  ;;  %v9524_v38 = vld [vmem:[#allocation14 + $0xde4] sm:$0xf0]  ;;  %v10035_v8 = vld [vmem:[#allocation14 + $0x4b8] sm:$0xf0] }
 0x2a7   :  { %v8859_v12 = vor.u32 %v10161_v11, %v8858_v43  ;;  %v8774_v1 = vld [vmem:[#allocation14 + $0x7e8] sm:$0xf]  ;;  %v3329_v43 = vld [vmem:[#allocation16] sm:$0xff]  ;;  %v9055_v11 = vor.u32 %v10210_v3, %v9054_v2  ;;  %v8355_v18 = vor.u32 %v10035_v8, %v8354_v7  ;;  %v8942_v2 = vld [vmem:[#allocation14 + $0x938] sm:$0xf] }
 0x2a8   :  { %5874 = vmatpush.bf16.msra.mxu3 %v8075_v61  ;;  %v2744_v13 = vpop.f32.mrf.mxu2  ;;  %v10140_v61 = vld [vmem:[#allocation14 + $0x800] sm:$0xf0]  ;;  %v3331_v52 = vperm.slane %v3329_v43, 0  ;;  %v10182_v3 = vld [vmem:[#allocation14 + $0x950] sm:$0xf0] }
 0x2a9   :  { %v8775_v32 = vor.u32 %v10140_v61, %v8774_v1  ;;  %v8746_v13 = vld [vmem:[#allocation14 + $0x7b0] sm:$0xf]  ;;  %v8662_v1 = vld [vmem:[#allocation14 + $0x708] sm:$0xf]  ;;  %v10112_v61 = vld [vmem:[#allocation14 + $0x720] sm:$0xf0] }
 0x2aa   :  { %5860 = vmatpush.bf16.msra.mxu2 %v7879_v22  ;;  %v2768_v21 = vpop.f32.mrf.mxu0  ;;  %5836 = vmatpush.bf16.msra.mxu0 %v9163_v4  ;;  %v10133_v4 = vld [vmem:[#allocation14 + $0x7c8] sm:$0xf0]  ;;  %v8663_v8 = vor.u32 %v10112_v61, %v8662_v1  ;;  %v8242_v43 = vld [vmem:[#allocation14 + $0x3c0] sm:$0xf]  ;;  %v9983_v1 = vld [vmem:[#allocation14 + $0x31c] sm:$0xf] }
 0x2ab   :  { %v2769_v22 = vadd.f32 %v2768_v21, %v2756_v19  ;;  %v8747_v19 = vor.u32 %v10133_v4, %v8746_v13  ;;  %v10028_v21 = vld [vmem:[#allocation14 + $0x480] sm:$0xf0]  ;;  %v10283_v4 = vld [vmem:[#allocation14 + $0xc7c] sm:$0xf]  ;;  %v8160_v61 = vld [vmem:[#allocation14 + $0x334] sm:$0xf0] }
 0x2ac   :  { %5875 = vmatpush.bf16.msra.mxu3 %v8047_v15  ;;  %v2783_v29 = vpop.f32.mrf.mxu1 }
 0x2ad   :  { %v2782_v39 = vadd.f32 %v2781_v35, %v2769_v22  ;;  %v10311_v35 = vld [vmem:[#allocation14 + $0xd5c] sm:$0xf]  ;;  %v10196_v29 = vld [vmem:[#allocation14 + $0x9c0] sm:$0xf0] }
 0x2ae   :  { %5861 = vmatpush.bf16.msra.mxu2 %v7851_v14  ;;  %v10325_v14 = vld [vmem:[#allocation14 + $0xdcc] sm:$0xf]  ;;  %5837 = vmatpush.bf16.msra.mxu0 %v9135_v24  ;;  %v9440_v24 = vld [vmem:[#allocation14 + $0xd3c] sm:$0xf0]  ;;  %v8999_v45 = vor.u32 %v10196_v29, %v8998_v27 }
 0x2af   :  { %vm2792_vm13 = vcmp.ge.f32.partialorder %v2782_v39, 0.0  ;;  %v2800_v48 = vmul.f32 0.2, %v2782_v39  ;;  %v9527_v55 = vor.u32 %v10325_v14, %v9524_v38  ;;  %v9443_v14 = vor.u32 %v10304_v20, %v9440_v24  ;;  %v10297_v38 = vld [vmem:[#allocation14 + $0xcec] sm:$0xf] }
 0x2b0   :  { %5876 = vmatpush.bf16.msra.mxu3 %v8019_v25  ;;  %v8718_v25 = vld [vmem:[#allocation14 + $0x778] sm:$0xf]  ;;  %v8214_v24 = vld [vmem:[#allocation14 + $0x388] sm:$0xf] }
 0x2b1   :  { %v2808_v54 = vsel %vm2792_vm13, %v2782_v39, %v2800_v48  ;;  %v8719_v39 = vor.u32 %v10126_v26, %v8718_v25  ;;  %v10119_v48 = vld [vmem:[#allocation14 + $0x758] sm:$0xf0]  ;;  %v10000_v25 = vld [vmem:[#allocation14 + $0x3a0] sm:$0xf0]  ;;  %v8886_v26 = vld [vmem:[#allocation14 + $0x8c8] sm:$0xf] }
 0x2b2   :  { %5862 = vmatpush.bf16.msra.mxu2 %v7823_v50  ;;  %v7991_v50 = vor.u32 %v9944_v30, %v7990_v23  ;;  %v10855_v58 = vpack.c.bf16 %v2808_v54, %v2808_v54  ;;  %v2770_v60 = vpop.f32.mrf.mxu0  ;;  %5838 = vmatpush.bf16.msra.mxu0 %v9107_v49  ;;  %v8327_v23 = vor.u32 %v10028_v21, %v8326_v31  ;;  %v10276_v31 = vld [vmem:[#allocation14 + $0xc44] sm:$0xf]  ;;  %v9328_v21 = vld [vmem:[#allocation14 + $0xc5c] sm:$0xf0] }
 0x2b3   :  { %v8299_v54 = vor.u32 %v10021_v34, %v8298_v41  ;;  %v10014_v60 = vld [vmem:[#allocation14 + $0x410] sm:$0xf0]  ;;  %v10105_v41 = vld [vmem:[#allocation14 + $0x6e8] sm:$0xf0]  ;;  %v9920_v34 = vld [vmem:[#allocation14 + $0x124] sm:$0xf] }
 0x2b4   :  { %5877 = vmatpush.bf16.msra.mxu3 %v7991_v50  ;;  %5748 = vmatmul.bf16.vlgmr.msra.gmra.mxu1 %v10855_v58  ;;  %v8970_v50 = vld [vmem:[#allocation14 + $0x970] sm:$0xf] }
 0x2b5   :  { %5844 = vmatpush.bf16.msra.mxu1 %v9527_v55  ;;  %5839 = vmatmul.bf16.vlgmr.msra.gmra.mxu0 %v10848_v10  ;;  %v10290_v55 = vld [vmem:[#allocation14 + $0xcb4] sm:$0xf] }
 0x2b6   :  { %5863 = vmatpush.bf16.msra.mxu2 %v7795_v0  ;;  %v9496_v0 = vld [vmem:[#allocation14 + $0xdac] sm:$0xf0]  ;;  %5883 = vmatpush.bf16.msrb.mxu0 %v8411_v53  ;;  %v9387_v7 = vor.u32 %v10290_v55, %v9384_v57  ;;  %v10266_v55 = vld [vmem:[#allocation14 + $0xbf0] sm:$0xf0] }
 0x2b7   :  { %v9499_v5 = vor.u32 %v10318_v56, %v9496_v0  ;;  %5878 = vmatmul.bf16.vlgmr.msra.gmra.mxu3 %v10807_v37  ;;  %v8691_v56 = vor.u32 %v10119_v48, %v8690_v47  ;;  %v8971_v0 = vor.u32 %v10189_v51, %v8970_v50  ;;  %v9990_v47 = vld [vmem:[#allocation14 + $0x354] sm:$0xf]  ;;  %v8188_v48 = vld [vmem:[#allocation14 + $0x36c] sm:$0xf0] }
 0x2b8   :  { %5922 = vmatpush.bf16.msrb.mxu3 %v9083_v63  ;;  %v8191_v57 = vor.u32 %v9990_v47, %v8188_v48 }
 0x2b9   :  { %5845 = vmatpush.bf16.msra.mxu1 %v9499_v5 }
 0x2ba   :  { %5864 = vmatpush.bf16.msra.mxu2 %v7767_v36  ;;  %v9468_v36 = vld [vmem:[#allocation14 + $0xd74] sm:$0xf0]  ;;  %v5671_v15 = vpop.f32.mrf.mxu3  ;;  %5884 = vmatpush.bf16.msrb.mxu0 %v8383_v62  ;;  %v9934_v62 = vld [vmem:[#allocation14 + $0x194] sm:$0xf] }
 0x2bb   :  { %v9471_v9 = vor.u32 %v10311_v35, %v9468_v36  ;;  %v7964_v35 = vld [vmem:[#allocation14 + $0x1ac] sm:$0xf0]  ;;  %v8943_v36 = vor.u32 %v10182_v3, %v8942_v2 }
 0x2bc   :  { %5923 = vmatpush.bf16.msrb.mxu3 %v9055_v11  ;;  %v10007_v11 = vld [vmem:[#allocation14 + $0x3d8] sm:$0xf0]  ;;  %v7967_v13 = vor.u32 %v9934_v62, %v7964_v35  ;;  %v9250_v62 = vld [vmem:[#allocation14 + $0xba0] sm:$0xf] }
 0x2bd   :  { %5865 = vmatmul.bf16.vlgmr.msra.gmra.mxu2 %v10816_v44  ;;  %5846 = vmatpush.bf16.msra.mxu1 %v9471_v9  ;;  %v7936_v9 = vld [vmem:[#allocation14 + $0x174] sm:$0xf0]  ;;  %v8243_v20 = vor.u32 %v10007_v11, %v8242_v43  ;;  %v10259_v35 = vld [vmem:[#allocation14 + $0xbb8] sm:$0xf0]  ;;  %v9906_v43 = vld [vmem:[#allocation14 + $0xb4] sm:$0xf] }
 0x2be   :  { %5909 = vmatpush.bf16.msrb.mxu2 %v8859_v12  ;;  %v10203_v12 = vld [vmem:[#allocation14 + $0x9f8] sm:$0xf0]  ;;  %5885 = vmatpush.bf16.msrb.mxu0 %v8355_v18  ;;  %v7852_v11 = vld [vmem:[#allocation14 + $0xcc] sm:$0xf0] }
 0x2bf   :  { %v9027_v22 = vor.u32 %v10203_v12, %v9026_v16  ;;  %v8914_v16 = vld [vmem:[#allocation14 + $0x900] sm:$0xf]  ;;  %v10175_v18 = vld [vmem:[#allocation14 + $0x918] sm:$0xf0] }
 0x2c0   :  { %v8915_v29 = vor.u32 %v10175_v18, %v8914_v16  ;;  %v9222_v16 = vld [vmem:[#allocation14 + $0xb68] sm:$0xf]  ;;  %v7855_v18 = vor.u32 %v9906_v43, %v7852_v11 }
 0x2c1   :  { %5924 = vmatpush.bf16.msrb.mxu3 %v9027_v22  ;;  %5847 = vmatpush.bf16.msra.mxu1 %v9443_v14  ;;  %v10273_v14 = vld [vmem:[#allocation14 + $0xc28] sm:$0xf0] }
 0x2c2   :  { %5910 = vmatpush.bf16.msrb.mxu2 %v8831_v33  ;;  %v5658_v33 = vpop.f32.mrf.mxu2  ;;  %v5673_v49 = vpop.f32.mrf.mxu3  ;;  %5886 = vmatpush.bf16.msrb.mxu0 %v8327_v23  ;;  %v10168_v23 = vld [vmem:[#allocation14 + $0x8e0] sm:$0xf0] }
 0x2c3   :  { %v5659_v30 = vadd.f32 %v5658_v33, %v3331_v52  ;;  %v9927_v52 = vld [vmem:[#allocation14 + $0x15c] sm:$0xf]  ;;  %v9331_v49 = vor.u32 %v10276_v31, %v9328_v21  ;;  %v8887_v51 = vor.u32 %v10168_v23, %v8886_v26  ;;  %v7824_v31 = vld [vmem:[#allocation14 + $0x94] sm:$0xf0]  ;;  %v9969_v21 = vld [vmem:[#allocation14 + $0x2ac] sm:$0xf] }
 0x2c4   :  { %v5697_v63 = vpop.f32.mrf.mxu1  ;;  %5800 = vmatmul.bf16.vlgmr.msrb.gmra.mxu1 %v10824_v42  ;;  %v7939_v33 = vor.u32 %v9927_v52, %v7936_v9  ;;  %v8550_v9 = vld [vmem:[#allocation14 + $0x628] sm:$0xf]  ;;  %v9194_v26 = vld [vmem:[#allocation14 + $0xb30] sm:$0xf] }
 0x2c5   :  { %v5672_v53 = vadd.f32 %v5671_v15, %v5659_v30  ;;  %5925 = vmatpush.bf16.msrb.mxu3 %v8999_v45  ;;  %v9356_v15 = vld [vmem:[#allocation14 + $0xc94] sm:$0xf0]  ;;  %v9306_v30 = vld [vmem:[#allocation14 + $0xc10] sm:$0xf]  ;;  %v8215_v45 = vor.u32 %v10000_v25, %v8214_v24 }
 0x2c6   :  { %5911 = vmatpush.bf16.msrb.mxu2 %v8803_v28  ;;  %v9415_v28 = vor.u32 %v10297_v38, %v9412_v46  ;;  %5887 = vmatpush.bf16.msrb.mxu0 %v8299_v54  ;;  %v9359_v22 = vor.u32 %v10283_v4, %v9356_v15  ;;  %v8634_v38 = vld [vmem:[#allocation14 + $0x6d0] sm:$0xf]  ;;  %v7908_v46 = vld [vmem:[#allocation14 + $0x13c] sm:$0xf0]  ;;  %v9307_v50 = vor.u32 %v10273_v14, %v9306_v30  ;;  %v9278_v54 = vld [vmem:[#allocation14 + $0xbd8] sm:$0xf] }
 0x2c7   :  { %v9279_v2 = vor.u32 %v10266_v55, %v9278_v54  ;;  %v9251_v4 = vor.u32 %v10259_v35, %v9250_v62  ;;  %v8522_v23 = vld [vmem:[#allocation14 + $0x5f0] sm:$0xf]  ;;  %v10077_v30 = vld [vmem:[#allocation14 + $0x608] sm:$0xf0]  ;;  %v9892_v14 = vld [vmem:[#allocation14 + $0x44] sm:$0xf] }
 0x2c8   :  { %5848 = vmatpush.bf16.msra.mxu1 %v9415_v28  ;;  %v8523_v48 = vor.u32 %v10077_v30, %v8522_v23  ;;  %v8494_v54 = vld [vmem:[#allocation14 + $0x5b8] sm:$0xf]  ;;  %v10070_v55 = vld [vmem:[#allocation14 + $0x5d0] sm:$0xf0]  ;;  %v8466_v62 = vld [vmem:[#allocation14 + $0x580] sm:$0xf] }
 0x2c9   :  { %5926 = vmatpush.bf16.msrb.mxu3 %v8971_v0  ;;  %v7880_v0 = vld [vmem:[#allocation14 + $0x104] sm:$0xf0]  ;;  %v10063_v35 = vld [vmem:[#allocation14 + $0x598] sm:$0xf0] }
 0x2ca   :  { %5912 = vmatpush.bf16.msrb.mxu2 %v8775_v32  ;;  %v5660_v5 = vpop.f32.mrf.mxu2  ;;  %v8271_v32 = vor.u32 %v10014_v60, %v8270_v17  ;;  %v5684_v12 = vpop.f32.mrf.mxu0  ;;  %v8606_v17 = vld [vmem:[#allocation14 + $0x698] sm:$0xf]  ;;  %v10098_v60 = vld [vmem:[#allocation14 + $0x6b0] sm:$0xf0] }
 0x2cb   :  { %v8607_v3 = vor.u32 %v10098_v60, %v8606_v17  ;;  %v8048_v17 = vld [vmem:[#allocation14 + $0x254] sm:$0xf0] }
 0x2cc   :  { %5888 = vmatpush.bf16.msrb.mxu0 %v8271_v32  ;;  %5849 = vmatpush.bf16.msra.mxu1 %v9387_v7  ;;  %v5699_v27 = vpop.f32.mrf.mxu1  ;;  %v8163_v32 = vor.u32 %v9983_v1, %v8160_v61  ;;  %v8578_v7 = vld [vmem:[#allocation14 + $0x660] sm:$0xf]  ;;  %v10231_v61 = vld [vmem:[#allocation14 + $0xad8] sm:$0xf0] }
 0x2cd   :  { %5927 = vmatpush.bf16.msrb.mxu3 %v8943_v36  ;;  %v9976_v36 = vld [vmem:[#allocation14 + $0x2e4] sm:$0xf]  ;;  %v10245_v27 = vld [vmem:[#allocation14 + $0xb48] sm:$0xf0]  ;;  %v9138_v1 = vld [vmem:[#allocation14 + $0xac0] sm:$0xf] }
 0x2ce   :  { %5913 = vmatpush.bf16.msrb.mxu2 %v8747_v19  ;;  %v5685_v19 = vadd.f32 %v5684_v12, %v5672_v53  ;;  %v8635_v53 = vor.u32 %v10105_v41, %v8634_v38  ;;  %v10252_v12 = vld [vmem:[#allocation14 + $0xb80] sm:$0xf0]  ;;  %v7796_v38 = vld [vmem:[#allocation14 + $0x5c] sm:$0xf0]  ;;  %v9962_v41 = vld [vmem:[#allocation14 + $0x274] sm:$0xf]  ;;  %v9139_v11 = vor.u32 %v10231_v61, %v9138_v1 }
 0x2cf   :  { %v9223_v24 = vor.u32 %v10252_v12, %v9222_v16  ;;  %v9110_v16 = vld [vmem:[#allocation14 + $0xa88] sm:$0xf]  ;;  %v10224_v12 = vld [vmem:[#allocation14 + $0xaa0] sm:$0xf0]  ;;  %v9028_v61 = vld [vmem:[#allocation14 + $0x9fc] sm:$0xf0] }
 0x2d0   :  { %5889 = vmatpush.bf16.msrb.mxu0 %v8243_v20  ;;  %5850 = vmatpush.bf16.msra.mxu1 %v9359_v22  ;;  %v9899_v20 = vld [vmem:[#allocation14 + $0x7c] sm:$0xf]  ;;  %v8104_v22 = vld [vmem:[#allocation14 + $0x2c4] sm:$0xf0]  ;;  %v10200_v1 = vld [vmem:[#allocation14 + $0x9e4] sm:$0xf] }
 0x2d1   :  { %5928 = vmatpush.bf16.msrb.mxu3 %v8915_v29  ;;  %v7827_v29 = vor.u32 %v9899_v20, %v7824_v31  ;;  %v8412_v20 = vld [vmem:[#allocation14 + $0x52c] sm:$0xf0] }
 0x2d2   :  { %5914 = vmatpush.bf16.msrb.mxu2 %v8719_v39  ;;  %v10861_v39 = vadd.f32 %v5697_v63, %v5685_v19  ;;  %v5686_v28 = vpop.f32.mrf.mxu0  ;;  %v9913_v63 = vld [vmem:[#allocation14 + $0xec] sm:$0xf]  ;;  %v10084_v19 = vld [vmem:[#allocation14 + $0x640] sm:$0xf0] }
 0x2d3   :  { %v7883_v5 = vor.u32 %v9913_v63, %v7880_v0  ;;  %v8551_v25 = vor.u32 %v10084_v19, %v8550_v9  ;;  %v9885_v28 = vld [vmem:[#allocation14 + $0xc] sm:$0xf]  ;;  %v10158_v63 = vld [vmem:[#allocation14 + $0x894] sm:$0xf]  ;;  %v8860_v0 = vld [vmem:[#allocation14 + $0x8ac] sm:$0xf0] }
 0x2d4   :  { %5890 = vmatpush.bf16.msrb.mxu0 %v8215_v45  ;;  %5851 = vmatpush.bf16.msra.mxu1 %v9331_v49  ;;  %v9166_v49 = vld [vmem:[#allocation14 + $0xaf8] sm:$0xf]  ;;  %v7992_v9 = vld [vmem:[#allocation14 + $0x1e4] sm:$0xf0]  ;;  %v10046_v19 = vld [vmem:[#allocation14 + $0x514] sm:$0xf] }
 0x2d5   :  { %5929 = vmatpush.bf16.msrb.mxu3 %v8887_v51  ;;  %v7799_v51 = vor.u32 %v9892_v14, %v7796_v38  ;;  %v8415_v23 = vor.u32 %v10046_v19, %v8412_v20  ;;  %v10039_v38 = vld [vmem:[#allocation14 + $0x4dc] sm:$0xf]  ;;  %v9418_v19 = vld [vmem:[#allocation14 + $0xcf0] sm:$0xf]  ;;  %v10301_v20 = vld [vmem:[#allocation14 + $0xd08] sm:$0xf0] }
 0x2d6   :  { %5915 = vmatpush.bf16.msrb.mxu2 %v8691_v56  ;;  %v7911_v56 = vor.u32 %v9920_v34, %v7908_v46  ;;  %v8076_v34 = vld [vmem:[#allocation14 + $0x28c] sm:$0xf0]  ;;  %v9195_v46 = vor.u32 %v10245_v27, %v9194_v26  ;;  %v8804_v26 = vld [vmem:[#allocation14 + $0x83c] sm:$0xf0]  ;;  %v10214_v27 = vld [vmem:[#allocation14 + $0xa54] sm:$0xf] }
 0x2d7   :  { %5891 = vmatmul.bf16.vlgmr.msrb.gmra.mxu0 %v10828_v6  ;;  %5852 = vmatmul.bf16.vlgmr.msra.gmra.mxu1 %v10855_v58 }
 0x2d8   :  { %5935 = vmatpush.bf16.msra.mxu0 %v9307_v50  ;;  %5896 = vmatpush.bf16.msrb.mxu1 %v8635_v53  ;;  %v10238_v50 = vld [vmem:[#allocation14 + $0xb10] sm:$0xf0]  ;;  %v8079_v53 = vor.u32 %v9962_v41, %v8076_v34  ;;  %v8384_v41 = vld [vmem:[#allocation14 + $0x4f4] sm:$0xf0] }
 0x2d9   :  { %5974 = vmatpush.bf16.msra.mxu3 %v8191_v57  ;;  %v9955_v57 = vld [vmem:[#allocation14 + $0x23c] sm:$0xf]  ;;  %v9167_v60 = vor.u32 %v10238_v50, %v9166_v49  ;;  %v10137_v49 = vld [vmem:[#allocation14 + $0x7ec] sm:$0xf]  ;;  %v8776_v50 = vld [vmem:[#allocation14 + $0x804] sm:$0xf0] }
 0x2da   :  { %5916 = vmatpush.bf16.msrb.mxu2 %v8663_v8  ;;  %v10091_v8 = vld [vmem:[#allocation14 + $0x678] sm:$0xf0]  ;;  %5930 = vmatmul.bf16.vlgmr.msrb.gmra.mxu3 %v10842_v40 }
 0x2db   :  { %v8579_v15 = vor.u32 %v10091_v8, %v8578_v7  ;;  %v8020_v7 = vld [vmem:[#allocation14 + $0x21c] sm:$0xf0]  ;;  %v10151_v8 = vld [vmem:[#allocation14 + $0x85c] sm:$0xf] }
 0x2dc   :  { %5936 = vmatpush.bf16.msra.mxu0 %v9279_v2  ;;  %5897 = vmatpush.bf16.msrb.mxu1 %v8607_v3  ;;  %v8051_v3 = vor.u32 %v9955_v57, %v8048_v17  ;;  %v8779_v57 = vor.u32 %v10137_v49, %v8776_v50  ;;  %v7970_v50 = vld [vmem:[#allocation14 + $0x198] sm:$0xf] }
 0x2dd   :  { %5917 = vmatmul.bf16.vlgmr.msrb.gmra.mxu2 %v10832_v59  ;;  %5975 = vmatpush.bf16.msra.mxu3 %v8163_v32  ;;  %v9948_v32 = vld [vmem:[#allocation14 + $0x204] sm:$0xf] }
 0x2de   :  { %5961 = vmatpush.bf16.msra.mxu2 %v7967_v13  ;;  %v8132_v13 = vld [vmem:[#allocation14 + $0x2fc] sm:$0xf0] }
 0x2df   :  { %v8135_v52 = vor.u32 %v9976_v36, %v8132_v13  ;;  %v8832_v36 = vld [vmem:[#allocation14 + $0x874] sm:$0xf0]  ;;  %v8438_v13 = vld [vmem:[#allocation14 + $0x548] sm:$0xf] }
 0x2e0   :  { %5937 = vmatpush.bf16.msra.mxu0 %v9251_v4  ;;  %5898 = vmatpush.bf16.msrb.mxu1 %v8579_v15  ;;  %v5710_v45 = vpop.f32.mrf.mxu2  ;;  %v10056_v4 = vld [vmem:[#allocation14 + $0x560] sm:$0xf0]  ;;  %v8467_v15 = vor.u32 %v10063_v35, %v8466_v62  ;;  %v8835_v31 = vor.u32 %v10151_v8, %v8832_v36  ;;  %v10025_v62 = vld [vmem:[#allocation14 + $0x46c] sm:$0xf]  ;;  %v8328_v35 = vld [vmem:[#allocation14 + $0x484] sm:$0xf0] }
 0x2e1   :  { %5976 = vmatpush.bf16.msra.mxu3 %v8135_v52  ;;  %v10868_v47 = vadd.f32 %v5710_v45, %v10861_v39  ;;  %v8495_v39 = vor.u32 %v10070_v55, %v8494_v54  ;;  %v8023_v52 = vor.u32 %v9948_v32, %v8020_v7  ;;  %v8387_v54 = vor.u32 %v10039_v38, %v8384_v41  ;;  %v9446_v7 = vld [vmem:[#allocation14 + $0xd28] sm:$0xf]  ;;  %v10308_v8 = vld [vmem:[#allocation14 + $0xd40] sm:$0xf0]  ;;  %v10193_v36 = vld [vmem:[#allocation14 + $0x9ac] sm:$0xf] }
 0x2e2   :  { %5962 = vmatpush.bf16.msra.mxu2 %v7939_v33  ;;  %v8107_v33 = vor.u32 %v9969_v21, %v8104_v22  ;;  %v9530_v21 = vld [vmem:[#allocation14 + $0xdd0] sm:$0xf]  ;;  %v10329_v22 = vld [vmem:[#allocation14 + $0xde8] sm:$0xf0]  ;;  %v9031_v32 = vor.u32 %v10200_v1, %v9028_v61  ;;  %v10294_v38 = vld [vmem:[#allocation14 + $0xcd0] sm:$0xf0] }
 0x2e3   :  { %v9531_v14 = vor.u32 %v10329_v22, %v9530_v21  ;;  %v8692_v21 = vld [vmem:[#allocation14 + $0x75c] sm:$0xf0]  ;;  %v10186_v22 = vld [vmem:[#allocation14 + $0x974] sm:$0xf]  ;;  %v10109_v41 = vld [vmem:[#allocation14 + $0x70c] sm:$0xf] }
 0x2e4   :  { %5938 = vmatpush.bf16.msra.mxu0 %v9223_v24  ;;  %5899 = vmatpush.bf16.msrb.mxu1 %v8551_v25  ;;  %v10144_v24 = vld [vmem:[#allocation14 + $0x824] sm:$0xf]  ;;  %v9111_v25 = vor.u32 %v10224_v12, %v9110_v16  ;;  %v9447_v16 = vor.u32 %v10308_v8, %v9446_v7  ;;  %v10018_v12 = vld [vmem:[#allocation14 + $0x434] sm:$0xf]  ;;  %v9931_v61 = vld [vmem:[#allocation14 + $0x178] sm:$0xf0] }
 0x2e5   :  { %5977 = vmatpush.bf16.msra.mxu3 %v8107_v33  ;;  %v8439_v33 = vor.u32 %v10056_v4, %v8438_v13  ;;  %v8807_v34 = vor.u32 %v10144_v24, %v8804_v26  ;;  %v9000_v13 = vld [vmem:[#allocation14 + $0x9c4] sm:$0xf0]  ;;  %v8972_v24 = vld [vmem:[#allocation14 + $0x98c] sm:$0xf0]  ;;  %v10165_v7 = vld [vmem:[#allocation14 + $0x8cc] sm:$0xf] }
 0x2e6   :  { %5963 = vmatpush.bf16.msra.mxu2 %v7911_v56  ;;  %v7768_v56 = vld [vmem:[#allocation14 + $0x24] sm:$0xf0] }
 0x2e7   :  { %v7771_v2 = vor.u32 %v9885_v28, %v7768_v56  ;;  %v10032_v28 = vld [vmem:[#allocation14 + $0x4a4] sm:$0xf]  ;;  %v8356_v56 = vld [vmem:[#allocation14 + $0x4bc] sm:$0xf0] }
 0x2e8   :  { %5939 = vmatpush.bf16.msra.mxu0 %v9195_v46  ;;  %5900 = vmatpush.bf16.msrb.mxu1 %v8523_v48  ;;  %v5712_v43 = vpop.f32.mrf.mxu2  ;;  %v9502_v46 = vld [vmem:[#allocation14 + $0xd98] sm:$0xf]  ;;  %v10322_v48 = vld [vmem:[#allocation14 + $0xdb0] sm:$0xf0] }
 0x2e9   :  { %5978 = vmatpush.bf16.msra.mxu3 %v8079_v53  ;;  %v9056_v53 = vld [vmem:[#allocation14 + $0xa34] sm:$0xf0]  ;;  %v9503_v55 = vor.u32 %v10322_v48, %v9502_v46  ;;  %v10123_v43 = vld [vmem:[#allocation14 + $0x77c] sm:$0xf] }
 0x2ea   :  { %5964 = vmatpush.bf16.msra.mxu2 %v7883_v5  ;;  %v8863_v5 = vor.u32 %v10158_v63, %v8860_v0  ;;  %v10315_v63 = vld [vmem:[#allocation14 + $0xd78] sm:$0xf0]  ;;  %v10130_v0 = vld [vmem:[#allocation14 + $0x7b4] sm:$0xf]  ;;  %v8944_v46 = vld [vmem:[#allocation14 + $0x954] sm:$0xf0] }
 0x2ec   :  { %5940 = vmatpush.bf16.msra.mxu0 %v9167_v60  ;;  %5901 = vmatpush.bf16.msrb.mxu1 %v8495_v39  ;;  %v9474_v60 = vld [vmem:[#allocation14 + $0xd60] sm:$0xf]  ;;  %v8748_v39 = vld [vmem:[#allocation14 + $0x7cc] sm:$0xf0] }
 0x2ed   :  { %5979 = vmatpush.bf16.msra.mxu3 %v8051_v3  ;;  %v9475_v3 = vor.u32 %v10315_v63, %v9474_v60  ;;  %v10172_v63 = vld [vmem:[#allocation14 + $0x904] sm:$0xf] }
 0x2ee   :  { %5965 = vmatpush.bf16.msra.mxu2 %v7855_v18  ;;  %v9941_v18 = vld [vmem:[#allocation14 + $0x1cc] sm:$0xf] }
 0x2ef   :  { %v7995_v30 = vor.u32 %v9941_v18, %v7992_v9  ;;  %v8300_v18 = vld [vmem:[#allocation14 + $0x44c] sm:$0xf0]  ;;  %v9003_v9 = vor.u32 %v10193_v36, %v9000_v13 }
 0x2f0   :  { %5941 = vmatpush.bf16.msra.mxu0 %v9139_v11  ;;  %5902 = vmatpush.bf16.msrb.mxu1 %v8467_v15  ;;  %v8720_v11 = vld [vmem:[#allocation14 + $0x794] sm:$0xf0]  ;;  %v8331_v15 = vor.u32 %v10025_v62, %v8328_v35  ;;  %v9308_v36 = vld [vmem:[#allocation14 + $0xc2c] sm:$0xf0] }
 0x2f1   :  { %5980 = vmatpush.bf16.msra.mxu3 %v8023_v52  ;;  %v8723_v52 = vor.u32 %v10123_v43, %v8720_v11  ;;  %v8888_v43 = vld [vmem:[#allocation14 + $0x8e4] sm:$0xf0]  ;;  %v10270_v11 = vld [vmem:[#allocation14 + $0xc14] sm:$0xf] }
 0x2f2   :  { %5966 = vmatpush.bf16.msra.mxu2 %v7827_v29  ;;  %v9084_v29 = vld [vmem:[#allocation14 + $0xa6c] sm:$0xf0] }
 0x2f3   :  { %v9087_v45 = vor.u32 %v10214_v27, %v9084_v29  ;;  %v9419_v27 = vor.u32 %v10301_v20, %v9418_v19  ;;  %v10011_v29 = vld [vmem:[#allocation14 + $0x3fc] sm:$0xf]  ;;  %v9994_v19 = vld [vmem:[#allocation14 + $0x370] sm:$0xf0] }
 0x2f4   :  { %5942 = vmatpush.bf16.msra.mxu0 %v9111_v25  ;;  %5903 = vmatpush.bf16.msrb.mxu1 %v8439_v33  ;;  %v8303_v25 = vor.u32 %v10018_v12, %v8300_v18  ;;  %v8272_v33 = vld [vmem:[#allocation14 + $0x414] sm:$0xf0]  ;;  %v7914_v12 = vld [vmem:[#allocation14 + $0x128] sm:$0xf] }
 0x2f5   :  { %5981 = vmatpush.bf16.msra.mxu3 %v7995_v30  ;;  %v8975_v30 = vor.u32 %v10186_v22, %v8972_v24  ;;  %v8275_v49 = vor.u32 %v10011_v29, %v8272_v33  ;;  %v10263_v24 = vld [vmem:[#allocation14 + $0xbdc] sm:$0xf] }
 0x2f6   :  { %5967 = vmatpush.bf16.msra.mxu2 %v7799_v51  ;;  %v10207_v51 = vld [vmem:[#allocation14 + $0xa1c] sm:$0xf] }
 0x2f7   :  { %v9059_v17 = vor.u32 %v10207_v51, %v9056_v53  ;;  %5904 = vmatmul.bf16.vlgmr.msrb.gmra.mxu1 %v10824_v42  ;;  %5943 = vmatmul.bf16.vlgmr.msra.gmra.mxu0 %v10848_v10  ;;  %v9938_v51 = vld [vmem:[#allocation14 + $0x1b0] sm:$0xf0]  ;;  %v10095_v33 = vld [vmem:[#allocation14 + $0x69c] sm:$0xf] }
 0x2f8   :  { %5987 = vmatpush.bf16.msrb.mxu0 %v8415_v23  ;;  %5948 = vmatpush.bf16.msra.mxu1 %v9531_v14  ;;  %v10876_v26 = vpop.f32.mrf.mxu3  ;;  %v9390_v14 = vld [vmem:[#allocation14 + $0xcb8] sm:$0xf]  ;;  %v7971_v60 = vor.u32 %v9938_v51, %v7970_v50 }
 0x2f9   :  { %6026 = vmatpush.bf16.msrb.mxu3 %v9087_v45  ;;  %v10179_v45 = vld [vmem:[#allocation14 + $0x93c] sm:$0xf]  ;;  %v9391_v53 = vor.u32 %v10294_v38, %v9390_v14  ;;  %v9917_v14 = vld [vmem:[#allocation14 + $0x108] sm:$0xf0]  ;;  %v8166_v38 = vld [vmem:[#allocation14 + $0x320] sm:$0xf] }
 0x2fa   :  { %5968 = vmatpush.bf16.msra.mxu2 %v7771_v2  ;;  %5982 = vmatmul.bf16.vlgmr.msra.gmra.mxu3 %v10807_v37  ;;  %v8359_v2 = vor.u32 %v10032_v28, %v8356_v56  ;;  %v8947_v56 = vor.u32 %v10179_v45, %v8944_v46 }
 0x2fc   :  { %5988 = vmatpush.bf16.msrb.mxu0 %v8387_v54  ;;  %5949 = vmatpush.bf16.msra.mxu1 %v9503_v55  ;;  %v10004_v54 = vld [vmem:[#allocation14 + $0x3c4] sm:$0xf]  ;;  %v8244_v55 = vld [vmem:[#allocation14 + $0x3dc] sm:$0xf0] }
 0x2fd   :  { %5969 = vmatmul.bf16.vlgmr.msra.gmra.mxu2 %v10816_v44  ;;  %6027 = vmatpush.bf16.msrb.mxu3 %v9059_v17  ;;  %v10287_v17 = vld [vmem:[#allocation14 + $0xc98] sm:$0xf0]  ;;  %v8247_v1 = vor.u32 %v10004_v54, %v8244_v55  ;;  %v8580_v54 = vld [vmem:[#allocation14 + $0x67c] sm:$0xf0]  ;;  %v7858_v55 = vld [vmem:[#allocation14 + $0xb8] sm:$0xf] }
 0x2fe   :  { %6013 = vmatpush.bf16.msrb.mxu2 %v8863_v5  ;;  %v8751_v5 = vor.u32 %v10130_v0, %v8748_v39  ;;  %v8916_v0 = vld [vmem:[#allocation14 + $0x91c] sm:$0xf0] }
 0x2ff   :  { %v7942_v39 = vld [vmem:[#allocation14 + $0x160] sm:$0xf]  ;;  %v8919_v8 = vor.u32 %v10172_v63, %v8916_v0  ;;  %v10249_v63 = vld [vmem:[#allocation14 + $0xb6c] sm:$0xf]  ;;  %v9224_v0 = vld [vmem:[#allocation14 + $0xb84] sm:$0xf0] }
 0x300   :  { %5989 = vmatpush.bf16.msrb.mxu0 %v8359_v2  ;;  %v10874_v4 = vpop.f32.mrf.mxu2  ;;  %5950 = vmatpush.bf16.msra.mxu1 %v9475_v3  ;;  %v9334_v2 = vld [vmem:[#allocation14 + $0xc48] sm:$0xf]  ;;  %v10280_v3 = vld [vmem:[#allocation14 + $0xc60] sm:$0xf0]  ;;  %v5725_v62 = vpop.f32.mrf.mxu3  ;;  %v7943_v13 = vor.u32 %v9931_v61, %v7942_v39  ;;  %v10081_v61 = vld [vmem:[#allocation14 + $0x62c] sm:$0xf] }
 0x301   :  { %6028 = vmatpush.bf16.msrb.mxu3 %v9031_v32  ;;  %v8216_v32 = vld [vmem:[#allocation14 + $0x3a4] sm:$0xf0]  ;;  %v9335_v20 = vor.u32 %v10280_v3, %v9334_v2  ;;  %v7830_v3 = vld [vmem:[#allocation14 + $0x80] sm:$0xf]  ;;  %v9903_v62 = vld [vmem:[#allocation14 + $0x98] sm:$0xf0] }
 0x302   :  { %6014 = vmatpush.bf16.msrb.mxu2 %v8835_v31  ;;  %v10116_v31 = vld [vmem:[#allocation14 + $0x744] sm:$0xf]  ;;  %v8552_v2 = vld [vmem:[#allocation14 + $0x644] sm:$0xf0] }
 0x303   :  { %v8695_v23 = vor.u32 %v10116_v31, %v8692_v21  ;;  %v9311_v31 = vor.u32 %v10270_v11, %v9308_v36  ;;  %v8891_v21 = vor.u32 %v10165_v7, %v8888_v43  ;;  %v8555_v11 = vor.u32 %v10081_v61, %v8552_v2  ;;  %v10242_v36 = vld [vmem:[#allocation14 + $0xb34] sm:$0xf]  ;;  %v10053_v61 = vld [vmem:[#allocation14 + $0x54c] sm:$0xf]  ;;  %v8440_v2 = vld [vmem:[#allocation14 + $0x564] sm:$0xf0] }
 0x304   :  { %5990 = vmatpush.bf16.msrb.mxu0 %v8331_v15  ;;  %5951 = vmatpush.bf16.msra.mxu1 %v9447_v16  ;;  %v10102_v15 = vld [vmem:[#allocation14 + $0x6d4] sm:$0xf]  ;;  %v8636_v16 = vld [vmem:[#allocation14 + $0x6ec] sm:$0xf0] }
 0x305   :  { %6029 = vmatpush.bf16.msrb.mxu3 %v9003_v9  ;;  %v8194_v9 = vld [vmem:[#allocation14 + $0x358] sm:$0xf]  ;;  %v8639_v22 = vor.u32 %v10102_v15, %v8636_v16  ;;  %v7831_v15 = vor.u32 %v9903_v62, %v7830_v3  ;;  %v10221_v62 = vld [vmem:[#allocation14 + $0xa8c] sm:$0xf] }
 0x306   :  { %6015 = vmatpush.bf16.msrb.mxu2 %v8807_v34  ;;  %v8664_v34 = vld [vmem:[#allocation14 + $0x724] sm:$0xf0]  ;;  %v8195_v29 = vor.u32 %v9994_v19, %v8194_v9  ;;  %v9896_v9 = vld [vmem:[#allocation14 + $0x60] sm:$0xf0]  ;;  %v8082_v19 = vld [vmem:[#allocation14 + $0x278] sm:$0xf] }
 0x307   :  { %v8667_v28 = vor.u32 %v10109_v41, %v8664_v34  ;;  %v9987_v41 = vld [vmem:[#allocation14 + $0x338] sm:$0xf0] }
 0x308   :  { %5991 = vmatpush.bf16.msrb.mxu0 %v8303_v25  ;;  %v5764_v48 = vpop.f32.mrf.mxu2  ;;  %5952 = vmatpush.bf16.msra.mxu1 %v9419_v27  ;;  %v9280_v25 = vld [vmem:[#allocation14 + $0xbf4] sm:$0xf0]  ;;  %v10879_v34 = vpop.f32.mrf.mxu3  ;;  %v8167_v51 = vor.u32 %v9987_v41, %v8166_v38  ;;  %v9959_v38 = vld [vmem:[#allocation14 + $0x258] sm:$0xf0] }
 0x309   :  { %6030 = vmatpush.bf16.msrb.mxu3 %v8975_v30  ;;  %v7886_v30 = vld [vmem:[#allocation14 + $0xf0] sm:$0xf]  ;;  %v9283_v45 = vor.u32 %v10263_v24, %v9280_v25  ;;  %v10256_v48 = vld [vmem:[#allocation14 + $0xba4] sm:$0xf]  ;;  %v9168_v24 = vld [vmem:[#allocation14 + $0xb14] sm:$0xf0] }
 0x30a   :  { %6016 = vmatpush.bf16.msrb.mxu2 %v8779_v57  ;;  %v9362_v57 = vld [vmem:[#allocation14 + $0xc80] sm:$0xf]  ;;  %v7887_v50 = vor.u32 %v9917_v14, %v7886_v30  ;;  %v9889_v30 = vld [vmem:[#allocation14 + $0x28] sm:$0xf0] }
 0x30b   :  { %v9363_v35 = vor.u32 %v10287_v17, %v9362_v57  ;;  %v9980_v57 = vld [vmem:[#allocation14 + $0x300] sm:$0xf0]  ;;  %v8054_v14 = vld [vmem:[#allocation14 + $0x240] sm:$0xf] }
 0x30c   :  { %5992 = vmatpush.bf16.msrb.mxu0 %v8275_v49  ;;  %5953 = vmatpush.bf16.msra.mxu1 %v9391_v53  ;;  %v9252_v49 = vld [vmem:[#allocation14 + $0xbbc] sm:$0xf0]  ;;  %v10088_v53 = vld [vmem:[#allocation14 + $0x664] sm:$0xf] }
 0x30d   :  { %6031 = vmatpush.bf16.msrb.mxu3 %v8947_v56  ;;  %v8138_v56 = vld [vmem:[#allocation14 + $0x2e8] sm:$0xf]  ;;  %v9255_v17 = vor.u32 %v10256_v48, %v9252_v49  ;;  %v8866_v48 = vld [vmem:[#allocation14 + $0x898] sm:$0xf]  ;;  %v10162_v49 = vld [vmem:[#allocation14 + $0x8b0] sm:$0xf0] }
 0x30e   :  { %6017 = vmatpush.bf16.msrb.mxu2 %v8751_v5  ;;  %v9997_v5 = vld [vmem:[#allocation14 + $0x38c] sm:$0xf] }
 0x30f   :  { %v8219_v18 = vor.u32 %v9997_v5, %v8216_v32  ;;  %v9973_v5 = vld [vmem:[#allocation14 + $0x2c8] sm:$0xf0] }
 0x310   :  { %5993 = vmatpush.bf16.msrb.mxu0 %v8247_v1  ;;  %5954 = vmatpush.bf16.msra.mxu1 %v9363_v35  ;;  %v8139_v1 = vor.u32 %v9980_v57, %v8138_v56  ;;  %v8110_v35 = vld [vmem:[#allocation14 + $0x2b0] sm:$0xf]  ;;  %v5777_v43 = vpop.f32.mrf.mxu3  ;;  %v10060_v56 = vld [vmem:[#allocation14 + $0x584] sm:$0xf]  ;;  %v8468_v57 = vld [vmem:[#allocation14 + $0x59c] sm:$0xf0] }
 0x311   :  { %6032 = vmatpush.bf16.msrb.mxu3 %v8919_v8  ;;  %v9227_v8 = vor.u32 %v10249_v63, %v9224_v0  ;;  %v8111_v16 = vor.u32 %v9973_v5, %v8110_v35  ;;  %v9952_v63 = vld [vmem:[#allocation14 + $0x220] sm:$0xf0]  ;;  %v8838_v0 = vld [vmem:[#allocation14 + $0x860] sm:$0xf]  ;;  %v8471_v3 = vor.u32 %v10060_v56, %v8468_v57  ;;  %v9112_v35 = vld [vmem:[#allocation14 + $0xaa4] sm:$0xf0] }
 0x312   :  { %6018 = vmatpush.bf16.msrb.mxu2 %v8723_v52  ;;  %v9924_v52 = vld [vmem:[#allocation14 + $0x140] sm:$0xf0]  ;;  %v10884_v32 = vpop.f32.mrf.mxu0  ;;  %v7998_v5 = vld [vmem:[#allocation14 + $0x1d0] sm:$0xf]  ;;  %v9945_v43 = vld [vmem:[#allocation14 + $0x1e8] sm:$0xf0] }
 0x313   :  { %v7915_v27 = vor.u32 %v9924_v52, %v7914_v12  ;;  %v10074_v12 = vld [vmem:[#allocation14 + $0x5f4] sm:$0xf]  ;;  %v7802_v52 = vld [vmem:[#allocation14 + $0x48] sm:$0xf]  ;;  %v9476_v56 = vld [vmem:[#allocation14 + $0xd7c] sm:$0xf0] }
 0x314   :  { %5994 = vmatpush.bf16.msrb.mxu0 %v8219_v18  ;;  %5955 = vmatpush.bf16.msra.mxu1 %v9335_v20  ;;  %v8524_v18 = vld [vmem:[#allocation14 + $0x60c] sm:$0xf0]  ;;  %v9966_v20 = vld [vmem:[#allocation14 + $0x290] sm:$0xf0]  ;;  %v7803_v25 = vor.u32 %v9896_v9, %v7802_v52  ;;  %v9115_v52 = vor.u32 %v10221_v62, %v9112_v35  ;;  %v10148_v9 = vld [vmem:[#allocation14 + $0x840] sm:$0xf0] }
 0x315   :  { %6033 = vmatpush.bf16.msrb.mxu3 %v8891_v21  ;;  %v8527_v21 = vor.u32 %v10074_v12, %v8524_v18  ;;  %v8810_v12 = vld [vmem:[#allocation14 + $0x828] sm:$0xf]  ;;  %v8754_v57 = vld [vmem:[#allocation14 + $0x7b8] sm:$0xf] }
 0x316   :  { %6019 = vmatpush.bf16.msrb.mxu2 %v8695_v23  ;;  %v8608_v23 = vld [vmem:[#allocation14 + $0x6b4] sm:$0xf0] }
 0x317   :  { %v8611_v46 = vor.u32 %v10095_v33, %v8608_v23  ;;  %5956 = vmatmul.bf16.vlgmr.msra.gmra.mxu1 %v10855_v58  ;;  %5995 = vmatmul.bf16.vlgmr.msrb.gmra.mxu0 %v10828_v6  ;;  %v8496_v33 = vld [vmem:[#allocation14 + $0x5d4] sm:$0xf0]  ;;  %v7774_v23 = vld [vmem:[#allocation14 + $0x10] sm:$0xf] }
 0x318   :  { %6039 = vmatpush.bf16.msra.mxu0 %v9311_v31  ;;  %6000 = vmatpush.bf16.msrb.mxu1 %v8639_v22  ;;  %v10235_v22 = vld [vmem:[#allocation14 + $0xafc] sm:$0xf] }
 0x319   :  { %6078 = vmatpush.bf16.msra.mxu3 %v8195_v29  ;;  %v10067_v29 = vld [vmem:[#allocation14 + $0x5bc] sm:$0xf] }
 0x31a   :  { %6020 = vmatpush.bf16.msrb.mxu2 %v8667_v28  ;;  %v9910_v28 = vld [vmem:[#allocation14 + $0xd0] sm:$0xf0]  ;;  %6034 = vmatmul.bf16.vlgmr.msrb.gmra.mxu3 %v10842_v40  ;;  %v5738_v41 = vpop.f32.mrf.mxu0 }
 0x31b   :  { %v7859_v39 = vor.u32 %v9910_v28, %v7858_v55  ;;  %v7775_v55 = vor.u32 %v9889_v30, %v7774_v23  ;;  %v8055_v28 = vor.u32 %v9959_v38, %v8054_v14  ;;  %v10319_v30 = vld [vmem:[#allocation14 + $0xd9c] sm:$0xf]  ;;  %v9504_v14 = vld [vmem:[#allocation14 + $0xdb4] sm:$0xf0]  ;;  %v8782_v38 = vld [vmem:[#allocation14 + $0x7f0] sm:$0xf] }
 0x31c   :  { %6040 = vmatpush.bf16.msra.mxu0 %v9283_v45  ;;  %6001 = vmatpush.bf16.msrb.mxu1 %v8611_v46  ;;  %v9171_v46 = vor.u32 %v10235_v22, %v9168_v24  ;;  %v7999_v24 = vor.u32 %v9945_v43, %v7998_v5  ;;  %v10141_v41 = vld [vmem:[#allocation14 + $0x808] sm:$0xf0]  ;;  %v8726_v43 = vld [vmem:[#allocation14 + $0x780] sm:$0xf] }
 0x31d   :  { %6021 = vmatmul.bf16.vlgmr.msrb.gmra.mxu2 %v10832_v59  ;;  %6079 = vmatpush.bf16.msra.mxu3 %v8167_v51  ;;  %v8499_v51 = vor.u32 %v10067_v29, %v8496_v33  ;;  %v10043_v29 = vld [vmem:[#allocation14 + $0x4f8] sm:$0xf0]  ;;  %v8811_v33 = vor.u32 %v10148_v9, %v8810_v12  ;;  %v10305_v5 = vld [vmem:[#allocation14 + $0xd2c] sm:$0xf] }
 0x31e   :  { %6065 = vmatpush.bf16.msra.mxu2 %v7971_v60  ;;  %v8583_v60 = vor.u32 %v10088_v53, %v8580_v54  ;;  %v10228_v53 = vld [vmem:[#allocation14 + $0xac4] sm:$0xf]  ;;  %v9140_v54 = vld [vmem:[#allocation14 + $0xadc] sm:$0xf0] }
 0x320   :  { %6041 = vmatpush.bf16.msra.mxu0 %v9255_v17  ;;  %v10886_v7 = vpop.f32.mrf.mxu2  ;;  %6002 = vmatpush.bf16.msrb.mxu1 %v8583_v60  ;;  %v8867_v17 = vor.u32 %v10162_v49, %v8866_v48  ;;  %v8026_v60 = vld [vmem:[#allocation14 + $0x208] sm:$0xf]  ;;  %v9507_v49 = vor.u32 %v10319_v30, %v9504_v14 }
 0x321   :  { %6080 = vmatpush.bf16.msra.mxu3 %v8139_v1  ;;  %v10155_v1 = vld [vmem:[#allocation14 + $0x878] sm:$0xf0] }
 0x322   :  { %6066 = vmatpush.bf16.msra.mxu2 %v7943_v13  ;;  %v9196_v13 = vld [vmem:[#allocation14 + $0xb4c] sm:$0xf0]  ;;  %v10890_v18 = vpop.f32.mrf.mxu0 }
 0x323   :  { %v9199_v31 = vor.u32 %v10242_v36, %v9196_v13  ;;  %v10050_v36 = vld [vmem:[#allocation14 + $0x530] sm:$0xf0]  ;;  %v8839_v13 = vor.u32 %v10155_v1, %v8838_v0  ;;  %v10204_v0 = vld [vmem:[#allocation14 + $0xa00] sm:$0xf0] }
 0x324   :  { %6042 = vmatpush.bf16.msra.mxu0 %v9227_v8  ;;  %6003 = vmatpush.bf16.msrb.mxu1 %v8555_v11  ;;  %v8027_v8 = vor.u32 %v9952_v63, %v8026_v60  ;;  %v8418_v11 = vld [vmem:[#allocation14 + $0x518] sm:$0xf]  ;;  %v10134_v60 = vld [vmem:[#allocation14 + $0x7d0] sm:$0xf0]  ;;  %v9034_v63 = vld [vmem:[#allocation14 + $0x9e8] sm:$0xf] }
 0x325   :  { %6081 = vmatpush.bf16.msra.mxu3 %v8111_v16  ;;  %v9532_v16 = vld [vmem:[#allocation14 + $0xdec] sm:$0xf0]  ;;  %v8419_v22 = vor.u32 %v10050_v36, %v8418_v11  ;;  %v8755_v62 = vor.u32 %v10134_v60, %v8754_v57  ;;  %v9035_v35 = vor.u32 %v10204_v0, %v9034_v63  ;;  %v10127_v11 = vld [vmem:[#allocation14 + $0x798] sm:$0xf0] }
 0x326   :  { %6067 = vmatpush.bf16.msra.mxu2 %v7915_v27  ;;  %v8083_v27 = vor.u32 %v9966_v20, %v8082_v19  ;;  %v9090_v19 = vld [vmem:[#allocation14 + $0xa58] sm:$0xf]  ;;  %v10218_v20 = vld [vmem:[#allocation14 + $0xa70] sm:$0xf0]  ;;  %v9006_v36 = vld [vmem:[#allocation14 + $0x9b0] sm:$0xf] }
 0x327   :  { %v9091_v23 = vor.u32 %v10218_v20, %v9090_v19  ;;  %v8306_v19 = vld [vmem:[#allocation14 + $0x438] sm:$0xf]  ;;  %v8727_v20 = vor.u32 %v10127_v11, %v8726_v43  ;;  %v9935_v57 = vld [vmem:[#allocation14 + $0x19c] sm:$0xf]  ;;  %v8922_v43 = vld [vmem:[#allocation14 + $0x908] sm:$0xf] }
 0x328   :  { %6043 = vmatpush.bf16.msra.mxu0 %v9199_v31  ;;  %v5816_v45 = vpop.f32.mrf.mxu2  ;;  %6004 = vmatpush.bf16.msrb.mxu1 %v8527_v21  ;;  %v8443_v21 = vor.u32 %v10053_v61, %v8440_v2  ;;  %v8334_v61 = vld [vmem:[#allocation14 + $0x470] sm:$0xf]  ;;  %v10029_v2 = vld [vmem:[#allocation14 + $0x488] sm:$0xf0] }
 0x329   :  { %6082 = vmatpush.bf16.msra.mxu3 %v8083_v27  ;;  %v8390_v27 = vld [vmem:[#allocation14 + $0x4e0] sm:$0xf]  ;;  %v8335_v12 = vor.u32 %v10029_v2, %v8334_v61  ;;  %v10008_v61 = vld [vmem:[#allocation14 + $0x3e0] sm:$0xf0] }
 0x32a   :  { %6068 = vmatpush.bf16.msra.mxu2 %v7887_v50  ;;  %v10888_v50 = vpop.f32.mrf.mxu3  ;;  %v9062_v45 = vld [vmem:[#allocation14 + $0xa20] sm:$0xf]  ;;  %v8391_v48 = vor.u32 %v10043_v29, %v8390_v27  ;;  %v10120_v27 = vld [vmem:[#allocation14 + $0x760] sm:$0xf0]  ;;  %v10190_v29 = vld [vmem:[#allocation14 + $0x990] sm:$0xf0] }
 0x32c   :  { %6044 = vmatpush.bf16.msra.mxu0 %v9171_v46  ;;  %6005 = vmatpush.bf16.msrb.mxu1 %v8499_v51  ;;  %v10211_v46 = vld [vmem:[#allocation14 + $0xa38] sm:$0xf0]  ;;  %v8362_v51 = vld [vmem:[#allocation14 + $0x4a8] sm:$0xf] }
 0x32d   :  { %6083 = vmatpush.bf16.msra.mxu3 %v8055_v28  ;;  %v10312_v28 = vld [vmem:[#allocation14 + $0xd64] sm:$0xf] }
 0x32e   :  { %6069 = vmatpush.bf16.msra.mxu2 %v7859_v39  ;;  %v9143_v39 = vor.u32 %v10228_v53, %v9140_v54  ;;  %v10036_v53 = vld [vmem:[#allocation14 + $0x4c0] sm:$0xf0]  ;;  %v8783_v54 = vor.u32 %v10141_v41, %v8782_v38  ;;  %v9479_v1 = vor.u32 %v10312_v28, %v9476_v56  ;;  %v8278_v38 = vld [vmem:[#allocation14 + $0x400] sm:$0xf]  ;;  %v10015_v41 = vld [vmem:[#allocation14 + $0x418] sm:$0xf0] }
 0x32f   :  { %v8279_v56 = vor.u32 %v10015_v41, %v8278_v38 }
 0x330   :  { %6045 = vmatpush.bf16.msra.mxu0 %v9143_v39  ;;  %6006 = vmatpush.bf16.msrb.mxu1 %v8471_v3  ;;  %v8363_v39 = vor.u32 %v10036_v53, %v8362_v51  ;;  %v5724_v3 = vadd.f32 %v10876_v26, %v10868_v47  ;;  %v10022_v47 = vld [vmem:[#allocation14 + $0x450] sm:$0xf0]  ;;  %v8670_v51 = vld [vmem:[#allocation14 + $0x710] sm:$0xf]  ;;  %v10113_v53 = vld [vmem:[#allocation14 + $0x728] sm:$0xf0] }
 0x331   :  { %6084 = vmatpush.bf16.msra.mxu3 %v8027_v8  ;;  %v9448_v8 = vld [vmem:[#allocation14 + $0xd44] sm:$0xf0] }
 0x332   :  { %6070 = vmatpush.bf16.msra.mxu2 %v7831_v15  ;;  %v10326_v15 = vld [vmem:[#allocation14 + $0xdd4] sm:$0xf]  ;;  %v5829_v31 = vpop.f32.mrf.mxu3  ;;  %v9451_v9 = vor.u32 %v10305_v5, %v9448_v8  ;;  %v10284_v5 = vld [vmem:[#allocation14 + $0xc84] sm:$0xf]  ;;  %v9364_v8 = vld [vmem:[#allocation14 + $0xc9c] sm:$0xf0] }
 0x334   :  { %6046 = vmatpush.bf16.msra.mxu0 %v9115_v52  ;;  %6007 = vmatpush.bf16.msrb.mxu1 %v8443_v21  ;;  %v5749_v52 = vpop.f32.mrf.mxu1  ;;  %v10298_v21 = vld [vmem:[#allocation14 + $0xcf4] sm:$0xf] }
 0x335   :  { %6085 = vmatpush.bf16.msra.mxu3 %v7999_v24  ;;  %v8698_v24 = vld [vmem:[#allocation14 + $0x748] sm:$0xf] }
 0x336   :  { %6071 = vmatpush.bf16.msra.mxu2 %v7803_v25  ;;  %v9535_v25 = vor.u32 %v10326_v15, %v9532_v16  ;;  %v5737_v15 = vadd.f32 %v10884_v32, %v5724_v3  ;;  %v8978_v32 = vld [vmem:[#allocation14 + $0x978] sm:$0xf] }
 0x337   :  { %6008 = vmatmul.bf16.vlgmr.msrb.gmra.mxu1 %v10824_v42  ;;  %6047 = vmatmul.bf16.vlgmr.msra.gmra.mxu0 %v10848_v10 }
 0x338   :  { %6091 = vmatpush.bf16.msrb.mxu0 %v8419_v22  ;;  %6052 = vmatpush.bf16.msra.mxu1 %v9535_v25  ;;  %v5750_v26 = vadd.f32 %v5749_v52, %v5737_v15  ;;  %v9420_v22 = vld [vmem:[#allocation14 + $0xd0c] sm:$0xf0]  ;;  %v10176_v15 = vld [vmem:[#allocation14 + $0x920] sm:$0xf0]  ;;  %v7944_v52 = vld [vmem:[#allocation14 + $0x17c] sm:$0xf0] }
 0x339   :  { %6130 = vmatpush.bf16.msrb.mxu3 %v9091_v23  ;;  %v10901_v23 = vld [vmem:[#allocation16] sm:$0xff]  ;;  %v9423_v14 = vor.u32 %v10298_v21, %v9420_v22  ;;  %v8923_v22 = vor.u32 %v10176_v15, %v8922_v43  ;;  %v8586_v43 = vld [vmem:[#allocation14 + $0x668] sm:$0xf] }
 0x33a   :  { %6072 = vmatpush.bf16.msra.mxu2 %v7775_v55  ;;  %v9063_v55 = vor.u32 %v10211_v46, %v9062_v45  ;;  %6086 = vmatmul.bf16.vlgmr.msra.gmra.mxu3 %v10807_v37  ;;  %10350 = vtanh.f32 %v5750_v26  ;;  %v3333_v30 = vperm.slane %v10901_v23, 2  ;;  %v8699_v45 = vor.u32 %v10120_v27, %v8698_v24  ;;  %v5879_v3 = vpop.f32.mrf.mxu3  ;;  %v8222_v26 = vld [vmem:[#allocation14 + $0x390] sm:$0xf]  ;;  %v10169_v24 = vld [vmem:[#allocation14 + $0x8e8] sm:$0xf0] }
 0x33b   :  { %v8979_v46 = vor.u32 %v10190_v29, %v8978_v32  ;;  %v3332_v60 = vperm.slane %v10901_v23, 1  ;;  %v9314_v27 = vld [vmem:[#allocation14 + $0xc18] sm:$0xf]  ;;  %v10274_v32 = vld [vmem:[#allocation14 + $0xc30] sm:$0xf0] }
 0x33c   :  { %6092 = vmatpush.bf16.msrb.mxu0 %v8391_v48  ;;  %6053 = vmatpush.bf16.msra.mxu1 %v9507_v49  ;;  %v10291_v48 = vld [vmem:[#allocation14 + $0xcbc] sm:$0xf]  ;;  %v9392_v49 = vld [vmem:[#allocation14 + $0xcd4] sm:$0xf0]  ;;  %v5751_v0 = vpop.f32.mrf.mxu1 }
 0x33d   :  { %6073 = vmatmul.bf16.vlgmr.msra.gmra.mxu2 %v10816_v44  ;;  %6131 = vmatpush.bf16.msrb.mxu3 %v9063_v55  ;;  %v10183_v55 = vld [vmem:[#allocation14 + $0x958] sm:$0xf0]  ;;  %v5763_v21 = vadd.f32 %v10874_v4, %v3332_v60  ;;  %v8614_v60 = vld [vmem:[#allocation14 + $0x6a0] sm:$0xf]  ;;  %v9914_v0 = vld [vmem:[#allocation14 + $0xf4] sm:$0xf] }
 0x33e   :  { %6117 = vmatpush.bf16.msrb.mxu2 %v8867_v17  ;;  %v5790_v17 = vpop.f32.mrf.mxu0 }
 0x33f   :  { %v7972_v17 = vld [vmem:[#allocation14 + $0x1b4] sm:$0xf0]  ;;  %v5776_v38 = vadd.f32 %v10879_v34, %v5763_v21  ;;  %v8558_v21 = vld [vmem:[#allocation14 + $0x630] sm:$0xf] }
 0x340   :  { %6093 = vmatpush.bf16.msrb.mxu0 %v8363_v39  ;;  %v5866_v16 = vpop.f32.mrf.mxu2  ;;  %6054 = vmatpush.bf16.msra.mxu1 %v9479_v1  ;;  %v9395_v39 = vor.u32 %v10291_v48, %v9392_v49  ;;  %v8250_v1 = vld [vmem:[#allocation14 + $0x3c8] sm:$0xf]  ;;  %v10351_v2 = vpop.eup %10350  ;;  %v8196_v48 = vld [vmem:[#allocation14 + $0x374] sm:$0xf0] }
 0x341   :  { %6132 = vmatpush.bf16.msrb.mxu3 %v9035_v35  ;;  %v5867_v63 = vadd.f32 %v5866_v16, %v3333_v30  ;;  %6384 = vst [vmem:[#allocation17] sm:$0xff] %v10351_v2  ;;  %v9928_v16 = vld [vmem:[#allocation14 + $0x164] sm:$0xf]  ;;  %v10106_v30 = vld [vmem:[#allocation14 + $0x6f0] sm:$0xf0] }
 0x342   :  { %6118 = vmatpush.bf16.msrb.mxu2 %v8839_v13  ;;  %v10197_v13 = vld [vmem:[#allocation14 + $0x9c8] sm:$0xf0]  ;;  %v7947_v29 = vor.u32 %v9928_v16, %v7944_v52  ;;  %v8168_v2 = vld [vmem:[#allocation14 + $0x33c] sm:$0xf0]  ;;  %v7860_v16 = vld [vmem:[#allocation14 + $0xd4] sm:$0xf0] }
 0x343   :  { %v9007_v31 = vor.u32 %v10197_v13, %v9006_v36  ;;  %v10905_v11 = vadd.f32 %v5879_v3, %v5867_v63  ;;  %v7975_v13 = vor.u32 %v9935_v57, %v7972_v17  ;;  %v10267_v57 = vld [vmem:[#allocation14 + $0xbf8] sm:$0xf0]  ;;  %v8140_v52 = vld [vmem:[#allocation14 + $0x304] sm:$0xf0] }
 0x344   :  { %6094 = vmatpush.bf16.msrb.mxu0 %v8335_v12  ;;  %6055 = vmatpush.bf16.msra.mxu1 %v9451_v9  ;;  %v8251_v12 = vor.u32 %v10008_v61, %v8250_v1  ;;  %v10277_v9 = vld [vmem:[#allocation14 + $0xc4c] sm:$0xf]  ;;  %v5801_v4 = vpop.f32.mrf.mxu1  ;;  %v10099_v63 = vld [vmem:[#allocation14 + $0x6b8] sm:$0xf0]  ;;  %v7888_v1 = vld [vmem:[#allocation14 + $0x10c] sm:$0xf0] }
 0x345   :  { %6133 = vmatpush.bf16.msrb.mxu3 %v9007_v31  ;;  %v8894_v31 = vld [vmem:[#allocation14 + $0x8d0] sm:$0xf]  ;;  %v9984_v61 = vld [vmem:[#allocation14 + $0x324] sm:$0xf]  ;;  %v8615_v3 = vor.u32 %v10099_v63, %v8614_v60  ;;  %v9174_v60 = vld [vmem:[#allocation14 + $0xb00] sm:$0xf] }
 0x346   :  { %6119 = vmatpush.bf16.msrb.mxu2 %v8811_v33  ;;  %v10899_v25 = vpop.f32.mrf.mxu0  ;;  %v8307_v33 = vor.u32 %v10022_v47, %v8306_v19  ;;  %v9336_v19 = vld [vmem:[#allocation14 + $0xc64] sm:$0xf0]  ;;  %v9367_v47 = vor.u32 %v10284_v5, %v9364_v8  ;;  %v7891_v5 = vor.u32 %v9914_v0, %v7888_v1  ;;  %v8171_v8 = vor.u32 %v9984_v61, %v8168_v2  ;;  %v10239_v63 = vld [vmem:[#allocation14 + $0xb18] sm:$0xf0]  ;;  %v8502_v1 = vld [vmem:[#allocation14 + $0x5c0] sm:$0xf] }
 0x347   :  { %v9339_v49 = vor.u32 %v10277_v9, %v9336_v19  ;;  %v10071_v61 = vld [vmem:[#allocation14 + $0x5d8] sm:$0xf0]  ;;  %v7776_v2 = vld [vmem:[#allocation14 + $0x2c] sm:$0xf0] }
 0x348   :  { %6095 = vmatpush.bf16.msrb.mxu0 %v8307_v33  ;;  %v5868_v28 = vpop.f32.mrf.mxu2  ;;  %6056 = vmatpush.bf16.msra.mxu1 %v9423_v14  ;;  %v8642_v33 = vld [vmem:[#allocation14 + $0x6d8] sm:$0xf]  ;;  %v9921_v14 = vld [vmem:[#allocation14 + $0x12c] sm:$0xf] }
 0x349   :  { %6134 = vmatpush.bf16.msrb.mxu3 %v8979_v46  ;;  %v9991_v46 = vld [vmem:[#allocation14 + $0x35c] sm:$0xf]  ;;  %v8643_v28 = vor.u32 %v10106_v30, %v8642_v33  ;;  %v8112_v33 = vld [vmem:[#allocation14 + $0x2cc] sm:$0xf0] }
 0x34a   :  { %6120 = vmatpush.bf16.msrb.mxu2 %v8783_v54  ;;  %v8950_v54 = vld [vmem:[#allocation14 + $0x940] sm:$0xf]  ;;  %v8199_v17 = vor.u32 %v9991_v46, %v8196_v48 }
 0x34b   :  { %v8951_v35 = vor.u32 %v10183_v55, %v8950_v54  ;;  %v5881_v54 = vpop.f32.mrf.mxu3  ;;  %v8895_v55 = vor.u32 %v10169_v24, %v8894_v31  ;;  %v9900_v24 = vld [vmem:[#allocation14 + $0x84] sm:$0xf] }
 0x34c   :  { %6096 = vmatpush.bf16.msrb.mxu0 %v8279_v56  ;;  %6057 = vmatpush.bf16.msra.mxu1 %v9395_v39  ;;  %v9286_v56 = vld [vmem:[#allocation14 + $0xbe0] sm:$0xf]  ;;  %v5803_v9 = vpop.f32.mrf.mxu1  ;;  %v9963_v54 = vld [vmem:[#allocation14 + $0x27c] sm:$0xf] }
 0x34d   :  { %6135 = vmatpush.bf16.msrb.mxu3 %v8951_v35  ;;  %v10260_v35 = vld [vmem:[#allocation14 + $0xbc0] sm:$0xf0]  ;;  %v9949_v9 = vld [vmem:[#allocation14 + $0x20c] sm:$0xf] }
 0x34e   :  { %6121 = vmatpush.bf16.msrb.mxu2 %v8755_v62  ;;  %v8671_v62 = vor.u32 %v10113_v53, %v8670_v51  ;;  %v5842_v36 = vpop.f32.mrf.mxu0  ;;  %v9315_v51 = vor.u32 %v10274_v32, %v9314_v27  ;;  %v5789_v53 = vadd.f32 %v10890_v18, %v5776_v38  ;;  %v9287_v18 = vor.u32 %v10267_v57, %v9286_v56  ;;  %v7832_v32 = vld [vmem:[#allocation14 + $0x9c] sm:$0xf0]  ;;  %v9202_v38 = vld [vmem:[#allocation14 + $0xb38] sm:$0xf] }
 0x34f   :  { %v10092_v36 = vld [vmem:[#allocation14 + $0x680] sm:$0xf0]  ;;  %v7835_v46 = vor.u32 %v9900_v24, %v7832_v32  ;;  %v8446_v24 = vld [vmem:[#allocation14 + $0x550] sm:$0xf] }
 0x350   :  { %6097 = vmatpush.bf16.msrb.mxu0 %v8251_v12  ;;  %6058 = vmatpush.bf16.msra.mxu1 %v9367_v47  ;;  %v5802_v39 = vadd.f32 %v5801_v4, %v5789_v53  ;;  %v9977_v12 = vld [vmem:[#allocation14 + $0x2ec] sm:$0xf]  ;;  %v8587_v47 = vor.u32 %v10092_v36, %v8586_v43  ;;  %v8530_v4 = vld [vmem:[#allocation14 + $0x5f8] sm:$0xf]  ;;  %v7804_v53 = vld [vmem:[#allocation14 + $0x64] sm:$0xf0] }
 0x351   :  { %6136 = vmatpush.bf16.msrb.mxu3 %v8923_v22  ;;  %v10085_v22 = vld [vmem:[#allocation14 + $0x648] sm:$0xf0]  ;;  %v9146_v43 = vld [vmem:[#allocation14 + $0xac8] sm:$0xf]  ;;  %v10232_v36 = vld [vmem:[#allocation14 + $0xae0] sm:$0xf0] }
 0x352   :  { %6122 = vmatpush.bf16.msrb.mxu2 %v8727_v20  ;;  %v10001_v20 = vld [vmem:[#allocation14 + $0x3a8] sm:$0xf0]  ;;  %v5815_v15 = vadd.f32 %v10886_v7, %v5802_v39  ;;  %v8143_v7 = vor.u32 %v9977_v12, %v8140_v52  ;;  %v8474_v12 = vld [vmem:[#allocation14 + $0x588] sm:$0xf]  ;;  %v10064_v52 = vld [vmem:[#allocation14 + $0x5a0] sm:$0xf0] }
 0x353   :  { %v8223_v41 = vor.u32 %v10001_v20, %v8222_v26  ;;  %v9230_v26 = vld [vmem:[#allocation14 + $0xb70] sm:$0xf]  ;;  %v10253_v20 = vld [vmem:[#allocation14 + $0xb88] sm:$0xf0] }
 0x354   :  { %6059 = vmatpush.bf16.msra.mxu1 %v9339_v49  ;;  %v5828_v27 = vadd.f32 %v10888_v50, %v5815_v15  ;;  %v9231_v30 = vor.u32 %v10253_v20, %v9230_v26  ;;  %v10078_v49 = vld [vmem:[#allocation14 + $0x610] sm:$0xf0]  ;;  %v5853_v56 = vpop.f32.mrf.mxu1  ;;  %v8028_v26 = vld [vmem:[#allocation14 + $0x224] sm:$0xf0]  ;;  %v10152_v20 = vld [vmem:[#allocation14 + $0x864] sm:$0xf] }
 0x355   :  { %6098 = vmatpush.bf16.msrb.mxu0 %v8223_v41  ;;  %6137 = vmatpush.bf16.msrb.mxu3 %v8895_v55  ;;  %v10246_v41 = vld [vmem:[#allocation14 + $0xb50] sm:$0xf0]  ;;  %v8084_v55 = vld [vmem:[#allocation14 + $0x294] sm:$0xf0]  ;;  %v9118_v32 = vld [vmem:[#allocation14 + $0xa90] sm:$0xf] }
 0x356   :  { %6123 = vmatpush.bf16.msrb.mxu2 %v8699_v45  ;;  %v7916_v45 = vld [vmem:[#allocation14 + $0x144] sm:$0xf0]  ;;  %v5841_v50 = vadd.f32 %v10899_v25, %v5828_v27  ;;  %v9203_v57 = vor.u32 %v10246_v41, %v9202_v38  ;;  %v8087_v39 = vor.u32 %v9963_v54, %v8084_v55  ;;  %v9886_v25 = vld [vmem:[#allocation14 + $0x14] sm:$0xf]  ;;  %v10057_v27 = vld [vmem:[#allocation14 + $0x568] sm:$0xf0]  ;;  %v8031_v41 = vor.u32 %v9949_v9, %v8028_v26 }
 0x357   :  { %v7919_v34 = vor.u32 %v9921_v14, %v7916_v45  ;;  %6060 = vmatmul.bf16.vlgmr.msra.gmra.mxu1 %v10855_v58  ;;  %v8559_v14 = vor.u32 %v10085_v22, %v8558_v21  ;;  %v7779_v15 = vor.u32 %v9886_v25, %v7776_v2  ;;  %v9147_v22 = vor.u32 %v10232_v36, %v9146_v43  ;;  %v8000_v38 = vld [vmem:[#allocation14 + $0x1ec] sm:$0xf0]  ;;  %v8812_v54 = vld [vmem:[#allocation14 + $0x844] sm:$0xf0]  ;;  %v10215_v55 = vld [vmem:[#allocation14 + $0xa5c] sm:$0xf] }
 0x358   :  { %6104 = vmatpush.bf16.msrb.mxu1 %v8643_v28  ;;  %6099 = vmatmul.bf16.vlgmr.msrb.gmra.mxu0 %v10828_v6  ;;  %v10919_v28 = vpop.f32.mrf.mxu0  ;;  %v9510_v25 = vld [vmem:[#allocation14 + $0xda0] sm:$0xf]  ;;  %v10323_v2 = vld [vmem:[#allocation14 + $0xdb8] sm:$0xf0]  ;;  %v10033_v43 = vld [vmem:[#allocation14 + $0x4ac] sm:$0xf] }
 0x359   :  { %6143 = vmatpush.bf16.msra.mxu0 %v9315_v51  ;;  %6182 = vmatpush.bf16.msra.mxu3 %v8199_v17  ;;  %v9893_v51 = vld [vmem:[#allocation14 + $0x4c] sm:$0xf]  ;;  %v8531_v17 = vor.u32 %v10078_v49, %v8530_v4  ;;  %v9538_v49 = vld [vmem:[#allocation14 + $0xdd8] sm:$0xf]  ;;  %v8364_v36 = vld [vmem:[#allocation14 + $0x4c4] sm:$0xf0] }
 0x35a   :  { %6124 = vmatpush.bf16.msrb.mxu2 %v8671_v62  ;;  %v9258_v62 = vld [vmem:[#allocation14 + $0xba8] sm:$0xf]  ;;  %6138 = vmatmul.bf16.vlgmr.msrb.gmra.mxu3 %v10842_v40  ;;  %v7807_v0 = vor.u32 %v9893_v51, %v7804_v53  ;;  %v10330_v51 = vld [vmem:[#allocation14 + $0xdf0] sm:$0xf0]  ;;  %v8756_v9 = vld [vmem:[#allocation14 + $0x7d4] sm:$0xf0] }
 0x35b   :  { %v9259_v19 = vor.u32 %v10260_v35, %v9258_v62  ;;  %v9175_v62 = vor.u32 %v10239_v63, %v9174_v60  ;;  %v10159_v35 = vld [vmem:[#allocation14 + $0x89c] sm:$0xf]  ;;  %v9539_v60 = vor.u32 %v10330_v51, %v9538_v49  ;;  %v10040_v63 = vld [vmem:[#allocation14 + $0x4e4] sm:$0xf]  ;;  %v9036_v26 = vld [vmem:[#allocation14 + $0xa04] sm:$0xf0] }
 0x35c   :  { %6105 = vmatpush.bf16.msrb.mxu1 %v8615_v3  ;;  %v8056_v3 = vld [vmem:[#allocation14 + $0x25c] sm:$0xf0]  ;;  %v5855_v21 = vpop.f32.mrf.mxu1  ;;  %v9426_v51 = vld [vmem:[#allocation14 + $0xcf8] sm:$0xf] }
 0x35d   :  { %6125 = vmatmul.bf16.vlgmr.msrb.gmra.mxu2 %v10832_v59  ;;  %6144 = vmatpush.bf16.msra.mxu0 %v9287_v18  ;;  %v9956_v18 = vld [vmem:[#allocation14 + $0x244] sm:$0xf]  ;;  %v8336_v21 = vld [vmem:[#allocation14 + $0x48c] sm:$0xf0] }
 0x35e   :  { %6169 = vmatpush.bf16.msra.mxu2 %v7975_v13  ;;  %v9907_v13 = vld [vmem:[#allocation14 + $0xbc] sm:$0xf]  ;;  %6183 = vmatpush.bf16.msra.mxu3 %v8171_v8  ;;  %v8503_v8 = vor.u32 %v10071_v61, %v8502_v1 }
 0x35f   :  { %v7863_v31 = vor.u32 %v9907_v13, %v7860_v16  ;;  %v8059_v16 = vor.u32 %v9956_v18, %v8056_v3  ;;  %v10138_v18 = vld [vmem:[#allocation14 + $0x7f4] sm:$0xf]  ;;  %v8784_v3 = vld [vmem:[#allocation14 + $0x80c] sm:$0xf0] }
 0x360   :  { %6106 = vmatpush.bf16.msrb.mxu1 %v8587_v47  ;;  %v10916_v45 = vpop.f32.mrf.mxu2 }
 0x361   :  { %6145 = vmatpush.bf16.msra.mxu0 %v9259_v19  ;;  %v10921_v19 = vpop.f32.mrf.mxu3 }
 0x362   :  { %6170 = vmatpush.bf16.msra.mxu2 %v7947_v29  ;;  %v9970_v29 = vld [vmem:[#allocation14 + $0x2b4] sm:$0xf]  ;;  %6184 = vmatpush.bf16.msra.mxu3 %v8143_v7  ;;  %v5894_v7 = vpop.f32.mrf.mxu0 }
 0x363   :  { %v8115_v48 = vor.u32 %v9970_v29, %v8112_v33  ;;  %v8475_v33 = vor.u32 %v10064_v52, %v8474_v12  ;;  %v10316_v12 = vld [vmem:[#allocation14 + $0xd80] sm:$0xf0]  ;;  %v10131_v52 = vld [vmem:[#allocation14 + $0x7bc] sm:$0xf]  ;;  %v10026_v7 = vld [vmem:[#allocation14 + $0x474] sm:$0xf] }
 0x364   :  { %6107 = vmatpush.bf16.msrb.mxu1 %v8559_v14  ;;  %v9942_v14 = vld [vmem:[#allocation14 + $0x1d4] sm:$0xf] }
 0x365   :  { %6146 = vmatpush.bf16.msra.mxu0 %v9231_v30  ;;  %v10225_v30 = vld [vmem:[#allocation14 + $0xaa8] sm:$0xf0] }
 0x366   :  { %6171 = vmatpush.bf16.msra.mxu2 %v7919_v34  ;;  %v5854_v34 = vadd.f32 %v5853_v56, %v5841_v50  ;;  %6185 = vmatpush.bf16.msra.mxu3 %v8115_v48  ;;  %v8420_v48 = vld [vmem:[#allocation14 + $0x534] sm:$0xf0]  ;;  %v10145_v50 = vld [vmem:[#allocation14 + $0x82c] sm:$0xf]  ;;  %v9119_v53 = vor.u32 %v10225_v30, %v9118_v32  ;;  %v10194_v30 = vld [vmem:[#allocation14 + $0x9b4] sm:$0xf] }
 0x367   :  { %v9092_v56 = vld [vmem:[#allocation14 + $0xa74] sm:$0xf0]  ;;  %v8815_v1 = vor.u32 %v10145_v50, %v8812_v54  ;;  %v10309_v32 = vld [vmem:[#allocation14 + $0xd48] sm:$0xf0]  ;;  %v10302_v50 = vld [vmem:[#allocation14 + $0xd10] sm:$0xf0] }
 0x368   :  { %10352 = vtanh.f32 %v5854_v34  ;;  %6108 = vmatpush.bf16.msrb.mxu1 %v8531_v17  ;;  %v5920_v13 = vpop.f32.mrf.mxu2  ;;  %v8003_v17 = vor.u32 %v9942_v14, %v8000_v38  ;;  %v9095_v61 = vor.u32 %v10215_v55, %v9092_v56  ;;  %v9008_v14 = vld [vmem:[#allocation14 + $0x9cc] sm:$0xf0]  ;;  %v8339_v38 = vor.u32 %v10026_v7, %v8336_v21  ;;  %v8700_v55 = vld [vmem:[#allocation14 + $0x764] sm:$0xf0]  ;;  %v10187_v56 = vld [vmem:[#allocation14 + $0x97c] sm:$0xf] }
 0x369   :  { %6147 = vmatpush.bf16.msra.mxu0 %v9203_v57  ;;  %v8447_v57 = vor.u32 %v10057_v27, %v8446_v24  ;;  %v8787_v13 = vor.u32 %v10138_v18, %v8784_v3  ;;  %v9454_v27 = vld [vmem:[#allocation14 + $0xd30] sm:$0xf]  ;;  %v9011_v49 = vor.u32 %v10194_v30, %v9008_v14  ;;  %v10295_v18 = vld [vmem:[#allocation14 + $0xcd8] sm:$0xf0]  ;;  %v10110_v3 = vld [vmem:[#allocation14 + $0x714] sm:$0xf] }
 0x36a   :  { %6172 = vmatpush.bf16.msra.mxu2 %v7891_v5  ;;  %v8868_v5 = vld [vmem:[#allocation14 + $0x8b4] sm:$0xf0]  ;;  %6186 = vmatpush.bf16.msra.mxu3 %v8087_v39  ;;  %v5933_v39 = vpop.f32.mrf.mxu3  ;;  %v10173_v7 = vld [vmem:[#allocation14 + $0x90c] sm:$0xf]  ;;  %v8924_v21 = vld [vmem:[#allocation14 + $0x924] sm:$0xf0] }
 0x36b   :  { %v8871_v47 = vor.u32 %v10159_v35, %v8868_v5  ;;  %v9064_v35 = vld [vmem:[#allocation14 + $0xa3c] sm:$0xf0]  ;;  %v10012_v39 = vld [vmem:[#allocation14 + $0x404] sm:$0xf]  ;;  %v9342_v30 = vld [vmem:[#allocation14 + $0xc50] sm:$0xf] }
 0x36c   :  { %6109 = vmatpush.bf16.msrb.mxu1 %v8503_v8  ;;  %v9511_v8 = vor.u32 %v10323_v2, %v9510_v25  ;;  %v9398_v2 = vld [vmem:[#allocation14 + $0xcc0] sm:$0xf]  ;;  %v10281_v14 = vld [vmem:[#allocation14 + $0xc68] sm:$0xf0] }
 0x36d   :  { %6148 = vmatpush.bf16.msra.mxu0 %v9175_v62  ;;  %v10208_v62 = vld [vmem:[#allocation14 + $0xa24] sm:$0xf] }
 0x36e   :  { %6173 = vmatpush.bf16.msra.mxu2 %v7863_v31  ;;  %v8840_v31 = vld [vmem:[#allocation14 + $0x87c] sm:$0xf0]  ;;  %v10353_v29 = vpop.eup %10352  ;;  %6187 = vmatpush.bf16.msra.mxu3 %v8059_v16  ;;  %v9482_v16 = vld [vmem:[#allocation14 + $0xd68] sm:$0xf] }
 0x36f   :  { %6385 = vst [vmem:[#allocation17 + $0x8] sm:$0xff] %v10353_v29  ;;  %v8843_v4 = vor.u32 %v10152_v20, %v8840_v31  ;;  %v8367_v20 = vor.u32 %v10033_v43, %v8364_v36  ;;  %v9483_v31 = vor.u32 %v10316_v12, %v9482_v16  ;;  %v10124_v29 = vld [vmem:[#allocation14 + $0x784] sm:$0xf]  ;;  %v7978_v43 = vld [vmem:[#allocation14 + $0x1a0] sm:$0xf] }
 0x370   :  { %6110 = vmatpush.bf16.msrb.mxu1 %v8475_v33  ;;  %v8728_v33 = vld [vmem:[#allocation14 + $0x79c] sm:$0xf0]  ;;  %v9939_v36 = vld [vmem:[#allocation14 + $0x1b8] sm:$0xf0] }
 0x371   :  { %6149 = vmatpush.bf16.msra.mxu0 %v9147_v22  ;;  %v8759_v22 = vor.u32 %v10131_v52, %v8756_v9  ;;  %v9370_v9 = vld [vmem:[#allocation14 + $0xc88] sm:$0xf] }
 0x372   :  { %6174 = vmatpush.bf16.msra.mxu2 %v7835_v46  ;;  %v10047_v46 = vld [vmem:[#allocation14 + $0x51c] sm:$0xf]  ;;  %6188 = vmatpush.bf16.msra.mxu3 %v8031_v41  ;;  %v9455_v41 = vor.u32 %v10309_v32, %v9454_v27 }
 0x373   :  { %v8423_v34 = vor.u32 %v10047_v46, %v8420_v48  ;;  %v10019_v46 = vld [vmem:[#allocation14 + $0x43c] sm:$0xf]  ;;  %v8308_v48 = vld [vmem:[#allocation14 + $0x454] sm:$0xf0] }
 0x374   :  { %6111 = vmatpush.bf16.msrb.mxu1 %v8447_v57  ;;  %v8980_v57 = vld [vmem:[#allocation14 + $0x994] sm:$0xf0] }
 0x375   :  { %6150 = vmatpush.bf16.msra.mxu0 %v9119_v53  ;;  %v10117_v53 = vld [vmem:[#allocation14 + $0x74c] sm:$0xf]  ;;  %v8983_v25 = vor.u32 %v10187_v56, %v8980_v57  ;;  %v7922_v56 = vld [vmem:[#allocation14 + $0x130] sm:$0xf] }
 0x376   :  { %6175 = vmatpush.bf16.msra.mxu2 %v7807_v0  ;;  %v8392_v0 = vld [vmem:[#allocation14 + $0x4fc] sm:$0xf0]  ;;  %6189 = vmatpush.bf16.msra.mxu3 %v8003_v17  ;;  %v10929_v17 = vpop.f32.mrf.mxu0 }
 0x377   :  { %v8395_v5 = vor.u32 %v10040_v63, %v8392_v0  ;;  %6112 = vmatmul.bf16.vlgmr.msrb.gmra.mxu1 %v10824_v42  ;;  %v3334_v63 = vperm.slane %v10901_v23, 3  ;;  %v9427_v0 = vor.u32 %v10302_v50, %v9426_v51  ;;  %v9399_v23 = vor.u32 %v10295_v18, %v9398_v2  ;;  %v10271_v51 = vld [vmem:[#allocation14 + $0xc1c] sm:$0xf]  ;;  %v9316_v50 = vld [vmem:[#allocation14 + $0xc34] sm:$0xf0] }
 0x378   :  { %6156 = vmatpush.bf16.msra.mxu1 %v9539_v60  ;;  %6151 = vmatmul.bf16.vlgmr.msra.gmra.mxu0 %v10848_v10  ;;  %v8311_v60 = vor.u32 %v10019_v46, %v8308_v48  ;;  %v8224_v46 = vld [vmem:[#allocation14 + $0x3ac] sm:$0xf0]  ;;  %v10166_v48 = vld [vmem:[#allocation14 + $0x8d4] sm:$0xf]  ;;  %v10264_v18 = vld [vmem:[#allocation14 + $0xbe4] sm:$0xf] }
 0x379   :  { %6195 = vmatpush.bf16.msrb.mxu0 %v8423_v34  ;;  %6190 = vmatmul.bf16.vlgmr.msra.gmra.mxu3 %v10807_v37  ;;  %v10927_v34 = vpop.f32.mrf.mxu1 }
 0x37a   :  { %6176 = vmatpush.bf16.msra.mxu2 %v7779_v15  ;;  %6234 = vmatpush.bf16.msrb.mxu3 %v9095_v61  ;;  %v9067_v15 = vor.u32 %v10208_v62, %v9064_v35  ;;  %v8703_v61 = vor.u32 %v10117_v53, %v8700_v55  ;;  %v8672_v62 = vld [vmem:[#allocation14 + $0x72c] sm:$0xf0]  ;;  %v10180_v35 = vld [vmem:[#allocation14 + $0x944] sm:$0xf]  ;;  %v8644_v55 = vld [vmem:[#allocation14 + $0x6f4] sm:$0xf0] }
 0x37b   :  { %v8675_v12 = vor.u32 %v10110_v3, %v8672_v62  ;;  %v9288_v3 = vld [vmem:[#allocation14 + $0xbfc] sm:$0xf0] }
 0x37c   :  { %6157 = vmatpush.bf16.msra.mxu1 %v9511_v8 }
 0x37d   :  { %6177 = vmatmul.bf16.vlgmr.msra.gmra.mxu2 %v10816_v44  ;;  %6196 = vmatpush.bf16.msrb.mxu0 %v8395_v5  ;;  %v8952_v5 = vld [vmem:[#allocation14 + $0x95c] sm:$0xf0] }
 0x37e   :  { %6221 = vmatpush.bf16.msrb.mxu2 %v8871_v47  ;;  %v10201_v47 = vld [vmem:[#allocation14 + $0x9ec] sm:$0xf]  ;;  %6235 = vmatpush.bf16.msrb.mxu3 %v9067_v15  ;;  %v8252_v15 = vld [vmem:[#allocation14 + $0x3e4] sm:$0xf0]  ;;  %v8955_v52 = vor.u32 %v10180_v35, %v8952_v5  ;;  %v5946_v32 = vpop.f32.mrf.mxu0 }
 0x37f   :  { %v9039_v24 = vor.u32 %v10201_v47, %v9036_v26  ;;  %v10288_v47 = vld [vmem:[#allocation14 + $0xca0] sm:$0xf0] }
 0x380   :  { %6158 = vmatpush.bf16.msra.mxu1 %v9483_v31  ;;  %v5970_v54 = vpop.f32.mrf.mxu2  ;;  %v7979_v31 = vor.u32 %v9939_v36, %v7978_v43  ;;  %v8616_v43 = vld [vmem:[#allocation14 + $0x6bc] sm:$0xf0]  ;;  %v7894_v36 = vld [vmem:[#allocation14 + $0xf8] sm:$0xf] }
 0x381   :  { %6197 = vmatpush.bf16.msrb.mxu0 %v8367_v20  ;;  %v5971_v16 = vadd.f32 %v5970_v54, %v3334_v63  ;;  %v5983_v20 = vpop.f32.mrf.mxu3  ;;  %v5907_v27 = vpop.f32.mrf.mxu1  ;;  %v10103_v54 = vld [vmem:[#allocation14 + $0x6dc] sm:$0xf]  ;;  %v8202_v63 = vld [vmem:[#allocation14 + $0x360] sm:$0xf] }
 0x382   :  { %6222 = vmatpush.bf16.msrb.mxu2 %v8843_v4  ;;  %6236 = vmatpush.bf16.msrb.mxu3 %v9039_v24  ;;  %v8731_v4 = vor.u32 %v10124_v29, %v8728_v33  ;;  %v9932_v33 = vld [vmem:[#allocation14 + $0x180] sm:$0xf0]  ;;  %v8647_v2 = vor.u32 %v10103_v54, %v8644_v55  ;;  %v9204_v54 = vld [vmem:[#allocation14 + $0xb54] sm:$0xf0] }
 0x383   :  { %v10932_v24 = vadd.f32 %v5983_v20, %v5971_v16  ;;  %v9988_v16 = vld [vmem:[#allocation14 + $0x340] sm:$0xf0]  ;;  %v8588_v20 = vld [vmem:[#allocation14 + $0x684] sm:$0xf0] }
 0x384   :  { %6159 = vmatpush.bf16.msra.mxu1 %v9455_v41  ;;  %v9998_v41 = vld [vmem:[#allocation14 + $0x394] sm:$0xf] }
 0x385   :  { %6198 = vmatpush.bf16.msrb.mxu0 %v8339_v38  ;;  %v9371_v38 = vor.u32 %v10288_v47, %v9370_v9  ;;  %v8227_v57 = vor.u32 %v9998_v41, %v8224_v46  ;;  %v7838_v41 = vld [vmem:[#allocation14 + $0x88] sm:$0xf] }
 0x386   :  { %6223 = vmatpush.bf16.msrb.mxu2 %v8815_v1  ;;  %v8280_v1 = vld [vmem:[#allocation14 + $0x41c] sm:$0xf0]  ;;  %6237 = vmatpush.bf16.msrb.mxu3 %v9011_v49  ;;  %v8896_v49 = vld [vmem:[#allocation14 + $0x8ec] sm:$0xf0] }
 0x387   :  { %v8283_v8 = vor.u32 %v10012_v39, %v8280_v1  ;;  %v9343_v39 = vor.u32 %v10281_v14, %v9342_v30  ;;  %v9319_v1 = vor.u32 %v10271_v51, %v9316_v50 }
 0x388   :  { %6160 = vmatpush.bf16.msra.mxu1 %v9427_v0  ;;  %v5972_v26 = vpop.f32.mrf.mxu2  ;;  %v9995_v0 = vld [vmem:[#allocation14 + $0x378] sm:$0xf0] }
 0x389   :  { %6199 = vmatpush.bf16.msrb.mxu0 %v8311_v60  ;;  %v9925_v60 = vld [vmem:[#allocation14 + $0x148] sm:$0xf0]  ;;  %v5985_v62 = vpop.f32.mrf.mxu3  ;;  %v8203_v5 = vor.u32 %v9995_v0, %v8202_v63  ;;  %v7810_v63 = vld [vmem:[#allocation14 + $0x50] sm:$0xf] }
 0x38a   :  { %6224 = vmatpush.bf16.msrb.mxu2 %v8787_v13  ;;  %v10005_v13 = vld [vmem:[#allocation14 + $0x3cc] sm:$0xf]  ;;  %6238 = vmatpush.bf16.msrb.mxu3 %v8983_v25  ;;  %v8899_v25 = vor.u32 %v10166_v48, %v8896_v49  ;;  %v7923_v35 = vor.u32 %v9925_v60, %v7922_v56  ;;  %v9904_v48 = vld [vmem:[#allocation14 + $0xa0] sm:$0xf0]  ;;  %v9974_v49 = vld [vmem:[#allocation14 + $0x2d0] sm:$0xf0] }
 0x38b   :  { %v8255_v29 = vor.u32 %v10005_v13, %v8252_v15  ;;  %v9918_v13 = vld [vmem:[#allocation14 + $0x110] sm:$0xf0]  ;;  %v8174_v15 = vld [vmem:[#allocation14 + $0x328] sm:$0xf]  ;;  %v10089_v26 = vld [vmem:[#allocation14 + $0x66c] sm:$0xf]  ;;  %v7839_v55 = vor.u32 %v9904_v48, %v7838_v41 }
 0x38c   :  { %6161 = vmatpush.bf16.msra.mxu1 %v9399_v23  ;;  %v7895_v9 = vor.u32 %v9918_v13, %v7894_v36  ;;  %v8175_v47 = vor.u32 %v9988_v16, %v8174_v15  ;;  %v8591_v32 = vor.u32 %v10089_v26, %v8588_v20  ;;  %v8532_v60 = vld [vmem:[#allocation14 + $0x614] sm:$0xf0]  ;;  %v8504_v36 = vld [vmem:[#allocation14 + $0x5dc] sm:$0xf0]  ;;  %v9890_v13 = vld [vmem:[#allocation14 + $0x30] sm:$0xf0] }
 0x38d   :  { %6200 = vmatpush.bf16.msrb.mxu0 %v8283_v8  ;;  %v10096_v8 = vld [vmem:[#allocation14 + $0x6a4] sm:$0xf]  ;;  %v8062_v15 = vld [vmem:[#allocation14 + $0x248] sm:$0xf]  ;;  %v8448_v41 = vld [vmem:[#allocation14 + $0x56c] sm:$0xf0] }
 0x38e   :  { %6225 = vmatpush.bf16.msrb.mxu2 %v8759_v22  ;;  %v7950_v22 = vld [vmem:[#allocation14 + $0x168] sm:$0xf]  ;;  %6239 = vmatpush.bf16.msrb.mxu3 %v8955_v52  ;;  %v9960_v16 = vld [vmem:[#allocation14 + $0x260] sm:$0xf0] }
 0x38f   :  { %v7951_v53 = vor.u32 %v9932_v33, %v7950_v22  ;;  %v9260_v52 = vld [vmem:[#allocation14 + $0xbc4] sm:$0xf0]  ;;  %v9981_v22 = vld [vmem:[#allocation14 + $0x308] sm:$0xf0]  ;;  %v9232_v33 = vld [vmem:[#allocation14 + $0xb8c] sm:$0xf0]  ;;  %v8063_v20 = vor.u32 %v9960_v16, %v8062_v15 }
 0x390   :  { %6162 = vmatpush.bf16.msra.mxu1 %v9371_v38  ;;  %v8560_v38 = vld [vmem:[#allocation14 + $0x64c] sm:$0xf0]  ;;  %v10142_v15 = vld [vmem:[#allocation14 + $0x810] sm:$0xf0]  ;;  %v9070_v16 = vld [vmem:[#allocation14 + $0xa28] sm:$0xf] }
 0x391   :  { %6201 = vmatpush.bf16.msrb.mxu0 %v8255_v29  ;;  %v10250_v29 = vld [vmem:[#allocation14 + $0xb74] sm:$0xf] }
 0x392   :  { %6226 = vmatpush.bf16.msrb.mxu2 %v8731_v4  ;;  %v8927_v4 = vor.u32 %v10173_v7, %v8924_v21  ;;  %v9911_v7 = vld [vmem:[#allocation14 + $0xd8] sm:$0xf0]  ;;  %v8146_v21 = vld [vmem:[#allocation14 + $0x2f0] sm:$0xf]  ;;  %v9235_v51 = vor.u32 %v10250_v29, %v9232_v33  ;;  %v8846_v29 = vld [vmem:[#allocation14 + $0x868] sm:$0xf] }
 0x393   :  { %v8147_v14 = vor.u32 %v9981_v22, %v8146_v21  ;;  %v10156_v33 = vld [vmem:[#allocation14 + $0x880] sm:$0xf0] }
 0x394   :  { %6240 = vmatpush.bf16.msrb.mxu3 %v8927_v4  ;;  %6163 = vmatpush.bf16.msra.mxu1 %v9343_v39  ;;  %v8118_v4 = vld [vmem:[#allocation14 + $0x2b8] sm:$0xf] }
 0x395   :  { %6202 = vmatpush.bf16.msrb.mxu0 %v8227_v57  ;;  %v8119_v56 = vor.u32 %v9974_v49, %v8118_v4  ;;  %v10075_v57 = vld [vmem:[#allocation14 + $0x5fc] sm:$0xf]  ;;  %v9120_v49 = vld [vmem:[#allocation14 + $0xaac] sm:$0xf0] }
 0x396   :  { %6227 = vmatpush.bf16.msrb.mxu2 %v8703_v61  ;;  %v5893_v61 = vadd.f32 %v10919_v28, %v10905_v11  ;;  %v9291_v11 = vor.u32 %v10264_v18, %v9288_v3  ;;  %v8619_v28 = vor.u32 %v10096_v8, %v8616_v43  ;;  %v8535_v62 = vor.u32 %v10075_v57, %v8532_v60  ;;  %v10327_v57 = vld [vmem:[#allocation14 + $0xddc] sm:$0xf]  ;;  %v9540_v60 = vld [vmem:[#allocation14 + $0xdf4] sm:$0xf0] }
 0x397   :  { %6164 = vmatmul.bf16.vlgmr.msra.gmra.mxu1 %v10855_v58 }
 0x398   :  { %v5906_v23 = vadd.f32 %v10927_v34, %v5893_v61  ;;  %6241 = vmatpush.bf16.msrb.mxu3 %v8899_v25  ;;  %6208 = vmatpush.bf16.msrb.mxu1 %v8647_v2  ;;  %v9967_v61 = vld [vmem:[#allocation14 + $0x298] sm:$0xf0]  ;;  %v5957_v25 = vpop.f32.mrf.mxu1  ;;  %v10946_v2 = vpop.f32.mrf.mxu0 }
 0x399   :  { %6247 = vmatpush.bf16.msra.mxu0 %v9319_v1  ;;  %v8090_v1 = vld [vmem:[#allocation14 + $0x280] sm:$0xf] }
 0x39a   :  { %6228 = vmatpush.bf16.msrb.mxu2 %v8675_v12  ;;  %v10257_v12 = vld [vmem:[#allocation14 + $0xbac] sm:$0xf]  ;;  %v5919_v34 = vadd.f32 %v10916_v45, %v5906_v23  ;;  %6203 = vmatmul.bf16.vlgmr.msrb.gmra.mxu0 %v10828_v6  ;;  %v10082_v45 = vld [vmem:[#allocation14 + $0x634] sm:$0xf]  ;;  %v8091_v43 = vor.u32 %v9967_v61, %v8090_v1  ;;  %v7782_v23 = vld [vmem:[#allocation14 + $0x18] sm:$0xf] }
 0x39b   :  { %6242 = vmatmul.bf16.vlgmr.msrb.gmra.mxu3 %v10842_v40  ;;  %v9263_v27 = vor.u32 %v10257_v12, %v9260_v52  ;;  %v8563_v50 = vor.u32 %v10082_v45, %v8560_v38  ;;  %v10163_v12 = vld [vmem:[#allocation14 + $0x8b8] sm:$0xf0]  ;;  %v7783_v26 = vor.u32 %v9890_v13, %v7782_v23  ;;  %v10054_v38 = vld [vmem:[#allocation14 + $0x554] sm:$0xf]  ;;  %v9098_v1 = vld [vmem:[#allocation14 + $0xa60] sm:$0xf] }
 0x39c   :  { %6286 = vmatpush.bf16.msra.mxu3 %v8203_v5  ;;  %6209 = vmatpush.bf16.msrb.mxu1 %v8619_v28  ;;  %v5932_v46 = vadd.f32 %v10921_v19, %v5919_v34  ;;  %v9897_v19 = vld [vmem:[#allocation14 + $0x68] sm:$0xf0]  ;;  %v9176_v5 = vld [vmem:[#allocation14 + $0xb1c] sm:$0xf0]  ;;  %v8476_v34 = vld [vmem:[#allocation14 + $0x5a4] sm:$0xf0] }
 0x39d   :  { %6229 = vmatmul.bf16.vlgmr.msrb.gmra.mxu2 %v10832_v59  ;;  %6248 = vmatpush.bf16.msra.mxu0 %v9291_v11  ;;  %v7811_v8 = vor.u32 %v9897_v19, %v7810_v63  ;;  %v8874_v28 = vld [vmem:[#allocation14 + $0x8a0] sm:$0xf]  ;;  %v10948_v22 = vpop.f32.mrf.mxu3  ;;  %v8818_v63 = vld [vmem:[#allocation14 + $0x830] sm:$0xf]  ;;  %v10149_v19 = vld [vmem:[#allocation14 + $0x848] sm:$0xf0] }
 0x39e   :  { %6273 = vmatpush.bf16.msra.mxu2 %v7979_v31  ;;  %v7866_v31 = vld [vmem:[#allocation14 + $0xc0] sm:$0xf]  ;;  %v5945_v0 = vadd.f32 %v10929_v17, %v5932_v46  ;;  %v10068_v17 = vld [vmem:[#allocation14 + $0x5c4] sm:$0xf]  ;;  %v10222_v46 = vld [vmem:[#allocation14 + $0xa94] sm:$0xf] }
 0x39f   :  { %v7867_v30 = vor.u32 %v9911_v7, %v7866_v31  ;;  %v8507_v52 = vor.u32 %v10068_v17, %v8504_v36  ;;  %v10061_v31 = vld [vmem:[#allocation14 + $0x58c] sm:$0xf]  ;;  %v8034_v7 = vld [vmem:[#allocation14 + $0x210] sm:$0xf]  ;;  %v10219_v61 = vld [vmem:[#allocation14 + $0xa78] sm:$0xf0] }
 0x3a0   :  { %6287 = vmatpush.bf16.msra.mxu3 %v8175_v47  ;;  %6210 = vmatpush.bf16.msrb.mxu1 %v8591_v32  ;;  %v10944_v39 = vpop.f32.mrf.mxu2  ;;  %v5958_v3 = vadd.f32 %v5957_v25, %v5945_v0  ;;  %v9148_v47 = vld [vmem:[#allocation14 + $0xae4] sm:$0xf0]  ;;  %v9953_v32 = vld [vmem:[#allocation14 + $0x228] sm:$0xf0]  ;;  %v8479_v4 = vor.u32 %v10061_v31, %v8476_v34  ;;  %v9123_v0 = vor.u32 %v10222_v46, %v9120_v49  ;;  %v10320_v36 = vld [vmem:[#allocation14 + $0xda4] sm:$0xf] }
 0x3a1   :  { %6249 = vmatpush.bf16.msra.mxu0 %v9263_v27  ;;  %v8875_v27 = vor.u32 %v10163_v12, %v8874_v28  ;;  %v8451_v25 = vor.u32 %v10054_v38, %v8448_v41  ;;  %v9099_v17 = vor.u32 %v10219_v61, %v9098_v1  ;;  %v9512_v23 = vld [vmem:[#allocation14 + $0xdbc] sm:$0xf0]  ;;  %v8790_v13 = vld [vmem:[#allocation14 + $0x7f8] sm:$0xf]  ;;  %v8370_v12 = vld [vmem:[#allocation14 + $0x4b0] sm:$0xf] }
 0x3a2   :  { %6274 = vmatpush.bf16.msra.mxu2 %v7951_v53  ;;  %v10243_v53 = vld [vmem:[#allocation14 + $0xb3c] sm:$0xf]  ;;  %10354 = vtanh.f32 %v5958_v3  ;;  %v9515_v28 = vor.u32 %v10320_v36, %v9512_v23  ;;  %v8762_v31 = vld [vmem:[#allocation14 + $0x7c0] sm:$0xf]  ;;  %v9456_v38 = vld [vmem:[#allocation14 + $0xd4c] sm:$0xf0] }
 0x3a3   :  { %v9207_v18 = vor.u32 %v10243_v53, %v9204_v54  ;;  %v8035_v53 = vor.u32 %v9953_v32, %v8034_v7  ;;  %v8426_v54 = vld [vmem:[#allocation14 + $0x520] sm:$0xf]  ;;  %v10135_v34 = vld [vmem:[#allocation14 + $0x7d8] sm:$0xf0]  ;;  %v9042_v7 = vld [vmem:[#allocation14 + $0x9f0] sm:$0xf] }
 0x3a4   :  { %6288 = vmatpush.bf16.msra.mxu3 %v8147_v14  ;;  %6211 = vmatpush.bf16.msrb.mxu1 %v8563_v50  ;;  %v5998_v14 = vpop.f32.mrf.mxu0  ;;  %v9946_v50 = vld [vmem:[#allocation14 + $0x1f0] sm:$0xf0]  ;;  %v8734_v41 = vld [vmem:[#allocation14 + $0x788] sm:$0xf]  ;;  %v10128_v46 = vld [vmem:[#allocation14 + $0x7a0] sm:$0xf0] }
 0x3a5   :  { %6250 = vmatpush.bf16.msra.mxu0 %v9235_v51  ;;  %v8006_v51 = vld [vmem:[#allocation14 + $0x1d8] sm:$0xf]  ;;  %v9400_v36 = vld [vmem:[#allocation14 + $0xcdc] sm:$0xf0] }
 0x3a6   :  { %6275 = vmatpush.bf16.msra.mxu2 %v7923_v35  ;;  %v10236_v35 = vld [vmem:[#allocation14 + $0xb04] sm:$0xf]  ;;  %v8007_v3 = vor.u32 %v9946_v50, %v8006_v51  ;;  %v8314_v51 = vld [vmem:[#allocation14 + $0x440] sm:$0xf]  ;;  %v10023_v50 = vld [vmem:[#allocation14 + $0x458] sm:$0xf0] }
 0x3a7   :  { %v9179_v11 = vor.u32 %v10236_v35, %v9176_v5  ;;  %v8398_v35 = vld [vmem:[#allocation14 + $0x4e8] sm:$0xf]  ;;  %v10044_v5 = vld [vmem:[#allocation14 + $0x500] sm:$0xf0]  ;;  %v8678_v23 = vld [vmem:[#allocation14 + $0x718] sm:$0xf] }
 0x3a8   :  { %6289 = vmatpush.bf16.msra.mxu3 %v8119_v56  ;;  %6212 = vmatpush.bf16.msrb.mxu1 %v8535_v62  ;;  %v6024_v21 = vpop.f32.mrf.mxu2  ;;  %v10355_v48 = vpop.eup %10354  ;;  %v8847_v56 = vor.u32 %v10156_v33, %v8846_v29  ;;  %v9543_v62 = vor.u32 %v10327_v57, %v9540_v60  ;;  %v8342_v29 = vld [vmem:[#allocation14 + $0x478] sm:$0xf]  ;;  %v10030_v33 = vld [vmem:[#allocation14 + $0x490] sm:$0xf0]  ;;  %v8706_v57 = vld [vmem:[#allocation14 + $0x750] sm:$0xf] }
 0x3a9   :  { %6251 = vmatpush.bf16.msra.mxu0 %v9207_v18  ;;  %6386 = vst [vmem:[#allocation17 + $0x10] sm:$0xff] %v10355_v48  ;;  %v10205_v21 = vld [vmem:[#allocation14 + $0xa08] sm:$0xf0]  ;;  %v9014_v48 = vld [vmem:[#allocation14 + $0x9b8] sm:$0xf]  ;;  %v8343_v49 = vor.u32 %v10030_v33, %v8342_v29 }
 0x3aa   :  { %6276 = vmatpush.bf16.msra.mxu2 %v7895_v9  ;;  %v10229_v9 = vld [vmem:[#allocation14 + $0xacc] sm:$0xf]  ;;  %v9043_v14 = vor.u32 %v10205_v21, %v9042_v7  ;;  %v8930_v7 = vld [vmem:[#allocation14 + $0x910] sm:$0xf] }
 0x3ab   :  { %v9151_v45 = vor.u32 %v10229_v9, %v9148_v47  ;;  %v8791_v9 = vor.u32 %v10142_v15, %v8790_v13  ;;  %v10114_v13 = vld [vmem:[#allocation14 + $0x730] sm:$0xf0]  ;;  %v8958_v15 = vld [vmem:[#allocation14 + $0x948] sm:$0xf]  ;;  %v10177_v21 = vld [vmem:[#allocation14 + $0x928] sm:$0xf0] }
 0x3ac   :  { %6290 = vmatpush.bf16.msra.mxu3 %v8091_v43  ;;  %6213 = vmatpush.bf16.msrb.mxu1 %v8507_v52  ;;  %v8819_v43 = vor.u32 %v10149_v19, %v8818_v63  ;;  %v10037_v52 = vld [vmem:[#allocation14 + $0x4c8] sm:$0xf0]  ;;  %v10191_v19 = vld [vmem:[#allocation14 + $0x998] sm:$0xf0] }
 0x3ad   :  { %6252 = vmatpush.bf16.msra.mxu0 %v9179_v11  ;;  %v10212_v11 = vld [vmem:[#allocation14 + $0xa40] sm:$0xf0]  ;;  %v10121_v63 = vld [vmem:[#allocation14 + $0x768] sm:$0xf0] }
 0x3ae   :  { %6277 = vmatpush.bf16.msra.mxu2 %v7867_v30  ;;  %v5959_v30 = vpop.f32.mrf.mxu1  ;;  %v9071_v47 = vor.u32 %v10212_v11, %v9070_v16  ;;  %v10184_v16 = vld [vmem:[#allocation14 + $0x960] sm:$0xf0] }
 0x3af   :  { %v8763_v30 = vor.u32 %v10135_v34, %v8762_v31 }
 0x3b0   :  { %6291 = vmatpush.bf16.msra.mxu3 %v8063_v20  ;;  %6214 = vmatpush.bf16.msrb.mxu1 %v8479_v4  ;;  %v9484_v20 = vld [vmem:[#allocation14 + $0xd84] sm:$0xf0]  ;;  %v10198_v4 = vld [vmem:[#allocation14 + $0x9d0] sm:$0xf0] }
 0x3b1   :  { %6253 = vmatpush.bf16.msra.mxu0 %v9151_v45  ;;  %v10306_v45 = vld [vmem:[#allocation14 + $0xd34] sm:$0xf] }
 0x3b2   :  { %6278 = vmatpush.bf16.msra.mxu2 %v7839_v55  ;;  %v10051_v55 = vld [vmem:[#allocation14 + $0x538] sm:$0xf0] }
 0x3b3   :  { %v8427_v18 = vor.u32 %v10051_v55, %v8426_v54  ;;  %v9015_v54 = vor.u32 %v10198_v4, %v9014_v48  ;;  %v10299_v55 = vld [vmem:[#allocation14 + $0xcfc] sm:$0xf]  ;;  %v8902_v48 = vld [vmem:[#allocation14 + $0x8d8] sm:$0xf]  ;;  %v9322_v4 = vld [vmem:[#allocation14 + $0xc20] sm:$0xf] }
 0x3b4   :  { %6292 = vmatpush.bf16.msra.mxu3 %v8035_v53  ;;  %6215 = vmatpush.bf16.msrb.mxu1 %v8451_v25  ;;  %v8735_v53 = vor.u32 %v10128_v46, %v8734_v41  ;;  %v10956_v61 = vpop.f32.mrf.mxu0  ;;  %v8315_v25 = vor.u32 %v10023_v50, %v8314_v51  ;;  %v10002_v41 = vld [vmem:[#allocation14 + $0x3b0] sm:$0xf0]  ;;  %v8931_v46 = vor.u32 %v10177_v21, %v8930_v7  ;;  %v8650_v51 = vld [vmem:[#allocation14 + $0x6e0] sm:$0xf]  ;;  %v10107_v50 = vld [vmem:[#allocation14 + $0x6f8] sm:$0xf0] }
 0x3b5   :  { %6254 = vmatpush.bf16.msra.mxu0 %v9123_v0  ;;  %v8986_v0 = vld [vmem:[#allocation14 + $0x980] sm:$0xf]  ;;  %v8510_v7 = vld [vmem:[#allocation14 + $0x5c8] sm:$0xf]  ;;  %v10072_v21 = vld [vmem:[#allocation14 + $0x5e0] sm:$0xf0] }
 0x3b6   :  { %6279 = vmatpush.bf16.msra.mxu2 %v7811_v8  ;;  %v6037_v8 = vpop.f32.mrf.mxu3  ;;  %v10954_v1 = vpop.f32.mrf.mxu1 }
 0x3b7   :  { %6216 = vmatmul.bf16.vlgmr.msrb.gmra.mxu1 %v10824_v42  ;;  %v8707_v8 = vor.u32 %v10121_v63, %v8706_v57  ;;  %v9294_v63 = vld [vmem:[#allocation14 + $0xbe8] sm:$0xf] }
 0x3b8   :  { %6293 = vmatpush.bf16.msra.mxu3 %v8007_v3  ;;  %6260 = vmatpush.bf16.msra.mxu1 %v9543_v62 }
 0x3b9   :  { %6299 = vmatpush.bf16.msrb.mxu0 %v8427_v18  ;;  %v10958_v18 = vld [vmem:[#allocation16] sm:$0xff] }
 0x3ba   :  { %6280 = vmatpush.bf16.msra.mxu2 %v7783_v26  ;;  %v10313_v26 = vld [vmem:[#allocation14 + $0xd6c] sm:$0xf]  ;;  %6255 = vmatmul.bf16.vlgmr.msra.gmra.mxu0 %v10848_v10  ;;  %v3335_v3 = vperm.slane %v10958_v18, 4 }
 0x3bb   :  { %6294 = vmatmul.bf16.vlgmr.msra.gmra.mxu3 %v10807_v37  ;;  %v9487_v32 = vor.u32 %v10313_v26, %v9484_v20  ;;  %v9459_v37 = vor.u32 %v10306_v45, %v9456_v38  ;;  %v10285_v26 = vld [vmem:[#allocation14 + $0xc8c] sm:$0xf]  ;;  %v9372_v20 = vld [vmem:[#allocation14 + $0xca4] sm:$0xf0]  ;;  %v9344_v45 = vld [vmem:[#allocation14 + $0xc6c] sm:$0xf0] }
 0x3bc   :  { %6338 = vmatpush.bf16.msrb.mxu3 %v9099_v17  ;;  %6261 = vmatpush.bf16.msra.mxu1 %v9515_v28  ;;  %v10292_v17 = vld [vmem:[#allocation14 + $0xcc4] sm:$0xf]  ;;  %v8258_v28 = vld [vmem:[#allocation14 + $0x3d0] sm:$0xf]  ;;  %v6050_v29 = vpop.f32.mrf.mxu0  ;;  %v8230_v38 = vld [vmem:[#allocation14 + $0x398] sm:$0xf] }
 0x3bd   :  { %6281 = vmatmul.bf16.vlgmr.msra.gmra.mxu2 %v10816_v44  ;;  %v8399_v44 = vor.u32 %v10044_v5, %v8398_v35  ;;  %v8286_v35 = vld [vmem:[#allocation14 + $0x408] sm:$0xf]  ;;  %v10016_v5 = vld [vmem:[#allocation14 + $0x420] sm:$0xf0]  ;;  %v8511_v29 = vor.u32 %v10072_v21, %v8510_v7 }
 0x3be   :  { %6325 = vmatpush.bf16.msrb.mxu2 %v8875_v27  ;;  %v8371_v27 = vor.u32 %v10037_v52, %v8370_v12  ;;  %v8287_v11 = vor.u32 %v10016_v5, %v8286_v35  ;;  %v10009_v12 = vld [vmem:[#allocation14 + $0x3e8] sm:$0xf0]  ;;  %v6087_v34 = vpop.f32.mrf.mxu3  ;;  %v9266_v5 = vld [vmem:[#allocation14 + $0xbb0] sm:$0xf] }
 0x3bf   :  { %6300 = vmatpush.bf16.msrb.mxu0 %v8399_v44  ;;  %v9403_v44 = vor.u32 %v10292_v17, %v9400_v36  ;;  %v8259_v33 = vor.u32 %v10009_v12, %v8258_v28  ;;  %v9238_v36 = vld [vmem:[#allocation14 + $0xb78] sm:$0xf]  ;;  %v8538_v28 = vld [vmem:[#allocation14 + $0x600] sm:$0xf]  ;;  %v10079_v12 = vld [vmem:[#allocation14 + $0x618] sm:$0xf0] }
 0x3c0   :  { %6339 = vmatpush.bf16.msrb.mxu3 %v9071_v47  ;;  %6262 = vmatpush.bf16.msra.mxu1 %v9487_v32  ;;  %v6074_v60 = vpop.f32.mrf.mxu2  ;;  %v8959_v47 = vor.u32 %v10184_v16, %v8958_v15  ;;  %v6011_v32 = vpop.f32.mrf.mxu1  ;;  %v10086_v15 = vld [vmem:[#allocation14 + $0x650] sm:$0xf0] }
 0x3c1   :  { %v6075_v52 = vadd.f32 %v6074_v60, %v3335_v3  ;;  %v8651_v60 = vor.u32 %v10107_v50, %v8650_v51  ;;  %v10100_v3 = vld [vmem:[#allocation14 + $0x6c0] sm:$0xf0]  ;;  %v10226_v51 = vld [vmem:[#allocation14 + $0xab0] sm:$0xf0]  ;;  %v8454_v50 = vld [vmem:[#allocation14 + $0x558] sm:$0xf] }
 0x3c2   :  { %6326 = vmatpush.bf16.msrb.mxu2 %v8847_v56  ;;  %v9428_v56 = vld [vmem:[#allocation14 + $0xd14] sm:$0xf0] }
 0x3c3   :  { %6301 = vmatpush.bf16.msrb.mxu0 %v8371_v27  ;;  %v9431_v62 = vor.u32 %v10299_v55, %v9428_v56  ;;  %v10961_v27 = vadd.f32 %v6087_v34, %v6075_v52  ;;  %v5997_v56 = vadd.f32 %v10946_v2, %v10932_v24  ;;  %v8594_v24 = vld [vmem:[#allocation14 + $0x670] sm:$0xf]  ;;  %v10093_v2 = vld [vmem:[#allocation14 + $0x688] sm:$0xf0]  ;;  %v10240_v34 = vld [vmem:[#allocation14 + $0xb20] sm:$0xf0] }
 0x3c4   :  { %6340 = vmatpush.bf16.msrb.mxu3 %v9043_v14  ;;  %6263 = vmatpush.bf16.msra.mxu1 %v9459_v37  ;;  %v9375_v14 = vor.u32 %v10285_v26, %v9372_v20  ;;  %v10170_v37 = vld [vmem:[#allocation14 + $0x8f0] sm:$0xf0]  ;;  %v8595_v17 = vor.u32 %v10093_v2, %v8594_v24  ;;  %v9434_v24 = vld [vmem:[#allocation14 + $0xd00] sm:$0xf]  ;;  %v10303_v2 = vld [vmem:[#allocation14 + $0xd18] sm:$0xf0] }
 0x3c5   :  { %v8903_v57 = vor.u32 %v10170_v37, %v8902_v48  ;;  %v9126_v37 = vld [vmem:[#allocation14 + $0xa98] sm:$0xf] }
 0x3c6   :  { %6327 = vmatpush.bf16.msrb.mxu2 %v8819_v43  ;;  %v8987_v43 = vor.u32 %v10191_v19, %v8986_v0  ;;  %v10268_v0 = vld [vmem:[#allocation14 + $0xc00] sm:$0xf0]  ;;  %v6089_v19 = vpop.f32.mrf.mxu3 }
 0x3c7   :  { %6302 = vmatpush.bf16.msrb.mxu0 %v8343_v49  ;;  %v10275_v49 = vld [vmem:[#allocation14 + $0xc38] sm:$0xf0]  ;;  %v10324_v19 = vld [vmem:[#allocation14 + $0xdc0] sm:$0xf0] }
 0x3c8   :  { %6341 = vmatpush.bf16.msrb.mxu3 %v9015_v54  ;;  %6264 = vmatpush.bf16.msra.mxu1 %v9431_v62  ;;  %v6076_v31 = vpop.f32.mrf.mxu2  ;;  %v9323_v55 = vor.u32 %v10275_v49, %v9322_v4  ;;  %v6010_v62 = vadd.f32 %v10954_v1, %v5997_v56  ;;  %v9127_v56 = vor.u32 %v10226_v51, %v9126_v37 }
 0x3c9   :  { %v9182_v31 = vld [vmem:[#allocation14 + $0xb08] sm:$0xf] }
 0x3ca   :  { %6328 = vmatpush.bf16.msrb.mxu2 %v8791_v9  ;;  %v8679_v9 = vor.u32 %v10114_v13, %v8678_v23  ;;  %v10254_v23 = vld [vmem:[#allocation14 + $0xb90] sm:$0xf0]  ;;  %v8566_v13 = vld [vmem:[#allocation14 + $0x638] sm:$0xf]  ;;  %v9183_v32 = vor.u32 %v10240_v34, %v9182_v31 }
 0x3cb   :  { %6303 = vmatpush.bf16.msrb.mxu0 %v8315_v25  ;;  %v8622_v25 = vld [vmem:[#allocation14 + $0x6a8] sm:$0xf] }
 0x3cc   :  { %6342 = vmatpush.bf16.msrb.mxu3 %v8987_v43  ;;  %6265 = vmatpush.bf16.msra.mxu1 %v9403_v44  ;;  %v8623_v35 = vor.u32 %v10100_v3, %v8622_v25  ;;  %v6023_v43 = vadd.f32 %v10944_v39, %v6010_v62  ;;  %v9210_v44 = vld [vmem:[#allocation14 + $0xb40] sm:$0xf]  ;;  %v10247_v39 = vld [vmem:[#allocation14 + $0xb58] sm:$0xf0]  ;;  %v9490_v3 = vld [vmem:[#allocation14 + $0xd70] sm:$0xf] }
 0x3cd   :  { %v9211_v26 = vor.u32 %v10247_v39, %v9210_v44  ;;  %v10317_v62 = vld [vmem:[#allocation14 + $0xd88] sm:$0xf0] }
 0x3ce   :  { %6329 = vmatpush.bf16.msrb.mxu2 %v8763_v30  ;;  %v10278_v30 = vld [vmem:[#allocation14 + $0xc54] sm:$0xf]  ;;  %v6036_v16 = vadd.f32 %v10948_v22, %v6023_v43  ;;  %v8539_v22 = vor.u32 %v10079_v12, %v8538_v28 }
 0x3cf   :  { %6304 = vmatpush.bf16.msrb.mxu0 %v8287_v11  ;;  %v9347_v54 = vor.u32 %v10278_v30, %v9344_v45  ;;  %v8567_v11 = vor.u32 %v10086_v15, %v8566_v13  ;;  %v8482_v30 = vld [vmem:[#allocation14 + $0x590] sm:$0xf]  ;;  %v10296_v13 = vld [vmem:[#allocation14 + $0xce0] sm:$0xf0] }
 0x3d0   :  { %6343 = vmatpush.bf16.msrb.mxu3 %v8959_v47  ;;  %6266 = vmatpush.bf16.msra.mxu1 %v9375_v14  ;;  %v10065_v14 = vld [vmem:[#allocation14 + $0x5a8] sm:$0xf0] }
 0x3d1   :  { %v8483_v49 = vor.u32 %v10065_v14, %v8482_v30 }
 0x3d2   :  { %6330 = vmatpush.bf16.msrb.mxu2 %v8735_v53  ;;  %v8231_v53 = vor.u32 %v10002_v41, %v8230_v38 }
 0x3d3   :  { %6305 = vmatpush.bf16.msrb.mxu0 %v8259_v33  ;;  %v10233_v33 = vld [vmem:[#allocation14 + $0xae8] sm:$0xf0] }
 0x3d4   :  { %6344 = vmatpush.bf16.msrb.mxu3 %v8931_v46  ;;  %6267 = vmatpush.bf16.msra.mxu1 %v9347_v54  ;;  %v9546_v54 = vld [vmem:[#allocation14 + $0xde0] sm:$0xf] }
 0x3d5   :  { %v10975_v47 = vpop.f32.mrf.mxu0 }
 0x3d6   :  { %6331 = vmatpush.bf16.msrb.mxu2 %v8707_v8  ;;  %v10261_v8 = vld [vmem:[#allocation14 + $0xbc8] sm:$0xf0] }
 0x3d7   :  { %6306 = vmatpush.bf16.msrb.mxu0 %v8231_v53  ;;  %6268 = vmatmul.bf16.vlgmr.msra.gmra.mxu1 %v10855_v58  ;;  %v9267_v1 = vor.u32 %v10261_v8, %v9266_v5  ;;  %v10058_v53 = vld [vmem:[#allocation14 + $0x570] sm:$0xf0] }
 0x3d8   :  { %6345 = vmatpush.bf16.msrb.mxu3 %v8903_v57  ;;  %6312 = vmatpush.bf16.msrb.mxu1 %v8651_v60  ;;  %v8455_v57 = vor.u32 %v10058_v53, %v8454_v50  ;;  %v10310_v5 = vld [vmem:[#allocation14 + $0xd50] sm:$0xf0] }
 0x3da   :  { %6332 = vmatpush.bf16.msrb.mxu2 %v8679_v9  ;;  %6307 = vmatmul.bf16.vlgmr.msrb.gmra.mxu0 %v10828_v6  ;;  %v9239_v6 = vor.u32 %v10254_v23, %v9238_v36  ;;  %v6061_v9 = vpop.f32.mrf.mxu1  ;;  %v9435_v36 = vor.u32 %v10303_v2, %v9434_v24  ;;  %v3336_v23 = vperm.slane %v10958_v18, 5 }
 0x3db   :  { %6351 = vmatpush.bf16.msra.mxu0 %v9323_v55  ;;  %6346 = vmatmul.bf16.vlgmr.msrb.gmra.mxu3 %v10842_v40  ;;  %v6049_v40 = vadd.f32 %v10956_v61, %v6036_v16  ;;  %v9154_v61 = vld [vmem:[#allocation14 + $0xad0] sm:$0xf]  ;;  %v10331_v55 = vld [vmem:[#allocation14 + $0xdf8] sm:$0xf0] }
 0x3dc   :  { %6313 = vmatpush.bf16.msrb.mxu1 %v8623_v35  ;;  %v9155_v48 = vor.u32 %v10233_v33, %v9154_v61  ;;  %v9547_v60 = vor.u32 %v10331_v55, %v9546_v54  ;;  %v9462_v35 = vld [vmem:[#allocation14 + $0xd38] sm:$0xf]  ;;  %v9378_v16 = vld [vmem:[#allocation14 + $0xc90] sm:$0xf] }
 0x3dd   :  { %6333 = vmatmul.bf16.vlgmr.msrb.gmra.mxu2 %v10832_v59  ;;  %v9295_v59 = vor.u32 %v10268_v0, %v9294_v63  ;;  %v6062_v20 = vadd.f32 %v6061_v9, %v6049_v40  ;;  %v10977_v38 = vpop.f32.mrf.mxu3  ;;  %v6102_v46 = vpop.f32.mrf.mxu0  ;;  %v9518_v0 = vld [vmem:[#allocation14 + $0xda8] sm:$0xf]  ;;  %v9463_v8 = vor.u32 %v10310_v5, %v9462_v35  ;;  %v9350_v9 = vld [vmem:[#allocation14 + $0xc58] sm:$0xf] }
 0x3de   :  { %v9519_v25 = vor.u32 %v10324_v19, %v9518_v0 }
 0x3df   :  { %6352 = vmatpush.bf16.msra.mxu0 %v9295_v59  ;;  %10356 = vtanh.f32 %v6062_v20  ;;  %v9491_v59 = vor.u32 %v10317_v62, %v9490_v3 }
 0x3e0   :  { %6314 = vmatpush.bf16.msrb.mxu1 %v8595_v17  ;;  %v10973_v52 = vpop.f32.mrf.mxu2 }
 0x3e2   :  { %v6063_v41 = vpop.f32.mrf.mxu1 }
 0x3e3   :  { %6353 = vmatpush.bf16.msra.mxu0 %v9267_v1 }
 0x3e4   :  { %6315 = vmatpush.bf16.msrb.mxu1 %v8567_v11 }
 0x3e5   :  { %v10357_v4 = vpop.eup %10356  ;;  %v6141_v63 = vpop.f32.mrf.mxu3 }
 0x3e6   :  { %6387 = vst [vmem:[#allocation17 + $0x18] sm:$0xff] %v10357_v4 }
 0x3e7   :  { %6354 = vmatpush.bf16.msra.mxu0 %v9239_v6  ;;  %v10289_v6 = vld [vmem:[#allocation14 + $0xca8] sm:$0xf0] }
 0x3e8   :  { %6316 = vmatpush.bf16.msrb.mxu1 %v8539_v22  ;;  %v6128_v45 = vpop.f32.mrf.mxu2  ;;  %v9379_v40 = vor.u32 %v10289_v6, %v9378_v16  ;;  %v6101_v22 = vadd.f32 %v10975_v47, %v10961_v27 }
 0x3eb   :  { %6355 = vmatpush.bf16.msra.mxu0 %v9211_v26  ;;  %v10282_v26 = vld [vmem:[#allocation14 + $0xc70] sm:$0xf0] }
 0x3ec   :  { %6317 = vmatpush.bf16.msrb.mxu1 %v8511_v29  ;;  %v9351_v20 = vor.u32 %v10282_v26, %v9350_v9 }
 0x3ef   :  { %6356 = vmatpush.bf16.msra.mxu0 %v9183_v32 }
 0x3f0   :  { %6318 = vmatpush.bf16.msrb.mxu1 %v8483_v49 }
 0x3f3   :  { %6357 = vmatpush.bf16.msra.mxu0 %v9155_v48 }
 0x3f4   :  { %6319 = vmatpush.bf16.msrb.mxu1 %v8455_v57  ;;  %v6113_v1 = vpop.f32.mrf.mxu1 }
 0x3f5   :  { %v6152_v17 = vpop.f32.mrf.mxu0  ;;  %v6114_v34 = vadd.f32 %v6113_v1, %v6101_v22 }
 0x3f7   :  { %6358 = vmatpush.bf16.msra.mxu0 %v9127_v56  ;;  %6320 = vmatmul.bf16.vlgmr.msrb.gmra.mxu1 %v10824_v42  ;;  %v6127_v7 = vadd.f32 %v10973_v52, %v6114_v34 }
 0x3f8   :  { %6364 = vmatpush.bf16.msra.mxu1 %v9547_v60 }
 0x3f9   :  { %v6140_v21 = vadd.f32 %v10977_v38, %v6127_v7 }
 0x3fa   :  { %6359 = vmatmul.bf16.vlgmr.msra.gmra.mxu0 %v10848_v10  ;;  %v9406_v10 = vld [vmem:[#allocation14 + $0xcc8] sm:$0xf] }
 0x3fb   :  { %v9407_v15 = vor.u32 %v10296_v13, %v9406_v10  ;;  %v6153_v32 = vadd.f32 %v6152_v17, %v6140_v21 }
 0x3fc   :  { %6365 = vmatpush.bf16.msra.mxu1 %v9519_v25  ;;  %v6191_v44 = vpop.f32.mrf.mxu3  ;;  %v6115_v28 = vpop.f32.mrf.mxu1 }
 0x3fd   :  { %v6154_v12 = vpop.f32.mrf.mxu0 }
 0x400   :  { %6366 = vmatpush.bf16.msra.mxu1 %v9491_v59  ;;  %v6178_v43 = vpop.f32.mrf.mxu2 }
 0x401   :  { %v6179_v42 = vadd.f32 %v6178_v43, %v3336_v23 }
 0x403   :  { %v6192_v39 = vadd.f32 %v6191_v44, %v6179_v42 }
 0x404   :  { %6367 = vmatpush.bf16.msra.mxu1 %v9463_v8  ;;  %v6193_v31 = vpop.f32.mrf.mxu3 }
 0x408   :  { %6368 = vmatpush.bf16.msra.mxu1 %v9435_v36  ;;  %v6180_v11 = vpop.f32.mrf.mxu2 }
 0x40c   :  { %6369 = vmatpush.bf16.msra.mxu1 %v9407_v15 }
 0x410   :  { %6370 = vmatpush.bf16.msra.mxu1 %v9379_v40 }
 0x414   :  { %6371 = vmatpush.bf16.msra.mxu1 %v9351_v20  ;;  %v6165_v61 = vpop.f32.mrf.mxu1 }
 0x415   :  { %v6166_v30 = vadd.f32 %v6165_v61, %v6153_v32 }
 0x417   :  { %6372 = vmatmul.bf16.vlgmr.msra.gmra.mxu1 %v10855_v58  ;;  %v6204_v33 = vpop.f32.mrf.mxu0  ;;  %10358 = vtanh.f32 %v6166_v30  ;;  %v3337_v58 = vperm.slane %v10958_v18, 6 }
 0x418   :  { %v6205_v54 = vadd.f32 %v6204_v33, %v6192_v39 }
 0x41c   :  { %v6167_v41 = vpop.f32.mrf.mxu1 }
 0x41d   :  { %v10359_v27 = vpop.eup %10358 }
 0x41e   :  { %v6243_v45 = vpop.f32.mrf.mxu3  ;;  %6388 = vst [vmem:[#allocation17 + $0x20] sm:$0xff] %v10359_v27 }
 0x41f   :  { %v6206_v46 = vpop.f32.mrf.mxu0 }
 0x420   :  { %v6230_v29 = vpop.f32.mrf.mxu2 }
 0x426   :  { %v6245_v47 = vpop.f32.mrf.mxu3 }
 0x428   :  { %v6232_v14 = vpop.f32.mrf.mxu2 }
 0x434   :  { %v6217_v4 = vpop.f32.mrf.mxu1 }
 0x435   :  { %v6218_v56 = vadd.f32 %v6217_v4, %v6205_v54 }
 0x437   :  { %v6256_v52 = vpop.f32.mrf.mxu0  ;;  %v6231_v57 = vadd.f32 %v6230_v29, %v6218_v56 }
 0x439   :  { %v6244_v60 = vadd.f32 %v6243_v45, %v6231_v57 }
 0x43b   :  { %v6257_v63 = vadd.f32 %v6256_v52, %v6244_v60 }
 0x43c   :  { %v6219_v50 = vpop.f32.mrf.mxu1 }
 0x43e   :  { %v6295_v37 = vpop.f32.mrf.mxu3 }
 0x43f   :  { %v6258_v53 = vpop.f32.mrf.mxu0 }
 0x440   :  { %v6282_v48 = vpop.f32.mrf.mxu2 }
 0x441   :  { %v6283_v49 = vadd.f32 %v6282_v48, %v3337_v58 }
 0x443   :  { %v6296_v51 = vadd.f32 %v6295_v37, %v6283_v49 }
 0x446   :  { %v6297_v55 = vpop.f32.mrf.mxu3 }
 0x448   :  { %v6284_v38 = vpop.f32.mrf.mxu2 }
 0x454   :  { %v6269_v25 = vpop.f32.mrf.mxu1 }
 0x455   :  { %v6270_v3 = vadd.f32 %v6269_v25, %v6257_v63 }
 0x457   :  { %v6308_v19 = vpop.f32.mrf.mxu0  ;;  %10360 = vtanh.f32 %v6270_v3 }
 0x458   :  { %v6309_v17 = vadd.f32 %v6308_v19, %v6296_v51 }
 0x45c   :  { %v6271_v18 = vpop.f32.mrf.mxu1 }
 0x45d   :  { %v10361_v5 = vpop.eup %10360 }
 0x45e   :  { %v6347_v59 = vpop.f32.mrf.mxu3  ;;  %6389 = vst [vmem:[#allocation17 + $0x28] sm:$0xff] %v10361_v5 }
 0x45f   :  { %v6310_v35 = vpop.f32.mrf.mxu0 }
 0x460   :  { %v6334_v0 = vpop.f32.mrf.mxu2 }
 0x466   :  { %v6349_v8 = vpop.f32.mrf.mxu3 }
 0x468   :  { %v6336_v62 = vpop.f32.mrf.mxu2 }
 0x474   :  { %v6321_v2 = vpop.f32.mrf.mxu1 }
 0x475   :  { %v6322_v36 = vadd.f32 %v6321_v2, %v6309_v17 }
 0x477   :  { %v6360_v24 = vpop.f32.mrf.mxu0  ;;  %v6335_v23 = vadd.f32 %v6334_v0, %v6322_v36 }
 0x479   :  { %v6348_v10 = vadd.f32 %v6347_v59, %v6335_v23 }
 0x47b   :  { %v6361_v13 = vadd.f32 %v6360_v24, %v6348_v10 }
 0x47c   :  { %v6323_v1 = vpop.f32.mrf.mxu1 }
 0x47f   :  { %v6362_v43 = vpop.f32.mrf.mxu0 }
 0x494   :  { %v6373_v15 = vpop.f32.mrf.mxu1 }
 0x495   :  { %v6374_v42 = vadd.f32 %v6373_v15, %v6361_v13 }
 0x497   :  { %10362 = vtanh.f32 %v6374_v42 }
 0x49c   :  { %v6375_v16 = vpop.f32.mrf.mxu1 }
 0x49d   :  { %v10363_v6 = vpop.eup %10362 }
 0x49e   :  { %6390 = vst [vmem:[#allocation17 + $0x30] sm:$0xff] %v10363_v6 }
 0x49f   :  { %6401 = dma.vmem_to_hbm [thread:$0]  %s6397_s8, 896, %s6399_s13, [#allocation4]  }
 0x4a0   :  { %10617 = dma.done.wait [#allocation4], 896  }
 0x4a1   :  { %10618 = vsyncadd [#allocation4], 4294966400 }
 0x4a2   :  { %6406 = vsyncpa [#allocation3], 1 }
 0x4a3   :  { %6407 = vsyncpa [#allocation6], 1 }
 0x4a4   :  { %6408 = vsyncpa [#allocation9], 1 }
 0x4a5   :  { %6409 = vsyncpa [#allocation12], 1 }
 0x4a6   :  { %6410 = vsyncpa [#allocation15], 1 }
 0x4a7   :  { %6411 = vsyncpa [#allocation4], 1 }

</bundles_post_ra>
